<compile_context>
chip_gen: v7x
topology: tpu7x:2x2x1
jax: 0.10.0
libtpu: 0.0.40
codegen_flags: <defaults>
</compile_context>

<pallas_src>
import functools

import jax
import jax.numpy as jnp
import numpy as np
from jax.experimental import pallas as pl
from jax.experimental.pallas import tpu as pltpu

# ----------------------------- configuration --------------------------------
D      = 32     # id_dimension
L_GRU  = 2      # gru_layers_num (wavefront schedule below is specialised to 2)
L_MLP  = 2      # mlp_layers
VOCAB  = 100    # id_vocab
VPAD   = 128    # vocab padded to a full lane tile for the one-hot gathers
B      = 4      # batch
S      = 8      # sequence length
E      = L_MLP * D * D   # flat generated-weight width
OUT_L  = 128    # lane-dense (padded) score output width


# --------------------------- fused forward kernel ----------------------------
def gru4rec_kernel(ids_ref, tgt_ref, emb_ref, pos_ref, ab_ref,
                   wx0_ref, wh0x1_ref, wh1_ref,
                   wz_ref, bz_ref, wg_ref, bg_ref,
                   w1_ref, b1_ref, w2_ref, b2_ref,
                   out_ref):
    f32, bf16 = jnp.float32, jnp.bfloat16

    ids = ids_ref[...]                                             # (B, S) i32
    lengths = jnp.sum((ids != 0).astype(jnp.int32), axis=1,
                      keepdims=True)                               # (B, 1) i32
    lengths_f = lengths.astype(f32)

    emb = emb_ref[...]                                             # (VPAD, D) bf16
    vocab_iota = jax.lax.broadcasted_iota(jnp.int32, (B, VPAD), 1)

    def onehot(idx):                                               # idx: (B,1) i32
        return jnp.where(vocab_iota == idx, 1.0, 0.0).astype(bf16)

    # -------- hoisted phase (independent of the recurrent state) -------------
    # one-hot embedding gathers, layer-0 gate pre-activations for every step,
    # and the position-weighted history row at the last valid position.
    wx0 = wx0_ref[...]                                             # (D, 3D) bf16
    gx0 = []
    hist_last = jnp.zeros((B, D), f32)
    for t in range(S):
        x_t = jnp.dot(onehot(ids[:, t:t + 1]), emb,
                      preferred_element_type=f32)                  # (B, D)
        gx0.append(jnp.dot(x_t.astype(bf16), wx0,
                           preferred_element_type=f32))            # (B, 3D)
        is_last = (lengths == t + 1).astype(f32)                   # (B, 1)
        hist_last = hist_last + is_last * (x_t + pos_ref[t:t + 1, :])

    # target_trans: Tanh dense -> linear dense (off the recurrence path)
    t_raw = jnp.dot(onehot(tgt_ref[...]), emb, preferred_element_type=f32)
    tt = jnp.tanh(jnp.dot(t_raw.astype(bf16), w1_ref[...],
                          preferred_element_type=f32) + b1_ref[...])
    t_emb = jnp.dot(tt.astype(bf16), w2_ref[...],
                    preferred_element_type=f32) + b2_ref[...]      # (B, D)

    # HyperNetwork summarizer (last valid position only) + weight generation
    alpha = ab_ref[:, 0:1]
    beta = ab_ref[:, 1:2]
    pw = alpha * jnp.exp((lengths_f - float(S)) / beta)            # (B, 1)
    whist = hist_last * pw                                         # (B, D)
    z = jnp.tanh(jnp.dot(whist.astype(bf16), wz_ref[...],
                         preferred_element_type=f32) + bz_ref[...])
    gen = jnp.dot(z.astype(bf16), wg_ref[...],
                  preferred_element_type=f32) + bg_ref[...]        # (B, E)

    # -------- 2-layer GRU recurrence, wavefront schedule ----------------------
    # wave w: layer-0 step t=w and layer-1 step t=w-1.  All matmuls of a wave
    # depend only on the previous wave's state -> one dependent MXU round trip
    # per wave.  gh0 and gx1 share the LHS h0[w-1], so they are one fused push
    # against [whh0 | wih1]; gh1 is a second, independent push.
    wh0x1 = wh0x1_ref[...]                 # (D, 6D) bf16  = [whh0 | wih1]
    wh1 = wh1_ref[...]                     # (D, 3D) bf16  =  whh1

    def gru_cell(gx, gh, h_prev, m):
        rz = jax.nn.sigmoid(gx[:, :2 * D] + gh[:, :2 * D])   # fused (r,z) slab
        r, zg = rz[:, :D], rz[:, D:2 * D]
        n = jnp.tanh(gx[:, 2 * D:] + r * gh[:, 2 * D:])
        h_new = (1.0 - zg) * n + zg * h_prev
        # packed-sequence semantics: freeze hidden state past seq_len
        return m * h_new + (1.0 - m) * h_prev

    h0 = jnp.zeros((B, D), f32)
    h1 = jnp.zeros((B, D), f32)
    for w in range(S + 1):                  # static unroll, S compile-time
        if w >= 1:                          # matmuls at wave top
            g01 = jnp.dot(h0.astype(bf16), wh0x1, preferred_element_type=f32)
            gx1 = g01[:, 3 * D:]
            gh1 = (jnp.dot(h1.astype(bf16), wh1, preferred_element_type=f32)
                   if w >= 2 else jnp.zeros((B, 3 * D), f32))
        if w < S:                           # layer-0, step t = w
            gh0 = g01[:, :3 * D] if w >= 1 else jnp.zeros((B, 3 * D), f32)
            h0_new = gru_cell(gx0[w], gh0, h0, (lengths > w).astype(f32))
        if w >= 1:                          # layer-1, step t = w - 1
            h1 = gru_cell(gx1, gh1, h1, (lengths > (w - 1)).astype(f32))
        if w < S:
            h0 = h0_new
    user_state = h1                                                # (B, D)

    # -------- per-sample generated MLP on the flat gen tensor (pure VPU) ------
    # out[b, e] = sum_d x[b, d] * gen[b, l*D*D + d*D + e]
    x = user_state
    for l in range(L_MLP):
        base = l * D * D
        acc = jnp.zeros((B, D), f32)
        for d in range(D):
            acc = acc + x[:, d:d + 1] * gen[:, base + d * D: base + (d + 1) * D]
        x = jnp.tanh(acc) if l < L_MLP - 1 else acc

    score = jnp.sum(x * t_emb, axis=1, keepdims=True)              # (B, 1)
    out_ref[...] = jnp.broadcast_to(score, (B, OUT_L))             # lane-dense


# ------------------------------- full forward --------------------------------
def gru4rec_forward(params, item_seq, target_id):
    bf16 = jnp.bfloat16
    wih, whh = params["gru_wih_f"], params["gru_whh_f"]            # (L, D, 3D)

    # one-time weight prep: bf16 MXU operands, shared-LHS packing, vocab pad.
    emb_pad = jnp.pad(params["id_emb"],
                      ((0, VPAD - VOCAB), (0, 0))).astype(bf16)    # (VPAD, D)
    w_x0 = wih[0].astype(bf16)                                     # (D, 3D)
    w_h0x1 = jnp.concatenate([whh[0], wih[1]], axis=1).astype(bf16)  # (D, 6D)
    w_h1 = whh[1].astype(bf16)                                     # (D, 3D)
    ab = jnp.reshape(jnp.stack([params["alpha"], params["beta"]]),
                     (1, 2)).astype(jnp.float32)

    out = pl.pallas_call(
        gru4rec_kernel,
        out_shape=jax.ShapeDtypeStruct((B, OUT_L), jnp.float32),
        grid=(1,),
        in_specs=[
            pl.BlockSpec((B, S), lambda i: (0, 0)),                # item ids
            pl.BlockSpec((B, 1), lambda i: (0, 0)),                # target id
            pl.BlockSpec((VPAD, D), lambda i: (0, 0)),             # id_emb (bf16)
            pl.BlockSpec((S, D), lambda i: (0, 0)),                # pos_emb[:S]
            pl.BlockSpec((1, 2), lambda i: (0, 0)),                # alpha, beta
            pl.BlockSpec((D, 3 * D), lambda i: (0, 0)),            # wih layer 0
            pl.BlockSpec((D, 6 * D), lambda i: (0, 0)),            # [whh0 | wih1]
            pl.BlockSpec((D, 3 * D), lambda i: (0, 0)),            # whh1
            pl.BlockSpec((D, D), lambda i: (0, 0)),                # hyper wz
            pl.BlockSpec((1, D), lambda i: (0, 0)),                # hyper bz
            pl.BlockSpec((D, E), lambda i: (0, 0)),                # hyper wg
            pl.BlockSpec((1, E), lambda i: (0, 0)),                # hyper bg
            pl.BlockSpec((D, D), lambda i: (0, 0)),                # tt w1
            pl.BlockSpec((1, D), lambda i: (0, 0)),                # tt b1
            pl.BlockSpec((D, D), lambda i: (0, 0)),                # tt w2
            pl.BlockSpec((1, D), lambda i: (0, 0)),                # tt b2
        ],
        out_specs=pl.BlockSpec((B, OUT_L), lambda i: (0, 0)),
        compiler_params=pltpu.CompilerParams(
            dimension_semantics=("arbitrary",),
            # tiny kernel; explicit limit keeps the same tiling safe on v7x
            vmem_limit_bytes=32 * 1024 * 1024),
    )(item_seq.astype(jnp.int32),
      target_id.astype(jnp.int32).reshape(B, 1),
      emb_pad,
      params["pos_emb"][:S],
      ab,
      w_x0, w_h0x1, w_h1,
      params["hyper_wz_t"].astype(bf16), params["hyper_bz"],
      params["hyper_wg_t"].astype(bf16), params["hyper_bg"],
      params["tt_w1_t"].astype(bf16), params["tt_b1"],
      params["tt_w2_t"].astype(bf16), params["tt_b2"])
    return out[:, :1]                                              # (B, 1)


# ----------------------------- pure-JAX reference ----------------------------
def reference_forward(params, item_seq, target_id):
    hp = jax.lax.Precision.HIGHEST
    dot = functools.partial(jnp.dot, precision=hp)

    mask = (item_seq != 0)
    mask_f = mask.astype(jnp.float32)
    seq_length = jnp.sum(mask.astype(jnp.int32), axis=1)
    positions = jnp.tile(jnp.arange(S, dtype=jnp.int32)[None, :], (B, 1))

    seq_emb = params["id_emb"][item_seq]
    target_raw = params["id_emb"][target_id]
    pos_e = params["pos_emb"][positions]
    pos_w = params["alpha"] * jnp.exp(
        (positions.astype(jnp.float32) + 1.0 - S) / params["beta"])
    pos_w = (pos_w * mask_f)[..., None]

    # GRU with mask-carry (equivalent to pack_padded + gather at seq_len-1)
    wih, whh = params["gru_wih_f"], params["gru_whh_f"]   # (L, D, 3D)
    h = [jnp.zeros((B, D), jnp.float32) for _ in range(L_GRU)]
    for t in range(S):
        x = seq_emb[:, t, :]
        m = mask_f[:, t][:, None]
        for l in range(L_GRU):
            hl = h[l]
            gx = dot(x, wih[l])
            gh = dot(hl, whh[l])
            r = jax.nn.sigmoid(gx[:, :D] + gh[:, :D])
            zg = jax.nn.sigmoid(gx[:, D:2 * D] + gh[:, D:2 * D])
            n = jnp.tanh(gx[:, 2 * D:] + r * gh[:, 2 * D:])
            h_new = (1.0 - zg) * n + zg * hl
            h_upd = m * h_new + (1.0 - m) * hl
            h[l] = h_upd
            x = h_upd
    user_state = h[-1]

    t_ = jnp.tanh(dot(target_raw, params["tt_w1_t"]) + params["tt_b1"])
    target_embed = dot(t_, params["tt_w2_t"]) + params["tt_b2"]

    whist = (seq_emb + pos_e) * pos_w
    zs = jnp.tanh(dot(whist.reshape(B * S, D), params["hyper_wz_t"])
                  + params["hyper_bz"]).reshape(B, S, D)
    z = zs[jnp.arange(B), seq_length - 1]
    gen = (dot(z, params["hyper_wg_t"]) + params["hyper_bg"]).reshape(B, L_MLP, D, D)

    x = user_state
    for l in range(L_MLP):
        x = jnp.einsum("bd,bde->be", x, gen[:, l], precision=hp)
        if l < L_MLP - 1:
            x = jnp.tanh(x)
    return jnp.sum(x * target_embed, axis=1, keepdims=True)


# ------------------------------ parameter init --------------------------------
def init_params(key):
    ks = jax.random.split(key, 12)

    def kaiming(k, shape, fan_in):
        return (jnp.sqrt(2.0 / fan_in) * jax.random.normal(k, shape)).astype(jnp.float32)

    p = {
        "id_emb":     kaiming(ks[0], (VOCAB, D), D),
        "pos_emb":    kaiming(ks[1], (VOCAB, D), D),
        # fused GRU gate weights, pre-transposed, gate order (r, z, n) on last axis
        "gru_wih_f":  (0.1 * jax.random.normal(ks[2], (L_GRU, D, 3 * D))).astype(jnp.float32),
        "gru_whh_f":  (0.1 * jax.random.normal(ks[3], (L_GRU, D, 3 * D))).astype(jnp.float32),
        "tt_w1_t":    kaiming(ks[4], (D, D), D),
        "tt_b1":      (0.01 * jax.random.normal(ks[5], (1, D))).astype(jnp.float32),
        "tt_w2_t":    kaiming(ks[6], (D, D), D),
        "tt_b2":      (0.01 * jax.random.normal(ks[7], (1, D))).astype(jnp.float32),
        "hyper_wz_t": kaiming(ks[8], (D, D), D),
        "hyper_bz":   (0.01 * jax.random.normal(ks[9], (1, D))).astype(jnp.float32),
        "hyper_wg_t": kaiming(ks[10], (D, E), D),
        "hyper_bg":   (0.01 * jax.random.normal(ks[11], (1, E))).astype(jnp.float32),
        "alpha":      jnp.float32(1.0),
        "beta":       jnp.float32(1.0),
    }
    return p


# ------------------------------------ main ------------------------------------
if __name__ == "__main__":
    key = jax.random.PRNGKey(0)
    pkey, dkey1, dkey2 = jax.random.split(key, 3)
    params = init_params(pkey)

    # valid prefix then zero padding (pack_padded_sequence assumption)
    lengths = jnp.array([8, 5, 3, 1], dtype=jnp.int32)
    ids = jax.random.randint(dkey1, (B, S), 1, VOCAB, dtype=jnp.int32)
    pos_idx = jnp.arange(S, dtype=jnp.int32)[None, :]
    item_seq = jnp.where(pos_idx < lengths[:, None], ids, 0)
    target_id = jax.random.randint(dkey2, (B,), 1, VOCAB, dtype=jnp.int32)

    out = jax.jit(gru4rec_forward)(params, item_seq, target_id)
    out = jax.block_until_ready(out)

    ref = reference_forward(params, item_seq, target_id)

    out_np = np.asarray(out, dtype=np.float64)
    ref_np = np.asarray(ref, dtype=np.float64)
    err = float(np.max(np.abs(out_np - ref_np)))
    # bf16 MXU operands in the kernel vs a HIGHEST-precision f32 reference:
    # tolerance is scale-aware (~5% of the output magnitude, with a small floor).
    tol = 2e-2 + 5e-2 * float(np.max(np.abs(ref_np)))
    if not np.isfinite(err) or err > tol:
        raise AssertionError(
            f"Pallas output mismatch (max err {err:.4f}, tol {tol:.4f}):\n"
            f"{out_np}\nvs reference\n{ref_np}")

    print("KERNEL_OK")
</pallas_src>

<mosaic_0001>
module attributes {stable_mosaic.version = 11 : i64} {
  func.func @gru4rec_kernel(%arg0: i32, %arg1: memref<4x8xi32, #tpu.memory_space<vmem>>, %arg2: memref<4x1xi32, #tpu.memory_space<vmem>>, %arg3: memref<128x32xbf16, #tpu.memory_space<vmem>>, %arg4: memref<8x32xf32, #tpu.memory_space<vmem>>, %arg5: memref<1x2xf32, #tpu.memory_space<vmem>>, %arg6: memref<32x96xbf16, #tpu.memory_space<vmem>>, %arg7: memref<32x192xbf16, #tpu.memory_space<vmem>>, %arg8: memref<32x96xbf16, #tpu.memory_space<vmem>>, %arg9: memref<32x32xbf16, #tpu.memory_space<vmem>>, %arg10: memref<1x32xf32, #tpu.memory_space<vmem>>, %arg11: memref<32x2048xbf16, #tpu.memory_space<vmem>>, %arg12: memref<1x2048xf32, #tpu.memory_space<vmem>>, %arg13: memref<32x32xbf16, #tpu.memory_space<vmem>>, %arg14: memref<1x32xf32, #tpu.memory_space<vmem>>, %arg15: memref<32x32xbf16, #tpu.memory_space<vmem>>, %arg16: memref<1x32xf32, #tpu.memory_space<vmem>>, %arg17: memref<4x128xf32, #tpu.memory_space<vmem>>) attributes {dimension_semantics = [#tpu.dimension_semantics<arbitrary>], iteration_bounds = array<i64: 1>, scalar_prefetch = 0 : i64, scratch_operands = 0 : i64, tpu.core_type = #tpu.core_type<tc>, window_params = [{pipeline_mode = #tpu.pipeline_mode<synchronous>, transform_indices = @transform_0, window_bounds = array<i64: 4, 8>}, {pipeline_mode = #tpu.pipeline_mode<synchronous>, transform_indices = @transform_1, window_bounds = array<i64: 4, 1>}, {pipeline_mode = #tpu.pipeline_mode<synchronous>, transform_indices = @transform_2, window_bounds = array<i64: 128, 32>}, {pipeline_mode = #tpu.pipeline_mode<synchronous>, transform_indices = @transform_3, window_bounds = array<i64: 8, 32>}, {pipeline_mode = #tpu.pipeline_mode<synchronous>, transform_indices = @transform_4, window_bounds = array<i64: 1, 2>}, {pipeline_mode = #tpu.pipeline_mode<synchronous>, transform_indices = @transform_5, window_bounds = array<i64: 32, 96>}, {pipeline_mode = #tpu.pipeline_mode<synchronous>, transform_indices = @transform_6, window_bounds = array<i64: 32, 192>}, {pipeline_mode = #tpu.pipeline_mode<synchronous>, transform_indices = @transform_7, window_bounds = array<i64: 32, 96>}, {pipeline_mode = #tpu.pipeline_mode<synchronous>, transform_indices = @transform_8, window_bounds = array<i64: 32, 32>}, {pipeline_mode = #tpu.pipeline_mode<synchronous>, transform_indices = @transform_9, window_bounds = array<i64: 1, 32>}, {pipeline_mode = #tpu.pipeline_mode<synchronous>, transform_indices = @transform_10, window_bounds = array<i64: 32, 2048>}, {pipeline_mode = #tpu.pipeline_mode<synchronous>, transform_indices = @transform_11, window_bounds = array<i64: 1, 2048>}, {pipeline_mode = #tpu.pipeline_mode<synchronous>, transform_indices = @transform_12, window_bounds = array<i64: 32, 32>}, {pipeline_mode = #tpu.pipeline_mode<synchronous>, transform_indices = @transform_13, window_bounds = array<i64: 1, 32>}, {pipeline_mode = #tpu.pipeline_mode<synchronous>, transform_indices = @transform_14, window_bounds = array<i64: 32, 32>}, {pipeline_mode = #tpu.pipeline_mode<synchronous>, transform_indices = @transform_15, window_bounds = array<i64: 1, 32>}, {pipeline_mode = #tpu.pipeline_mode<synchronous>, transform_indices = @transform_16, window_bounds = array<i64: 4, 128>}]} {
    %c0 = arith.constant 0 : index
    %c0_0 = arith.constant 0 : index
    %0 = vector.load %arg1[%c0, %c0_0] : memref<4x8xi32, #tpu.memory_space<vmem>>, vector<4x8xi32>
    %c0_i32 = arith.constant 0 : i32
    %1 = vector.broadcast %c0_i32 : i32 to vector<4x8xi32>
    %2 = arith.cmpi ne, %0, %1 : vector<4x8xi32>
    %3 = arith.extui %2 : vector<4x8xi1> to vector<4x8xi32>
    %cst = arith.constant dense<0> : vector<4xi32>
    %4 = vector.multi_reduction <add>, %3, %cst [1] : vector<4x8xi32> to vector<4xi32>
    %5 = vector.shape_cast %4 : vector<4xi32> to vector<4x1xi32>
    %6 = arith.sitofp %5 : vector<4x1xi32> to vector<4x1xf32>
    %c0_1 = arith.constant 0 : index
    %c0_2 = arith.constant 0 : index
    %7 = vector.load %arg3[%c0_1, %c0_2] : memref<128x32xbf16, #tpu.memory_space<vmem>>, vector<128x32xbf16>
    %8 = tpu.iota {dimensions = array<i32: 1>} : vector<4x128xi32>
    %c0_3 = arith.constant 0 : index
    %c0_4 = arith.constant 0 : index
    %9 = vector.load %arg6[%c0_3, %c0_4] : memref<32x96xbf16, #tpu.memory_space<vmem>>, vector<32x96xbf16>
    %cst_5 = arith.constant 0.000000e+00 : f32
    %10 = vector.broadcast %cst_5 : f32 to vector<4x32xf32>
    %11 = vector.extract_strided_slice %0 {offsets = [0, 0], sizes = [4, 1], strides = [1, 1]} : vector<4x8xi32> to vector<4x1xi32>
    %12 = vector.broadcast %11 : vector<4x1xi32> to vector<4x128xi32>
    %13 = arith.cmpi eq, %8, %12 : vector<4x128xi32>
    %cst_6 = arith.constant 1.000000e+00 : f32
    %cst_7 = arith.constant 0.000000e+00 : f32
    %14 = vector.broadcast %cst_6 : f32 to vector<4x128xf32>
    %15 = vector.broadcast %cst_7 : f32 to vector<4x128xf32>
    %16 = arith.select %13, %14, %15 : vector<4x128xi1>, vector<4x128xf32>
    %17 = arith.truncf %16 : vector<4x128xf32> to vector<4x128xbf16>
    %cst_8 = arith.constant dense<0.000000e+00> : vector<4x32xf32>
    %18 = tpu.matmul %17, %7, %cst_8 {dimension_numbers = #tpu.dot_dimension_numbers<[1], [0], [0], [1], [0, 0, 1, 1], [], []>} : vector<4x128xbf16>, vector<128x32xbf16>, vector<4x32xf32> -> vector<4x32xf32>
    %19 = arith.truncf %18 : vector<4x32xf32> to vector<4x32xbf16>
    %cst_9 = arith.constant dense<0.000000e+00> : vector<4x96xf32>
    %20 = tpu.matmul %19, %9, %cst_9 {dimension_numbers = #tpu.dot_dimension_numbers<[1], [0], [0], [1], [0, 0, 1, 1], [], []>} : vector<4x32xbf16>, vector<32x96xbf16>, vector<4x96xf32> -> vector<4x96xf32>
    %c1_i32 = arith.constant 1 : i32
    %21 = vector.broadcast %c1_i32 : i32 to vector<4x1xi32>
    %22 = arith.cmpi eq, %5, %21 : vector<4x1xi32>
    %23 = arith.extui %22 : vector<4x1xi1> to vector<4x1xi32>
    %24 = arith.sitofp %23 : vector<4x1xi32> to vector<4x1xf32>
    %c0_10 = arith.constant 0 : index
    %c0_11 = arith.constant 0 : index
    %25 = vector.load %arg4[%c0_10, %c0_11] : memref<8x32xf32, #tpu.memory_space<vmem>>, vector<1x32xf32>
    %26 = vector.broadcast %25 : vector<1x32xf32> to vector<4x32xf32>
    %27 = arith.addf %18, %26 : vector<4x32xf32>
    %28 = vector.broadcast %24 : vector<4x1xf32> to vector<4x32xf32>
    %29 = arith.mulf %28, %27 : vector<4x32xf32>
    %30 = arith.addf %10, %29 : vector<4x32xf32>
    %31 = vector.extract_strided_slice %0 {offsets = [0, 1], sizes = [4, 1], strides = [1, 1]} : vector<4x8xi32> to vector<4x1xi32>
    %32 = vector.broadcast %31 : vector<4x1xi32> to vector<4x128xi32>
    %33 = arith.cmpi eq, %8, %32 : vector<4x128xi32>
    %cst_12 = arith.constant 1.000000e+00 : f32
    %cst_13 = arith.constant 0.000000e+00 : f32
    %34 = vector.broadcast %cst_12 : f32 to vector<4x128xf32>
    %35 = vector.broadcast %cst_13 : f32 to vector<4x128xf32>
    %36 = arith.select %33, %34, %35 : vector<4x128xi1>, vector<4x128xf32>
    %37 = arith.truncf %36 : vector<4x128xf32> to vector<4x128xbf16>
    %cst_14 = arith.constant dense<0.000000e+00> : vector<4x32xf32>
    %38 = tpu.matmul %37, %7, %cst_14 {dimension_numbers = #tpu.dot_dimension_numbers<[1], [0], [0], [1], [0, 0, 1, 1], [], []>} : vector<4x128xbf16>, vector<128x32xbf16>, vector<4x32xf32> -> vector<4x32xf32>
    %39 = arith.truncf %38 : vector<4x32xf32> to vector<4x32xbf16>
    %cst_15 = arith.constant dense<0.000000e+00> : vector<4x96xf32>
    %40 = tpu.matmul %39, %9, %cst_15 {dimension_numbers = #tpu.dot_dimension_numbers<[1], [0], [0], [1], [0, 0, 1, 1], [], []>} : vector<4x32xbf16>, vector<32x96xbf16>, vector<4x96xf32> -> vector<4x96xf32>
    %c2_i32 = arith.constant 2 : i32
    %41 = vector.broadcast %c2_i32 : i32 to vector<4x1xi32>
    %42 = arith.cmpi eq, %5, %41 : vector<4x1xi32>
    %43 = arith.extui %42 : vector<4x1xi1> to vector<4x1xi32>
    %44 = arith.sitofp %43 : vector<4x1xi32> to vector<4x1xf32>
    %c1 = arith.constant 1 : index
    %c0_16 = arith.constant 0 : index
    %45 = vector.load %arg4[%c1, %c0_16] : memref<8x32xf32, #tpu.memory_space<vmem>>, vector<1x32xf32>
    %46 = vector.broadcast %45 : vector<1x32xf32> to vector<4x32xf32>
    %47 = arith.addf %38, %46 : vector<4x32xf32>
    %48 = vector.broadcast %44 : vector<4x1xf32> to vector<4x32xf32>
    %49 = arith.mulf %48, %47 : vector<4x32xf32>
    %50 = arith.addf %30, %49 : vector<4x32xf32>
    %51 = vector.extract_strided_slice %0 {offsets = [0, 2], sizes = [4, 1], strides = [1, 1]} : vector<4x8xi32> to vector<4x1xi32>
    %52 = vector.broadcast %51 : vector<4x1xi32> to vector<4x128xi32>
    %53 = arith.cmpi eq, %8, %52 : vector<4x128xi32>
    %cst_17 = arith.constant 1.000000e+00 : f32
    %cst_18 = arith.constant 0.000000e+00 : f32
    %54 = vector.broadcast %cst_17 : f32 to vector<4x128xf32>
    %55 = vector.broadcast %cst_18 : f32 to vector<4x128xf32>
    %56 = arith.select %53, %54, %55 : vector<4x128xi1>, vector<4x128xf32>
    %57 = arith.truncf %56 : vector<4x128xf32> to vector<4x128xbf16>
    %cst_19 = arith.constant dense<0.000000e+00> : vector<4x32xf32>
    %58 = tpu.matmul %57, %7, %cst_19 {dimension_numbers = #tpu.dot_dimension_numbers<[1], [0], [0], [1], [0, 0, 1, 1], [], []>} : vector<4x128xbf16>, vector<128x32xbf16>, vector<4x32xf32> -> vector<4x32xf32>
    %59 = arith.truncf %58 : vector<4x32xf32> to vector<4x32xbf16>
    %cst_20 = arith.constant dense<0.000000e+00> : vector<4x96xf32>
    %60 = tpu.matmul %59, %9, %cst_20 {dimension_numbers = #tpu.dot_dimension_numbers<[1], [0], [0], [1], [0, 0, 1, 1], [], []>} : vector<4x32xbf16>, vector<32x96xbf16>, vector<4x96xf32> -> vector<4x96xf32>
    %c3_i32 = arith.constant 3 : i32
    %61 = vector.broadcast %c3_i32 : i32 to vector<4x1xi32>
    %62 = arith.cmpi eq, %5, %61 : vector<4x1xi32>
    %63 = arith.extui %62 : vector<4x1xi1> to vector<4x1xi32>
    %64 = arith.sitofp %63 : vector<4x1xi32> to vector<4x1xf32>
    %c2 = arith.constant 2 : index
    %c0_21 = arith.constant 0 : index
    %65 = vector.load %arg4[%c2, %c0_21] : memref<8x32xf32, #tpu.memory_space<vmem>>, vector<1x32xf32>
    %66 = vector.broadcast %65 : vector<1x32xf32> to vector<4x32xf32>
    %67 = arith.addf %58, %66 : vector<4x32xf32>
    %68 = vector.broadcast %64 : vector<4x1xf32> to vector<4x32xf32>
    %69 = arith.mulf %68, %67 : vector<4x32xf32>
    %70 = arith.addf %50, %69 : vector<4x32xf32>
    %71 = vector.extract_strided_slice %0 {offsets = [0, 3], sizes = [4, 1], strides = [1, 1]} : vector<4x8xi32> to vector<4x1xi32>
    %72 = vector.broadcast %71 : vector<4x1xi32> to vector<4x128xi32>
    %73 = arith.cmpi eq, %8, %72 : vector<4x128xi32>
    %cst_22 = arith.constant 1.000000e+00 : f32
    %cst_23 = arith.constant 0.000000e+00 : f32
    %74 = vector.broadcast %cst_22 : f32 to vector<4x128xf32>
    %75 = vector.broadcast %cst_23 : f32 to vector<4x128xf32>
    %76 = arith.select %73, %74, %75 : vector<4x128xi1>, vector<4x128xf32>
    %77 = arith.truncf %76 : vector<4x128xf32> to vector<4x128xbf16>
    %cst_24 = arith.constant dense<0.000000e+00> : vector<4x32xf32>
    %78 = tpu.matmul %77, %7, %cst_24 {dimension_numbers = #tpu.dot_dimension_numbers<[1], [0], [0], [1], [0, 0, 1, 1], [], []>} : vector<4x128xbf16>, vector<128x32xbf16>, vector<4x32xf32> -> vector<4x32xf32>
    %79 = arith.truncf %78 : vector<4x32xf32> to vector<4x32xbf16>
    %cst_25 = arith.constant dense<0.000000e+00> : vector<4x96xf32>
    %80 = tpu.matmul %79, %9, %cst_25 {dimension_numbers = #tpu.dot_dimension_numbers<[1], [0], [0], [1], [0, 0, 1, 1], [], []>} : vector<4x32xbf16>, vector<32x96xbf16>, vector<4x96xf32> -> vector<4x96xf32>
    %c4_i32 = arith.constant 4 : i32
    %81 = vector.broadcast %c4_i32 : i32 to vector<4x1xi32>
    %82 = arith.cmpi eq, %5, %81 : vector<4x1xi32>
    %83 = arith.extui %82 : vector<4x1xi1> to vector<4x1xi32>
    %84 = arith.sitofp %83 : vector<4x1xi32> to vector<4x1xf32>
    %c3 = arith.constant 3 : index
    %c0_26 = arith.constant 0 : index
    %85 = vector.load %arg4[%c3, %c0_26] : memref<8x32xf32, #tpu.memory_space<vmem>>, vector<1x32xf32>
    %86 = vector.broadcast %85 : vector<1x32xf32> to vector<4x32xf32>
    %87 = arith.addf %78, %86 : vector<4x32xf32>
    %88 = vector.broadcast %84 : vector<4x1xf32> to vector<4x32xf32>
    %89 = arith.mulf %88, %87 : vector<4x32xf32>
    %90 = arith.addf %70, %89 : vector<4x32xf32>
    %91 = vector.extract_strided_slice %0 {offsets = [0, 4], sizes = [4, 1], strides = [1, 1]} : vector<4x8xi32> to vector<4x1xi32>
    %92 = vector.broadcast %91 : vector<4x1xi32> to vector<4x128xi32>
    %93 = arith.cmpi eq, %8, %92 : vector<4x128xi32>
    %cst_27 = arith.constant 1.000000e+00 : f32
    %cst_28 = arith.constant 0.000000e+00 : f32
    %94 = vector.broadcast %cst_27 : f32 to vector<4x128xf32>
    %95 = vector.broadcast %cst_28 : f32 to vector<4x128xf32>
    %96 = arith.select %93, %94, %95 : vector<4x128xi1>, vector<4x128xf32>
    %97 = arith.truncf %96 : vector<4x128xf32> to vector<4x128xbf16>
    %cst_29 = arith.constant dense<0.000000e+00> : vector<4x32xf32>
    %98 = tpu.matmul %97, %7, %cst_29 {dimension_numbers = #tpu.dot_dimension_numbers<[1], [0], [0], [1], [0, 0, 1, 1], [], []>} : vector<4x128xbf16>, vector<128x32xbf16>, vector<4x32xf32> -> vector<4x32xf32>
    %99 = arith.truncf %98 : vector<4x32xf32> to vector<4x32xbf16>
    %cst_30 = arith.constant dense<0.000000e+00> : vector<4x96xf32>
    %100 = tpu.matmul %99, %9, %cst_30 {dimension_numbers = #tpu.dot_dimension_numbers<[1], [0], [0], [1], [0, 0, 1, 1], [], []>} : vector<4x32xbf16>, vector<32x96xbf16>, vector<4x96xf32> -> vector<4x96xf32>
    %c5_i32 = arith.constant 5 : i32
    %101 = vector.broadcast %c5_i32 : i32 to vector<4x1xi32>
    %102 = arith.cmpi eq, %5, %101 : vector<4x1xi32>
    %103 = arith.extui %102 : vector<4x1xi1> to vector<4x1xi32>
    %104 = arith.sitofp %103 : vector<4x1xi32> to vector<4x1xf32>
    %c4 = arith.constant 4 : index
    %c0_31 = arith.constant 0 : index
    %105 = vector.load %arg4[%c4, %c0_31] : memref<8x32xf32, #tpu.memory_space<vmem>>, vector<1x32xf32>
    %106 = vector.broadcast %105 : vector<1x32xf32> to vector<4x32xf32>
    %107 = arith.addf %98, %106 : vector<4x32xf32>
    %108 = vector.broadcast %104 : vector<4x1xf32> to vector<4x32xf32>
    %109 = arith.mulf %108, %107 : vector<4x32xf32>
    %110 = arith.addf %90, %109 : vector<4x32xf32>
    %111 = vector.extract_strided_slice %0 {offsets = [0, 5], sizes = [4, 1], strides = [1, 1]} : vector<4x8xi32> to vector<4x1xi32>
    %112 = vector.broadcast %111 : vector<4x1xi32> to vector<4x128xi32>
    %113 = arith.cmpi eq, %8, %112 : vector<4x128xi32>
    %cst_32 = arith.constant 1.000000e+00 : f32
    %cst_33 = arith.constant 0.000000e+00 : f32
    %114 = vector.broadcast %cst_32 : f32 to vector<4x128xf32>
    %115 = vector.broadcast %cst_33 : f32 to vector<4x128xf32>
    %116 = arith.select %113, %114, %115 : vector<4x128xi1>, vector<4x128xf32>
    %117 = arith.truncf %116 : vector<4x128xf32> to vector<4x128xbf16>
    %cst_34 = arith.constant dense<0.000000e+00> : vector<4x32xf32>
    %118 = tpu.matmul %117, %7, %cst_34 {dimension_numbers = #tpu.dot_dimension_numbers<[1], [0], [0], [1], [0, 0, 1, 1], [], []>} : vector<4x128xbf16>, vector<128x32xbf16>, vector<4x32xf32> -> vector<4x32xf32>
    %119 = arith.truncf %118 : vector<4x32xf32> to vector<4x32xbf16>
    %cst_35 = arith.constant dense<0.000000e+00> : vector<4x96xf32>
    %120 = tpu.matmul %119, %9, %cst_35 {dimension_numbers = #tpu.dot_dimension_numbers<[1], [0], [0], [1], [0, 0, 1, 1], [], []>} : vector<4x32xbf16>, vector<32x96xbf16>, vector<4x96xf32> -> vector<4x96xf32>
    %c6_i32 = arith.constant 6 : i32
    %121 = vector.broadcast %c6_i32 : i32 to vector<4x1xi32>
    %122 = arith.cmpi eq, %5, %121 : vector<4x1xi32>
    %123 = arith.extui %122 : vector<4x1xi1> to vector<4x1xi32>
    %124 = arith.sitofp %123 : vector<4x1xi32> to vector<4x1xf32>
    %c5 = arith.constant 5 : index
    %c0_36 = arith.constant 0 : index
    %125 = vector.load %arg4[%c5, %c0_36] : memref<8x32xf32, #tpu.memory_space<vmem>>, vector<1x32xf32>
    %126 = vector.broadcast %125 : vector<1x32xf32> to vector<4x32xf32>
    %127 = arith.addf %118, %126 : vector<4x32xf32>
    %128 = vector.broadcast %124 : vector<4x1xf32> to vector<4x32xf32>
    %129 = arith.mulf %128, %127 : vector<4x32xf32>
    %130 = arith.addf %110, %129 : vector<4x32xf32>
    %131 = vector.extract_strided_slice %0 {offsets = [0, 6], sizes = [4, 1], strides = [1, 1]} : vector<4x8xi32> to vector<4x1xi32>
    %132 = vector.broadcast %131 : vector<4x1xi32> to vector<4x128xi32>
    %133 = arith.cmpi eq, %8, %132 : vector<4x128xi32>
    %cst_37 = arith.constant 1.000000e+00 : f32
    %cst_38 = arith.constant 0.000000e+00 : f32
    %134 = vector.broadcast %cst_37 : f32 to vector<4x128xf32>
    %135 = vector.broadcast %cst_38 : f32 to vector<4x128xf32>
    %136 = arith.select %133, %134, %135 : vector<4x128xi1>, vector<4x128xf32>
    %137 = arith.truncf %136 : vector<4x128xf32> to vector<4x128xbf16>
    %cst_39 = arith.constant dense<0.000000e+00> : vector<4x32xf32>
    %138 = tpu.matmul %137, %7, %cst_39 {dimension_numbers = #tpu.dot_dimension_numbers<[1], [0], [0], [1], [0, 0, 1, 1], [], []>} : vector<4x128xbf16>, vector<128x32xbf16>, vector<4x32xf32> -> vector<4x32xf32>
    %139 = arith.truncf %138 : vector<4x32xf32> to vector<4x32xbf16>
    %cst_40 = arith.constant dense<0.000000e+00> : vector<4x96xf32>
    %140 = tpu.matmul %139, %9, %cst_40 {dimension_numbers = #tpu.dot_dimension_numbers<[1], [0], [0], [1], [0, 0, 1, 1], [], []>} : vector<4x32xbf16>, vector<32x96xbf16>, vector<4x96xf32> -> vector<4x96xf32>
    %c7_i32 = arith.constant 7 : i32
    %141 = vector.broadcast %c7_i32 : i32 to vector<4x1xi32>
    %142 = arith.cmpi eq, %5, %141 : vector<4x1xi32>
    %143 = arith.extui %142 : vector<4x1xi1> to vector<4x1xi32>
    %144 = arith.sitofp %143 : vector<4x1xi32> to vector<4x1xf32>
    %c6 = arith.constant 6 : index
    %c0_41 = arith.constant 0 : index
    %145 = vector.load %arg4[%c6, %c0_41] : memref<8x32xf32, #tpu.memory_space<vmem>>, vector<1x32xf32>
    %146 = vector.broadcast %145 : vector<1x32xf32> to vector<4x32xf32>
    %147 = arith.addf %138, %146 : vector<4x32xf32>
    %148 = vector.broadcast %144 : vector<4x1xf32> to vector<4x32xf32>
    %149 = arith.mulf %148, %147 : vector<4x32xf32>
    %150 = arith.addf %130, %149 : vector<4x32xf32>
    %151 = vector.extract_strided_slice %0 {offsets = [0, 7], sizes = [4, 1], strides = [1, 1]} : vector<4x8xi32> to vector<4x1xi32>
    %152 = vector.broadcast %151 : vector<4x1xi32> to vector<4x128xi32>
    %153 = arith.cmpi eq, %8, %152 : vector<4x128xi32>
    %cst_42 = arith.constant 1.000000e+00 : f32
    %cst_43 = arith.constant 0.000000e+00 : f32
    %154 = vector.broadcast %cst_42 : f32 to vector<4x128xf32>
    %155 = vector.broadcast %cst_43 : f32 to vector<4x128xf32>
    %156 = arith.select %153, %154, %155 : vector<4x128xi1>, vector<4x128xf32>
    %157 = arith.truncf %156 : vector<4x128xf32> to vector<4x128xbf16>
    %cst_44 = arith.constant dense<0.000000e+00> : vector<4x32xf32>
    %158 = tpu.matmul %157, %7, %cst_44 {dimension_numbers = #tpu.dot_dimension_numbers<[1], [0], [0], [1], [0, 0, 1, 1], [], []>} : vector<4x128xbf16>, vector<128x32xbf16>, vector<4x32xf32> -> vector<4x32xf32>
    %159 = arith.truncf %158 : vector<4x32xf32> to vector<4x32xbf16>
    %cst_45 = arith.constant dense<0.000000e+00> : vector<4x96xf32>
    %160 = tpu.matmul %159, %9, %cst_45 {dimension_numbers = #tpu.dot_dimension_numbers<[1], [0], [0], [1], [0, 0, 1, 1], [], []>} : vector<4x32xbf16>, vector<32x96xbf16>, vector<4x96xf32> -> vector<4x96xf32>
    %c8_i32 = arith.constant 8 : i32
    %161 = vector.broadcast %c8_i32 : i32 to vector<4x1xi32>
    %162 = arith.cmpi eq, %5, %161 : vector<4x1xi32>
    %163 = arith.extui %162 : vector<4x1xi1> to vector<4x1xi32>
    %164 = arith.sitofp %163 : vector<4x1xi32> to vector<4x1xf32>
    %c7 = arith.constant 7 : index
    %c0_46 = arith.constant 0 : index
    %165 = vector.load %arg4[%c7, %c0_46] : memref<8x32xf32, #tpu.memory_space<vmem>>, vector<1x32xf32>
    %166 = vector.broadcast %165 : vector<1x32xf32> to vector<4x32xf32>
    %167 = arith.addf %158, %166 : vector<4x32xf32>
    %168 = vector.broadcast %164 : vector<4x1xf32> to vector<4x32xf32>
    %169 = arith.mulf %168, %167 : vector<4x32xf32>
    %170 = arith.addf %150, %169 : vector<4x32xf32>
    %c0_47 = arith.constant 0 : index
    %c0_48 = arith.constant 0 : index
    %171 = vector.load %arg2[%c0_47, %c0_48] : memref<4x1xi32, #tpu.memory_space<vmem>>, vector<4x1xi32>
    %172 = vector.broadcast %171 : vector<4x1xi32> to vector<4x128xi32>
    %173 = arith.cmpi eq, %8, %172 : vector<4x128xi32>
    %cst_49 = arith.constant 1.000000e+00 : f32
    %cst_50 = arith.constant 0.000000e+00 : f32
    %174 = vector.broadcast %cst_49 : f32 to vector<4x128xf32>
    %175 = vector.broadcast %cst_50 : f32 to vector<4x128xf32>
    %176 = arith.select %173, %174, %175 : vector<4x128xi1>, vector<4x128xf32>
    %177 = arith.truncf %176 : vector<4x128xf32> to vector<4x128xbf16>
    %cst_51 = arith.constant dense<0.000000e+00> : vector<4x32xf32>
    %178 = tpu.matmul %177, %7, %cst_51 {dimension_numbers = #tpu.dot_dimension_numbers<[1], [0], [0], [1], [0, 0, 1, 1], [], []>} : vector<4x128xbf16>, vector<128x32xbf16>, vector<4x32xf32> -> vector<4x32xf32>
    %179 = arith.truncf %178 : vector<4x32xf32> to vector<4x32xbf16>
    %c0_52 = arith.constant 0 : index
    %c0_53 = arith.constant 0 : index
    %180 = vector.load %arg13[%c0_52, %c0_53] : memref<32x32xbf16, #tpu.memory_space<vmem>>, vector<32x32xbf16>
    %cst_54 = arith.constant dense<0.000000e+00> : vector<4x32xf32>
    %181 = tpu.matmul %179, %180, %cst_54 {dimension_numbers = #tpu.dot_dimension_numbers<[1], [0], [0], [1], [0, 0, 1, 1], [], []>} : vector<4x32xbf16>, vector<32x32xbf16>, vector<4x32xf32> -> vector<4x32xf32>
    %c0_55 = arith.constant 0 : index
    %c0_56 = arith.constant 0 : index
    %182 = vector.load %arg14[%c0_55, %c0_56] : memref<1x32xf32, #tpu.memory_space<vmem>>, vector<1x32xf32>
    %183 = vector.broadcast %182 : vector<1x32xf32> to vector<4x32xf32>
    %184 = arith.addf %181, %183 : vector<4x32xf32>
    %185 = math.tanh %184 : vector<4x32xf32>
    %186 = arith.truncf %185 : vector<4x32xf32> to vector<4x32xbf16>
    %c0_57 = arith.constant 0 : index
    %c0_58 = arith.constant 0 : index
    %187 = vector.load %arg15[%c0_57, %c0_58] : memref<32x32xbf16, #tpu.memory_space<vmem>>, vector<32x32xbf16>
    %cst_59 = arith.constant dense<0.000000e+00> : vector<4x32xf32>
    %188 = tpu.matmul %186, %187, %cst_59 {dimension_numbers = #tpu.dot_dimension_numbers<[1], [0], [0], [1], [0, 0, 1, 1], [], []>} : vector<4x32xbf16>, vector<32x32xbf16>, vector<4x32xf32> -> vector<4x32xf32>
    %c0_60 = arith.constant 0 : index
    %c0_61 = arith.constant 0 : index
    %189 = vector.load %arg16[%c0_60, %c0_61] : memref<1x32xf32, #tpu.memory_space<vmem>>, vector<1x32xf32>
    %190 = vector.broadcast %189 : vector<1x32xf32> to vector<4x32xf32>
    %191 = arith.addf %188, %190 : vector<4x32xf32>
    %c0_62 = arith.constant 0 : index
    %c0_63 = arith.constant 0 : index
    %192 = vector.load %arg5[%c0_62, %c0_63] : memref<1x2xf32, #tpu.memory_space<vmem>>, vector<1x1xf32>
    %c0_64 = arith.constant 0 : index
    %c1_65 = arith.constant 1 : index
    %193 = vector.load %arg5[%c0_64, %c1_65] : memref<1x2xf32, #tpu.memory_space<vmem>>, vector<1x1xf32>
    %cst_66 = arith.constant 8.000000e+00 : f32
    %194 = vector.broadcast %cst_66 : f32 to vector<4x1xf32>
    %195 = arith.subf %6, %194 : vector<4x1xf32>
    %196 = vector.broadcast %193 : vector<1x1xf32> to vector<4x1xf32>
    %197 = arith.divf %195, %196 : vector<4x1xf32>
    %198 = math.exp %197 : vector<4x1xf32>
    %199 = vector.broadcast %192 : vector<1x1xf32> to vector<4x1xf32>
    %200 = arith.mulf %199, %198 : vector<4x1xf32>
    %201 = vector.broadcast %200 : vector<4x1xf32> to vector<4x32xf32>
    %202 = arith.mulf %170, %201 : vector<4x32xf32>
    %203 = arith.truncf %202 : vector<4x32xf32> to vector<4x32xbf16>
    %c0_67 = arith.constant 0 : index
    %c0_68 = arith.constant 0 : index
    %204 = vector.load %arg9[%c0_67, %c0_68] : memref<32x32xbf16, #tpu.memory_space<vmem>>, vector<32x32xbf16>
    %cst_69 = arith.constant dense<0.000000e+00> : vector<4x32xf32>
    %205 = tpu.matmul %203, %204, %cst_69 {dimension_numbers = #tpu.dot_dimension_numbers<[1], [0], [0], [1], [0, 0, 1, 1], [], []>} : vector<4x32xbf16>, vector<32x32xbf16>, vector<4x32xf32> -> vector<4x32xf32>
    %c0_70 = arith.constant 0 : index
    %c0_71 = arith.constant 0 : index
    %206 = vector.load %arg10[%c0_70, %c0_71] : memref<1x32xf32, #tpu.memory_space<vmem>>, vector<1x32xf32>
    %207 = vector.broadcast %206 : vector<1x32xf32> to vector<4x32xf32>
    %208 = arith.addf %205, %207 : vector<4x32xf32>
    %209 = math.tanh %208 : vector<4x32xf32>
    %210 = arith.truncf %209 : vector<4x32xf32> to vector<4x32xbf16>
    %c0_72 = arith.constant 0 : index
    %c0_73 = arith.constant 0 : index
    %211 = vector.load %arg11[%c0_72, %c0_73] : memref<32x2048xbf16, #tpu.memory_space<vmem>>, vector<32x2048xbf16>
    %cst_74 = arith.constant dense<0.000000e+00> : vector<4x2048xf32>
    %212 = tpu.matmul %210, %211, %cst_74 {dimension_numbers = #tpu.dot_dimension_numbers<[1], [0], [0], [1], [0, 0, 1, 1], [], []>} : vector<4x32xbf16>, vector<32x2048xbf16>, vector<4x2048xf32> -> vector<4x2048xf32>
    %c0_75 = arith.constant 0 : index
    %c0_76 = arith.constant 0 : index
    %213 = vector.load %arg12[%c0_75, %c0_76] : memref<1x2048xf32, #tpu.memory_space<vmem>>, vector<1x2048xf32>
    %214 = vector.broadcast %213 : vector<1x2048xf32> to vector<4x2048xf32>
    %215 = arith.addf %212, %214 : vector<4x2048xf32>
    %c0_77 = arith.constant 0 : index
    %c0_78 = arith.constant 0 : index
    %216 = vector.load %arg7[%c0_77, %c0_78] : memref<32x192xbf16, #tpu.memory_space<vmem>>, vector<32x192xbf16>
    %c0_79 = arith.constant 0 : index
    %c0_80 = arith.constant 0 : index
    %217 = vector.load %arg8[%c0_79, %c0_80] : memref<32x96xbf16, #tpu.memory_space<vmem>>, vector<32x96xbf16>
    %cst_81 = arith.constant 0.000000e+00 : f32
    %218 = vector.broadcast %cst_81 : f32 to vector<4x32xf32>
    %cst_82 = arith.constant 0.000000e+00 : f32
    %219 = vector.broadcast %cst_82 : f32 to vector<4x32xf32>
    %cst_83 = arith.constant 0.000000e+00 : f32
    %220 = vector.broadcast %cst_83 : f32 to vector<4x96xf32>
    %c0_i32_84 = arith.constant 0 : i32
    %221 = vector.broadcast %c0_i32_84 : i32 to vector<4x1xi32>
    %222 = arith.cmpi sgt, %5, %221 : vector<4x1xi32>
    %223 = arith.extui %222 : vector<4x1xi1> to vector<4x1xi32>
    %224 = arith.sitofp %223 : vector<4x1xi32> to vector<4x1xf32>
    %225 = vector.extract_strided_slice %20 {offsets = [0, 0], sizes = [4, 64], strides = [1, 1]} : vector<4x96xf32> to vector<4x64xf32>
    %226 = vector.extract_strided_slice %220 {offsets = [0, 0], sizes = [4, 64], strides = [1, 1]} : vector<4x96xf32> to vector<4x64xf32>
    %227 = arith.addf %225, %226 : vector<4x64xf32>
    %228 = arith.negf %227 : vector<4x64xf32>
    %229 = math.exp %228 : vector<4x64xf32>
    %cst_85 = arith.constant 1.000000e+00 : f32
    %230 = vector.broadcast %cst_85 : f32 to vector<4x64xf32>
    %231 = arith.addf %230, %229 : vector<4x64xf32>
    %232 = arith.divf %230, %231 : vector<4x64xf32>
    %233 = vector.extract_strided_slice %232 {offsets = [0, 0], sizes = [4, 32], strides = [1, 1]} : vector<4x64xf32> to vector<4x32xf32>
    %234 = vector.extract_strided_slice %232 {offsets = [0, 32], sizes = [4, 32], strides = [1, 1]} : vector<4x64xf32> to vector<4x32xf32>
    %235 = vector.extract_strided_slice %20 {offsets = [0, 64], sizes = [4, 32], strides = [1, 1]} : vector<4x96xf32> to vector<4x32xf32>
    %236 = vector.extract_strided_slice %220 {offsets = [0, 64], sizes = [4, 32], strides = [1, 1]} : vector<4x96xf32> to vector<4x32xf32>
    %237 = arith.mulf %233, %236 : vector<4x32xf32>
    %238 = arith.addf %235, %237 : vector<4x32xf32>
    %239 = math.tanh %238 : vector<4x32xf32>
    %cst_86 = arith.constant 1.000000e+00 : f32
    %240 = vector.broadcast %cst_86 : f32 to vector<4x32xf32>
    %241 = arith.subf %240, %234 : vector<4x32xf32>
    %242 = arith.mulf %241, %239 : vector<4x32xf32>
    %243 = arith.mulf %234, %218 : vector<4x32xf32>
    %244 = arith.addf %242, %243 : vector<4x32xf32>
    %245 = vector.broadcast %224 : vector<4x1xf32> to vector<4x32xf32>
    %246 = arith.mulf %245, %244 : vector<4x32xf32>
    %cst_87 = arith.constant 1.000000e+00 : f32
    %247 = vector.broadcast %cst_87 : f32 to vector<4x1xf32>
    %248 = arith.subf %247, %224 : vector<4x1xf32>
    %249 = vector.broadcast %248 : vector<4x1xf32> to vector<4x32xf32>
    %250 = arith.mulf %249, %218 : vector<4x32xf32>
    %251 = arith.addf %246, %250 : vector<4x32xf32>
    %252 = arith.truncf %251 : vector<4x32xf32> to vector<4x32xbf16>
    %cst_88 = arith.constant dense<0.000000e+00> : vector<4x192xf32>
    %253 = tpu.matmul %252, %216, %cst_88 {dimension_numbers = #tpu.dot_dimension_numbers<[1], [0], [0], [1], [0, 0, 1, 1], [], []>} : vector<4x32xbf16>, vector<32x192xbf16>, vector<4x192xf32> -> vector<4x192xf32>
    %254 = vector.extract_strided_slice %253 {offsets = [0, 96], sizes = [4, 96], strides = [1, 1]} : vector<4x192xf32> to vector<4x96xf32>
    %cst_89 = arith.constant 0.000000e+00 : f32
    %255 = vector.broadcast %cst_89 : f32 to vector<4x96xf32>
    %256 = vector.extract_strided_slice %253 {offsets = [0, 0], sizes = [4, 96], strides = [1, 1]} : vector<4x192xf32> to vector<4x96xf32>
    %c1_i32_90 = arith.constant 1 : i32
    %257 = vector.broadcast %c1_i32_90 : i32 to vector<4x1xi32>
    %258 = arith.cmpi sgt, %5, %257 : vector<4x1xi32>
    %259 = arith.extui %258 : vector<4x1xi1> to vector<4x1xi32>
    %260 = arith.sitofp %259 : vector<4x1xi32> to vector<4x1xf32>
    %261 = vector.extract_strided_slice %40 {offsets = [0, 0], sizes = [4, 64], strides = [1, 1]} : vector<4x96xf32> to vector<4x64xf32>
    %262 = vector.extract_strided_slice %256 {offsets = [0, 0], sizes = [4, 64], strides = [1, 1]} : vector<4x96xf32> to vector<4x64xf32>
    %263 = arith.addf %261, %262 : vector<4x64xf32>
    %264 = arith.negf %263 : vector<4x64xf32>
    %265 = math.exp %264 : vector<4x64xf32>
    %cst_91 = arith.constant 1.000000e+00 : f32
    %266 = vector.broadcast %cst_91 : f32 to vector<4x64xf32>
    %267 = arith.addf %266, %265 : vector<4x64xf32>
    %268 = arith.divf %266, %267 : vector<4x64xf32>
    %269 = vector.extract_strided_slice %268 {offsets = [0, 0], sizes = [4, 32], strides = [1, 1]} : vector<4x64xf32> to vector<4x32xf32>
    %270 = vector.extract_strided_slice %268 {offsets = [0, 32], sizes = [4, 32], strides = [1, 1]} : vector<4x64xf32> to vector<4x32xf32>
    %271 = vector.extract_strided_slice %40 {offsets = [0, 64], sizes = [4, 32], strides = [1, 1]} : vector<4x96xf32> to vector<4x32xf32>
    %272 = vector.extract_strided_slice %256 {offsets = [0, 64], sizes = [4, 32], strides = [1, 1]} : vector<4x96xf32> to vector<4x32xf32>
    %273 = arith.mulf %269, %272 : vector<4x32xf32>
    %274 = arith.addf %271, %273 : vector<4x32xf32>
    %275 = math.tanh %274 : vector<4x32xf32>
    %cst_92 = arith.constant 1.000000e+00 : f32
    %276 = vector.broadcast %cst_92 : f32 to vector<4x32xf32>
    %277 = arith.subf %276, %270 : vector<4x32xf32>
    %278 = arith.mulf %277, %275 : vector<4x32xf32>
    %279 = arith.mulf %270, %251 : vector<4x32xf32>
    %280 = arith.addf %278, %279 : vector<4x32xf32>
    %281 = vector.broadcast %260 : vector<4x1xf32> to vector<4x32xf32>
    %282 = arith.mulf %281, %280 : vector<4x32xf32>
    %cst_93 = arith.constant 1.000000e+00 : f32
    %283 = vector.broadcast %cst_93 : f32 to vector<4x1xf32>
    %284 = arith.subf %283, %260 : vector<4x1xf32>
    %285 = vector.broadcast %284 : vector<4x1xf32> to vector<4x32xf32>
    %286 = arith.mulf %285, %251 : vector<4x32xf32>
    %287 = arith.addf %282, %286 : vector<4x32xf32>
    %c0_i32_94 = arith.constant 0 : i32
    %288 = vector.broadcast %c0_i32_94 : i32 to vector<4x1xi32>
    %289 = arith.cmpi sgt, %5, %288 : vector<4x1xi32>
    %290 = arith.extui %289 : vector<4x1xi1> to vector<4x1xi32>
    %291 = arith.sitofp %290 : vector<4x1xi32> to vector<4x1xf32>
    %292 = vector.extract_strided_slice %254 {offsets = [0, 0], sizes = [4, 64], strides = [1, 1]} : vector<4x96xf32> to vector<4x64xf32>
    %293 = vector.extract_strided_slice %255 {offsets = [0, 0], sizes = [4, 64], strides = [1, 1]} : vector<4x96xf32> to vector<4x64xf32>
    %294 = arith.addf %292, %293 : vector<4x64xf32>
    %295 = arith.negf %294 : vector<4x64xf32>
    %296 = math.exp %295 : vector<4x64xf32>
    %cst_95 = arith.constant 1.000000e+00 : f32
    %297 = vector.broadcast %cst_95 : f32 to vector<4x64xf32>
    %298 = arith.addf %297, %296 : vector<4x64xf32>
    %299 = arith.divf %297, %298 : vector<4x64xf32>
    %300 = vector.extract_strided_slice %299 {offsets = [0, 0], sizes = [4, 32], strides = [1, 1]} : vector<4x64xf32> to vector<4x32xf32>
    %301 = vector.extract_strided_slice %299 {offsets = [0, 32], sizes = [4, 32], strides = [1, 1]} : vector<4x64xf32> to vector<4x32xf32>
    %302 = vector.extract_strided_slice %254 {offsets = [0, 64], sizes = [4, 32], strides = [1, 1]} : vector<4x96xf32> to vector<4x32xf32>
    %303 = vector.extract_strided_slice %255 {offsets = [0, 64], sizes = [4, 32], strides = [1, 1]} : vector<4x96xf32> to vector<4x32xf32>
    %304 = arith.mulf %300, %303 : vector<4x32xf32>
    %305 = arith.addf %302, %304 : vector<4x32xf32>
    %306 = math.tanh %305 : vector<4x32xf32>
    %cst_96 = arith.constant 1.000000e+00 : f32
    %307 = vector.broadcast %cst_96 : f32 to vector<4x32xf32>
    %308 = arith.subf %307, %301 : vector<4x32xf32>
    %309 = arith.mulf %308, %306 : vector<4x32xf32>
    %310 = arith.mulf %301, %219 : vector<4x32xf32>
    %311 = arith.addf %309, %310 : vector<4x32xf32>
    %312 = vector.broadcast %291 : vector<4x1xf32> to vector<4x32xf32>
    %313 = arith.mulf %312, %311 : vector<4x32xf32>
    %cst_97 = arith.constant 1.000000e+00 : f32
    %314 = vector.broadcast %cst_97 : f32 to vector<4x1xf32>
    %315 = arith.subf %314, %291 : vector<4x1xf32>
    %316 = vector.broadcast %315 : vector<4x1xf32> to vector<4x32xf32>
    %317 = arith.mulf %316, %219 : vector<4x32xf32>
    %318 = arith.addf %313, %317 : vector<4x32xf32>
    %319 = arith.truncf %287 : vector<4x32xf32> to vector<4x32xbf16>
    %cst_98 = arith.constant dense<0.000000e+00> : vector<4x192xf32>
    %320 = tpu.matmul %319, %216, %cst_98 {dimension_numbers = #tpu.dot_dimension_numbers<[1], [0], [0], [1], [0, 0, 1, 1], [], []>} : vector<4x32xbf16>, vector<32x192xbf16>, vector<4x192xf32> -> vector<4x192xf32>
    %321 = vector.extract_strided_slice %320 {offsets = [0, 96], sizes = [4, 96], strides = [1, 1]} : vector<4x192xf32> to vector<4x96xf32>
    %322 = arith.truncf %318 : vector<4x32xf32> to vector<4x32xbf16>
    %cst_99 = arith.constant dense<0.000000e+00> : vector<4x96xf32>
    %323 = tpu.matmul %322, %217, %cst_99 {dimension_numbers = #tpu.dot_dimension_numbers<[1], [0], [0], [1], [0, 0, 1, 1], [], []>} : vector<4x32xbf16>, vector<32x96xbf16>, vector<4x96xf32> -> vector<4x96xf32>
    %324 = vector.extract_strided_slice %320 {offsets = [0, 0], sizes = [4, 96], strides = [1, 1]} : vector<4x192xf32> to vector<4x96xf32>
    %c2_i32_100 = arith.constant 2 : i32
    %325 = vector.broadcast %c2_i32_100 : i32 to vector<4x1xi32>
    %326 = arith.cmpi sgt, %5, %325 : vector<4x1xi32>
    %327 = arith.extui %326 : vector<4x1xi1> to vector<4x1xi32>
    %328 = arith.sitofp %327 : vector<4x1xi32> to vector<4x1xf32>
    %329 = vector.extract_strided_slice %60 {offsets = [0, 0], sizes = [4, 64], strides = [1, 1]} : vector<4x96xf32> to vector<4x64xf32>
    %330 = vector.extract_strided_slice %324 {offsets = [0, 0], sizes = [4, 64], strides = [1, 1]} : vector<4x96xf32> to vector<4x64xf32>
    %331 = arith.addf %329, %330 : vector<4x64xf32>
    %332 = arith.negf %331 : vector<4x64xf32>
    %333 = math.exp %332 : vector<4x64xf32>
    %cst_101 = arith.constant 1.000000e+00 : f32
    %334 = vector.broadcast %cst_101 : f32 to vector<4x64xf32>
    %335 = arith.addf %334, %333 : vector<4x64xf32>
    %336 = arith.divf %334, %335 : vector<4x64xf32>
    %337 = vector.extract_strided_slice %336 {offsets = [0, 0], sizes = [4, 32], strides = [1, 1]} : vector<4x64xf32> to vector<4x32xf32>
    %338 = vector.extract_strided_slice %336 {offsets = [0, 32], sizes = [4, 32], strides = [1, 1]} : vector<4x64xf32> to vector<4x32xf32>
    %339 = vector.extract_strided_slice %60 {offsets = [0, 64], sizes = [4, 32], strides = [1, 1]} : vector<4x96xf32> to vector<4x32xf32>
    %340 = vector.extract_strided_slice %324 {offsets = [0, 64], sizes = [4, 32], strides = [1, 1]} : vector<4x96xf32> to vector<4x32xf32>
    %341 = arith.mulf %337, %340 : vector<4x32xf32>
    %342 = arith.addf %339, %341 : vector<4x32xf32>
    %343 = math.tanh %342 : vector<4x32xf32>
    %cst_102 = arith.constant 1.000000e+00 : f32
    %344 = vector.broadcast %cst_102 : f32 to vector<4x32xf32>
    %345 = arith.subf %344, %338 : vector<4x32xf32>
    %346 = arith.mulf %345, %343 : vector<4x32xf32>
    %347 = arith.mulf %338, %287 : vector<4x32xf32>
    %348 = arith.addf %346, %347 : vector<4x32xf32>
    %349 = vector.broadcast %328 : vector<4x1xf32> to vector<4x32xf32>
    %350 = arith.mulf %349, %348 : vector<4x32xf32>
    %cst_103 = arith.constant 1.000000e+00 : f32
    %351 = vector.broadcast %cst_103 : f32 to vector<4x1xf32>
    %352 = arith.subf %351, %328 : vector<4x1xf32>
    %353 = vector.broadcast %352 : vector<4x1xf32> to vector<4x32xf32>
    %354 = arith.mulf %353, %287 : vector<4x32xf32>
    %355 = arith.addf %350, %354 : vector<4x32xf32>
    %c1_i32_104 = arith.constant 1 : i32
    %356 = vector.broadcast %c1_i32_104 : i32 to vector<4x1xi32>
    %357 = arith.cmpi sgt, %5, %356 : vector<4x1xi32>
    %358 = arith.extui %357 : vector<4x1xi1> to vector<4x1xi32>
    %359 = arith.sitofp %358 : vector<4x1xi32> to vector<4x1xf32>
    %360 = vector.extract_strided_slice %321 {offsets = [0, 0], sizes = [4, 64], strides = [1, 1]} : vector<4x96xf32> to vector<4x64xf32>
    %361 = vector.extract_strided_slice %323 {offsets = [0, 0], sizes = [4, 64], strides = [1, 1]} : vector<4x96xf32> to vector<4x64xf32>
    %362 = arith.addf %360, %361 : vector<4x64xf32>
    %363 = arith.negf %362 : vector<4x64xf32>
    %364 = math.exp %363 : vector<4x64xf32>
    %cst_105 = arith.constant 1.000000e+00 : f32
    %365 = vector.broadcast %cst_105 : f32 to vector<4x64xf32>
    %366 = arith.addf %365, %364 : vector<4x64xf32>
    %367 = arith.divf %365, %366 : vector<4x64xf32>
    %368 = vector.extract_strided_slice %367 {offsets = [0, 0], sizes = [4, 32], strides = [1, 1]} : vector<4x64xf32> to vector<4x32xf32>
    %369 = vector.extract_strided_slice %367 {offsets = [0, 32], sizes = [4, 32], strides = [1, 1]} : vector<4x64xf32> to vector<4x32xf32>
    %370 = vector.extract_strided_slice %321 {offsets = [0, 64], sizes = [4, 32], strides = [1, 1]} : vector<4x96xf32> to vector<4x32xf32>
    %371 = vector.extract_strided_slice %323 {offsets = [0, 64], sizes = [4, 32], strides = [1, 1]} : vector<4x96xf32> to vector<4x32xf32>
    %372 = arith.mulf %368, %371 : vector<4x32xf32>
    %373 = arith.addf %370, %372 : vector<4x32xf32>
    %374 = math.tanh %373 : vector<4x32xf32>
    %cst_106 = arith.constant 1.000000e+00 : f32
    %375 = vector.broadcast %cst_106 : f32 to vector<4x32xf32>
    %376 = arith.subf %375, %369 : vector<4x32xf32>
    %377 = arith.mulf %376, %374 : vector<4x32xf32>
    %378 = arith.mulf %369, %318 : vector<4x32xf32>
    %379 = arith.addf %377, %378 : vector<4x32xf32>
    %380 = vector.broadcast %359 : vector<4x1xf32> to vector<4x32xf32>
    %381 = arith.mulf %380, %379 : vector<4x32xf32>
    %cst_107 = arith.constant 1.000000e+00 : f32
    %382 = vector.broadcast %cst_107 : f32 to vector<4x1xf32>
    %383 = arith.subf %382, %359 : vector<4x1xf32>
    %384 = vector.broadcast %383 : vector<4x1xf32> to vector<4x32xf32>
    %385 = arith.mulf %384, %318 : vector<4x32xf32>
    %386 = arith.addf %381, %385 : vector<4x32xf32>
    %387 = arith.truncf %355 : vector<4x32xf32> to vector<4x32xbf16>
    %cst_108 = arith.constant dense<0.000000e+00> : vector<4x192xf32>
    %388 = tpu.matmul %387, %216, %cst_108 {dimension_numbers = #tpu.dot_dimension_numbers<[1], [0], [0], [1], [0, 0, 1, 1], [], []>} : vector<4x32xbf16>, vector<32x192xbf16>, vector<4x192xf32> -> vector<4x192xf32>
    %389 = vector.extract_strided_slice %388 {offsets = [0, 96], sizes = [4, 96], strides = [1, 1]} : vector<4x192xf32> to vector<4x96xf32>
    %390 = arith.truncf %386 : vector<4x32xf32> to vector<4x32xbf16>
    %cst_109 = arith.constant dense<0.000000e+00> : vector<4x96xf32>
    %391 = tpu.matmul %390, %217, %cst_109 {dimension_numbers = #tpu.dot_dimension_numbers<[1], [0], [0], [1], [0, 0, 1, 1], [], []>} : vector<4x32xbf16>, vector<32x96xbf16>, vector<4x96xf32> -> vector<4x96xf32>
    %392 = vector.extract_strided_slice %388 {offsets = [0, 0], sizes = [4, 96], strides = [1, 1]} : vector<4x192xf32> to vector<4x96xf32>
    %c3_i32_110 = arith.constant 3 : i32
    %393 = vector.broadcast %c3_i32_110 : i32 to vector<4x1xi32>
    %394 = arith.cmpi sgt, %5, %393 : vector<4x1xi32>
    %395 = arith.extui %394 : vector<4x1xi1> to vector<4x1xi32>
    %396 = arith.sitofp %395 : vector<4x1xi32> to vector<4x1xf32>
    %397 = vector.extract_strided_slice %80 {offsets = [0, 0], sizes = [4, 64], strides = [1, 1]} : vector<4x96xf32> to vector<4x64xf32>
    %398 = vector.extract_strided_slice %392 {offsets = [0, 0], sizes = [4, 64], strides = [1, 1]} : vector<4x96xf32> to vector<4x64xf32>
    %399 = arith.addf %397, %398 : vector<4x64xf32>
    %400 = arith.negf %399 : vector<4x64xf32>
    %401 = math.exp %400 : vector<4x64xf32>
    %cst_111 = arith.constant 1.000000e+00 : f32
    %402 = vector.broadcast %cst_111 : f32 to vector<4x64xf32>
    %403 = arith.addf %402, %401 : vector<4x64xf32>
    %404 = arith.divf %402, %403 : vector<4x64xf32>
    %405 = vector.extract_strided_slice %404 {offsets = [0, 0], sizes = [4, 32], strides = [1, 1]} : vector<4x64xf32> to vector<4x32xf32>
    %406 = vector.extract_strided_slice %404 {offsets = [0, 32], sizes = [4, 32], strides = [1, 1]} : vector<4x64xf32> to vector<4x32xf32>
    %407 = vector.extract_strided_slice %80 {offsets = [0, 64], sizes = [4, 32], strides = [1, 1]} : vector<4x96xf32> to vector<4x32xf32>
    %408 = vector.extract_strided_slice %392 {offsets = [0, 64], sizes = [4, 32], strides = [1, 1]} : vector<4x96xf32> to vector<4x32xf32>
    %409 = arith.mulf %405, %408 : vector<4x32xf32>
    %410 = arith.addf %407, %409 : vector<4x32xf32>
    %411 = math.tanh %410 : vector<4x32xf32>
    %cst_112 = arith.constant 1.000000e+00 : f32
    %412 = vector.broadcast %cst_112 : f32 to vector<4x32xf32>
    %413 = arith.subf %412, %406 : vector<4x32xf32>
    %414 = arith.mulf %413, %411 : vector<4x32xf32>
    %415 = arith.mulf %406, %355 : vector<4x32xf32>
    %416 = arith.addf %414, %415 : vector<4x32xf32>
    %417 = vector.broadcast %396 : vector<4x1xf32> to vector<4x32xf32>
    %418 = arith.mulf %417, %416 : vector<4x32xf32>
    %cst_113 = arith.constant 1.000000e+00 : f32
    %419 = vector.broadcast %cst_113 : f32 to vector<4x1xf32>
    %420 = arith.subf %419, %396 : vector<4x1xf32>
    %421 = vector.broadcast %420 : vector<4x1xf32> to vector<4x32xf32>
    %422 = arith.mulf %421, %355 : vector<4x32xf32>
    %423 = arith.addf %418, %422 : vector<4x32xf32>
    %c2_i32_114 = arith.constant 2 : i32
    %424 = vector.broadcast %c2_i32_114 : i32 to vector<4x1xi32>
    %425 = arith.cmpi sgt, %5, %424 : vector<4x1xi32>
    %426 = arith.extui %425 : vector<4x1xi1> to vector<4x1xi32>
    %427 = arith.sitofp %426 : vector<4x1xi32> to vector<4x1xf32>
    %428 = vector.extract_strided_slice %389 {offsets = [0, 0], sizes = [4, 64], strides = [1, 1]} : vector<4x96xf32> to vector<4x64xf32>
    %429 = vector.extract_strided_slice %391 {offsets = [0, 0], sizes = [4, 64], strides = [1, 1]} : vector<4x96xf32> to vector<4x64xf32>
    %430 = arith.addf %428, %429 : vector<4x64xf32>
    %431 = arith.negf %430 : vector<4x64xf32>
    %432 = math.exp %431 : vector<4x64xf32>
    %cst_115 = arith.constant 1.000000e+00 : f32
    %433 = vector.broadcast %cst_115 : f32 to vector<4x64xf32>
    %434 = arith.addf %433, %432 : vector<4x64xf32>
    %435 = arith.divf %433, %434 : vector<4x64xf32>
    %436 = vector.extract_strided_slice %435 {offsets = [0, 0], sizes = [4, 32], strides = [1, 1]} : vector<4x64xf32> to vector<4x32xf32>
    %437 = vector.extract_strided_slice %435 {offsets = [0, 32], sizes = [4, 32], strides = [1, 1]} : vector<4x64xf32> to vector<4x32xf32>
    %438 = vector.extract_strided_slice %389 {offsets = [0, 64], sizes = [4, 32], strides = [1, 1]} : vector<4x96xf32> to vector<4x32xf32>
    %439 = vector.extract_strided_slice %391 {offsets = [0, 64], sizes = [4, 32], strides = [1, 1]} : vector<4x96xf32> to vector<4x32xf32>
    %440 = arith.mulf %436, %439 : vector<4x32xf32>
    %441 = arith.addf %438, %440 : vector<4x32xf32>
    %442 = math.tanh %441 : vector<4x32xf32>
    %cst_116 = arith.constant 1.000000e+00 : f32
    %443 = vector.broadcast %cst_116 : f32 to vector<4x32xf32>
    %444 = arith.subf %443, %437 : vector<4x32xf32>
    %445 = arith.mulf %444, %442 : vector<4x32xf32>
    %446 = arith.mulf %437, %386 : vector<4x32xf32>
    %447 = arith.addf %445, %446 : vector<4x32xf32>
    %448 = vector.broadcast %427 : vector<4x1xf32> to vector<4x32xf32>
    %449 = arith.mulf %448, %447 : vector<4x32xf32>
    %cst_117 = arith.constant 1.000000e+00 : f32
    %450 = vector.broadcast %cst_117 : f32 to vector<4x1xf32>
    %451 = arith.subf %450, %427 : vector<4x1xf32>
    %452 = vector.broadcast %451 : vector<4x1xf32> to vector<4x32xf32>
    %453 = arith.mulf %452, %386 : vector<4x32xf32>
    %454 = arith.addf %449, %453 : vector<4x32xf32>
    %455 = arith.truncf %423 : vector<4x32xf32> to vector<4x32xbf16>
    %cst_118 = arith.constant dense<0.000000e+00> : vector<4x192xf32>
    %456 = tpu.matmul %455, %216, %cst_118 {dimension_numbers = #tpu.dot_dimension_numbers<[1], [0], [0], [1], [0, 0, 1, 1], [], []>} : vector<4x32xbf16>, vector<32x192xbf16>, vector<4x192xf32> -> vector<4x192xf32>
    %457 = vector.extract_strided_slice %456 {offsets = [0, 96], sizes = [4, 96], strides = [1, 1]} : vector<4x192xf32> to vector<4x96xf32>
    %458 = arith.truncf %454 : vector<4x32xf32> to vector<4x32xbf16>
    %cst_119 = arith.constant dense<0.000000e+00> : vector<4x96xf32>
    %459 = tpu.matmul %458, %217, %cst_119 {dimension_numbers = #tpu.dot_dimension_numbers<[1], [0], [0], [1], [0, 0, 1, 1], [], []>} : vector<4x32xbf16>, vector<32x96xbf16>, vector<4x96xf32> -> vector<4x96xf32>
    %460 = vector.extract_strided_slice %456 {offsets = [0, 0], sizes = [4, 96], strides = [1, 1]} : vector<4x192xf32> to vector<4x96xf32>
    %c4_i32_120 = arith.constant 4 : i32
    %461 = vector.broadcast %c4_i32_120 : i32 to vector<4x1xi32>
    %462 = arith.cmpi sgt, %5, %461 : vector<4x1xi32>
    %463 = arith.extui %462 : vector<4x1xi1> to vector<4x1xi32>
    %464 = arith.sitofp %463 : vector<4x1xi32> to vector<4x1xf32>
    %465 = vector.extract_strided_slice %100 {offsets = [0, 0], sizes = [4, 64], strides = [1, 1]} : vector<4x96xf32> to vector<4x64xf32>
    %466 = vector.extract_strided_slice %460 {offsets = [0, 0], sizes = [4, 64], strides = [1, 1]} : vector<4x96xf32> to vector<4x64xf32>
    %467 = arith.addf %465, %466 : vector<4x64xf32>
    %468 = arith.negf %467 : vector<4x64xf32>
    %469 = math.exp %468 : vector<4x64xf32>
    %cst_121 = arith.constant 1.000000e+00 : f32
    %470 = vector.broadcast %cst_121 : f32 to vector<4x64xf32>
    %471 = arith.addf %470, %469 : vector<4x64xf32>
    %472 = arith.divf %470, %471 : vector<4x64xf32>
    %473 = vector.extract_strided_slice %472 {offsets = [0, 0], sizes = [4, 32], strides = [1, 1]} : vector<4x64xf32> to vector<4x32xf32>
    %474 = vector.extract_strided_slice %472 {offsets = [0, 32], sizes = [4, 32], strides = [1, 1]} : vector<4x64xf32> to vector<4x32xf32>
    %475 = vector.extract_strided_slice %100 {offsets = [0, 64], sizes = [4, 32], strides = [1, 1]} : vector<4x96xf32> to vector<4x32xf32>
    %476 = vector.extract_strided_slice %460 {offsets = [0, 64], sizes = [4, 32], strides = [1, 1]} : vector<4x96xf32> to vector<4x32xf32>
    %477 = arith.mulf %473, %476 : vector<4x32xf32>
    %478 = arith.addf %475, %477 : vector<4x32xf32>
    %479 = math.tanh %478 : vector<4x32xf32>
    %cst_122 = arith.constant 1.000000e+00 : f32
    %480 = vector.broadcast %cst_122 : f32 to vector<4x32xf32>
    %481 = arith.subf %480, %474 : vector<4x32xf32>
    %482 = arith.mulf %481, %479 : vector<4x32xf32>
    %483 = arith.mulf %474, %423 : vector<4x32xf32>
    %484 = arith.addf %482, %483 : vector<4x32xf32>
    %485 = vector.broadcast %464 : vector<4x1xf32> to vector<4x32xf32>
    %486 = arith.mulf %485, %484 : vector<4x32xf32>
    %cst_123 = arith.constant 1.000000e+00 : f32
    %487 = vector.broadcast %cst_123 : f32 to vector<4x1xf32>
    %488 = arith.subf %487, %464 : vector<4x1xf32>
    %489 = vector.broadcast %488 : vector<4x1xf32> to vector<4x32xf32>
    %490 = arith.mulf %489, %423 : vector<4x32xf32>
    %491 = arith.addf %486, %490 : vector<4x32xf32>
    %c3_i32_124 = arith.constant 3 : i32
    %492 = vector.broadcast %c3_i32_124 : i32 to vector<4x1xi32>
    %493 = arith.cmpi sgt, %5, %492 : vector<4x1xi32>
    %494 = arith.extui %493 : vector<4x1xi1> to vector<4x1xi32>
    %495 = arith.sitofp %494 : vector<4x1xi32> to vector<4x1xf32>
    %496 = vector.extract_strided_slice %457 {offsets = [0, 0], sizes = [4, 64], strides = [1, 1]} : vector<4x96xf32> to vector<4x64xf32>
    %497 = vector.extract_strided_slice %459 {offsets = [0, 0], sizes = [4, 64], strides = [1, 1]} : vector<4x96xf32> to vector<4x64xf32>
    %498 = arith.addf %496, %497 : vector<4x64xf32>
    %499 = arith.negf %498 : vector<4x64xf32>
    %500 = math.exp %499 : vector<4x64xf32>
    %cst_125 = arith.constant 1.000000e+00 : f32
    %501 = vector.broadcast %cst_125 : f32 to vector<4x64xf32>
    %502 = arith.addf %501, %500 : vector<4x64xf32>
    %503 = arith.divf %501, %502 : vector<4x64xf32>
    %504 = vector.extract_strided_slice %503 {offsets = [0, 0], sizes = [4, 32], strides = [1, 1]} : vector<4x64xf32> to vector<4x32xf32>
    %505 = vector.extract_strided_slice %503 {offsets = [0, 32], sizes = [4, 32], strides = [1, 1]} : vector<4x64xf32> to vector<4x32xf32>
    %506 = vector.extract_strided_slice %457 {offsets = [0, 64], sizes = [4, 32], strides = [1, 1]} : vector<4x96xf32> to vector<4x32xf32>
    %507 = vector.extract_strided_slice %459 {offsets = [0, 64], sizes = [4, 32], strides = [1, 1]} : vector<4x96xf32> to vector<4x32xf32>
    %508 = arith.mulf %504, %507 : vector<4x32xf32>
    %509 = arith.addf %506, %508 : vector<4x32xf32>
    %510 = math.tanh %509 : vector<4x32xf32>
    %cst_126 = arith.constant 1.000000e+00 : f32
    %511 = vector.broadcast %cst_126 : f32 to vector<4x32xf32>
    %512 = arith.subf %511, %505 : vector<4x32xf32>
    %513 = arith.mulf %512, %510 : vector<4x32xf32>
    %514 = arith.mulf %505, %454 : vector<4x32xf32>
    %515 = arith.addf %513, %514 : vector<4x32xf32>
    %516 = vector.broadcast %495 : vector<4x1xf32> to vector<4x32xf32>
    %517 = arith.mulf %516, %515 : vector<4x32xf32>
    %cst_127 = arith.constant 1.000000e+00 : f32
    %518 = vector.broadcast %cst_127 : f32 to vector<4x1xf32>
    %519 = arith.subf %518, %495 : vector<4x1xf32>
    %520 = vector.broadcast %519 : vector<4x1xf32> to vector<4x32xf32>
    %521 = arith.mulf %520, %454 : vector<4x32xf32>
    %522 = arith.addf %517, %521 : vector<4x32xf32>
    %523 = arith.truncf %491 : vector<4x32xf32> to vector<4x32xbf16>
    %cst_128 = arith.constant dense<0.000000e+00> : vector<4x192xf32>
    %524 = tpu.matmul %523, %216, %cst_128 {dimension_numbers = #tpu.dot_dimension_numbers<[1], [0], [0], [1], [0, 0, 1, 1], [], []>} : vector<4x32xbf16>, vector<32x192xbf16>, vector<4x192xf32> -> vector<4x192xf32>
    %525 = vector.extract_strided_slice %524 {offsets = [0, 96], sizes = [4, 96], strides = [1, 1]} : vector<4x192xf32> to vector<4x96xf32>
    %526 = arith.truncf %522 : vector<4x32xf32> to vector<4x32xbf16>
    %cst_129 = arith.constant dense<0.000000e+00> : vector<4x96xf32>
    %527 = tpu.matmul %526, %217, %cst_129 {dimension_numbers = #tpu.dot_dimension_numbers<[1], [0], [0], [1], [0, 0, 1, 1], [], []>} : vector<4x32xbf16>, vector<32x96xbf16>, vector<4x96xf32> -> vector<4x96xf32>
    %528 = vector.extract_strided_slice %524 {offsets = [0, 0], sizes = [4, 96], strides = [1, 1]} : vector<4x192xf32> to vector<4x96xf32>
    %c5_i32_130 = arith.constant 5 : i32
    %529 = vector.broadcast %c5_i32_130 : i32 to vector<4x1xi32>
    %530 = arith.cmpi sgt, %5, %529 : vector<4x1xi32>
    %531 = arith.extui %530 : vector<4x1xi1> to vector<4x1xi32>
    %532 = arith.sitofp %531 : vector<4x1xi32> to vector<4x1xf32>
    %533 = vector.extract_strided_slice %120 {offsets = [0, 0], sizes = [4, 64], strides = [1, 1]} : vector<4x96xf32> to vector<4x64xf32>
    %534 = vector.extract_strided_slice %528 {offsets = [0, 0], sizes = [4, 64], strides = [1, 1]} : vector<4x96xf32> to vector<4x64xf32>
    %535 = arith.addf %533, %534 : vector<4x64xf32>
    %536 = arith.negf %535 : vector<4x64xf32>
    %537 = math.exp %536 : vector<4x64xf32>
    %cst_131 = arith.constant 1.000000e+00 : f32
    %538 = vector.broadcast %cst_131 : f32 to vector<4x64xf32>
    %539 = arith.addf %538, %537 : vector<4x64xf32>
    %540 = arith.divf %538, %539 : vector<4x64xf32>
    %541 = vector.extract_strided_slice %540 {offsets = [0, 0], sizes = [4, 32], strides = [1, 1]} : vector<4x64xf32> to vector<4x32xf32>
    %542 = vector.extract_strided_slice %540 {offsets = [0, 32], sizes = [4, 32], strides = [1, 1]} : vector<4x64xf32> to vector<4x32xf32>
    %543 = vector.extract_strided_slice %120 {offsets = [0, 64], sizes = [4, 32], strides = [1, 1]} : vector<4x96xf32> to vector<4x32xf32>
    %544 = vector.extract_strided_slice %528 {offsets = [0, 64], sizes = [4, 32], strides = [1, 1]} : vector<4x96xf32> to vector<4x32xf32>
    %545 = arith.mulf %541, %544 : vector<4x32xf32>
    %546 = arith.addf %543, %545 : vector<4x32xf32>
    %547 = math.tanh %546 : vector<4x32xf32>
    %cst_132 = arith.constant 1.000000e+00 : f32
    %548 = vector.broadcast %cst_132 : f32 to vector<4x32xf32>
    %549 = arith.subf %548, %542 : vector<4x32xf32>
    %550 = arith.mulf %549, %547 : vector<4x32xf32>
    %551 = arith.mulf %542, %491 : vector<4x32xf32>
    %552 = arith.addf %550, %551 : vector<4x32xf32>
    %553 = vector.broadcast %532 : vector<4x1xf32> to vector<4x32xf32>
    %554 = arith.mulf %553, %552 : vector<4x32xf32>
    %cst_133 = arith.constant 1.000000e+00 : f32
    %555 = vector.broadcast %cst_133 : f32 to vector<4x1xf32>
    %556 = arith.subf %555, %532 : vector<4x1xf32>
    %557 = vector.broadcast %556 : vector<4x1xf32> to vector<4x32xf32>
    %558 = arith.mulf %557, %491 : vector<4x32xf32>
    %559 = arith.addf %554, %558 : vector<4x32xf32>
    %c4_i32_134 = arith.constant 4 : i32
    %560 = vector.broadcast %c4_i32_134 : i32 to vector<4x1xi32>
    %561 = arith.cmpi sgt, %5, %560 : vector<4x1xi32>
    %562 = arith.extui %561 : vector<4x1xi1> to vector<4x1xi32>
    %563 = arith.sitofp %562 : vector<4x1xi32> to vector<4x1xf32>
    %564 = vector.extract_strided_slice %525 {offsets = [0, 0], sizes = [4, 64], strides = [1, 1]} : vector<4x96xf32> to vector<4x64xf32>
    %565 = vector.extract_strided_slice %527 {offsets = [0, 0], sizes = [4, 64], strides = [1, 1]} : vector<4x96xf32> to vector<4x64xf32>
    %566 = arith.addf %564, %565 : vector<4x64xf32>
    %567 = arith.negf %566 : vector<4x64xf32>
    %568 = math.exp %567 : vector<4x64xf32>
    %cst_135 = arith.constant 1.000000e+00 : f32
    %569 = vector.broadcast %cst_135 : f32 to vector<4x64xf32>
    %570 = arith.addf %569, %568 : vector<4x64xf32>
    %571 = arith.divf %569, %570 : vector<4x64xf32>
    %572 = vector.extract_strided_slice %571 {offsets = [0, 0], sizes = [4, 32], strides = [1, 1]} : vector<4x64xf32> to vector<4x32xf32>
    %573 = vector.extract_strided_slice %571 {offsets = [0, 32], sizes = [4, 32], strides = [1, 1]} : vector<4x64xf32> to vector<4x32xf32>
    %574 = vector.extract_strided_slice %525 {offsets = [0, 64], sizes = [4, 32], strides = [1, 1]} : vector<4x96xf32> to vector<4x32xf32>
    %575 = vector.extract_strided_slice %527 {offsets = [0, 64], sizes = [4, 32], strides = [1, 1]} : vector<4x96xf32> to vector<4x32xf32>
    %576 = arith.mulf %572, %575 : vector<4x32xf32>
    %577 = arith.addf %574, %576 : vector<4x32xf32>
    %578 = math.tanh %577 : vector<4x32xf32>
    %cst_136 = arith.constant 1.000000e+00 : f32
    %579 = vector.broadcast %cst_136 : f32 to vector<4x32xf32>
    %580 = arith.subf %579, %573 : vector<4x32xf32>
    %581 = arith.mulf %580, %578 : vector<4x32xf32>
    %582 = arith.mulf %573, %522 : vector<4x32xf32>
    %583 = arith.addf %581, %582 : vector<4x32xf32>
    %584 = vector.broadcast %563 : vector<4x1xf32> to vector<4x32xf32>
    %585 = arith.mulf %584, %583 : vector<4x32xf32>
    %cst_137 = arith.constant 1.000000e+00 : f32
    %586 = vector.broadcast %cst_137 : f32 to vector<4x1xf32>
    %587 = arith.subf %586, %563 : vector<4x1xf32>
    %588 = vector.broadcast %587 : vector<4x1xf32> to vector<4x32xf32>
    %589 = arith.mulf %588, %522 : vector<4x32xf32>
    %590 = arith.addf %585, %589 : vector<4x32xf32>
    %591 = arith.truncf %559 : vector<4x32xf32> to vector<4x32xbf16>
    %cst_138 = arith.constant dense<0.000000e+00> : vector<4x192xf32>
    %592 = tpu.matmul %591, %216, %cst_138 {dimension_numbers = #tpu.dot_dimension_numbers<[1], [0], [0], [1], [0, 0, 1, 1], [], []>} : vector<4x32xbf16>, vector<32x192xbf16>, vector<4x192xf32> -> vector<4x192xf32>
    %593 = vector.extract_strided_slice %592 {offsets = [0, 96], sizes = [4, 96], strides = [1, 1]} : vector<4x192xf32> to vector<4x96xf32>
    %594 = arith.truncf %590 : vector<4x32xf32> to vector<4x32xbf16>
    %cst_139 = arith.constant dense<0.000000e+00> : vector<4x96xf32>
    %595 = tpu.matmul %594, %217, %cst_139 {dimension_numbers = #tpu.dot_dimension_numbers<[1], [0], [0], [1], [0, 0, 1, 1], [], []>} : vector<4x32xbf16>, vector<32x96xbf16>, vector<4x96xf32> -> vector<4x96xf32>
    %596 = vector.extract_strided_slice %592 {offsets = [0, 0], sizes = [4, 96], strides = [1, 1]} : vector<4x192xf32> to vector<4x96xf32>
    %c6_i32_140 = arith.constant 6 : i32
    %597 = vector.broadcast %c6_i32_140 : i32 to vector<4x1xi32>
    %598 = arith.cmpi sgt, %5, %597 : vector<4x1xi32>
    %599 = arith.extui %598 : vector<4x1xi1> to vector<4x1xi32>
    %600 = arith.sitofp %599 : vector<4x1xi32> to vector<4x1xf32>
    %601 = vector.extract_strided_slice %140 {offsets = [0, 0], sizes = [4, 64], strides = [1, 1]} : vector<4x96xf32> to vector<4x64xf32>
    %602 = vector.extract_strided_slice %596 {offsets = [0, 0], sizes = [4, 64], strides = [1, 1]} : vector<4x96xf32> to vector<4x64xf32>
    %603 = arith.addf %601, %602 : vector<4x64xf32>
    %604 = arith.negf %603 : vector<4x64xf32>
    %605 = math.exp %604 : vector<4x64xf32>
    %cst_141 = arith.constant 1.000000e+00 : f32
    %606 = vector.broadcast %cst_141 : f32 to vector<4x64xf32>
    %607 = arith.addf %606, %605 : vector<4x64xf32>
    %608 = arith.divf %606, %607 : vector<4x64xf32>
    %609 = vector.extract_strided_slice %608 {offsets = [0, 0], sizes = [4, 32], strides = [1, 1]} : vector<4x64xf32> to vector<4x32xf32>
    %610 = vector.extract_strided_slice %608 {offsets = [0, 32], sizes = [4, 32], strides = [1, 1]} : vector<4x64xf32> to vector<4x32xf32>
    %611 = vector.extract_strided_slice %140 {offsets = [0, 64], sizes = [4, 32], strides = [1, 1]} : vector<4x96xf32> to vector<4x32xf32>
    %612 = vector.extract_strided_slice %596 {offsets = [0, 64], sizes = [4, 32], strides = [1, 1]} : vector<4x96xf32> to vector<4x32xf32>
    %613 = arith.mulf %609, %612 : vector<4x32xf32>
    %614 = arith.addf %611, %613 : vector<4x32xf32>
    %615 = math.tanh %614 : vector<4x32xf32>
    %cst_142 = arith.constant 1.000000e+00 : f32
    %616 = vector.broadcast %cst_142 : f32 to vector<4x32xf32>
    %617 = arith.subf %616, %610 : vector<4x32xf32>
    %618 = arith.mulf %617, %615 : vector<4x32xf32>
    %619 = arith.mulf %610, %559 : vector<4x32xf32>
    %620 = arith.addf %618, %619 : vector<4x32xf32>
    %621 = vector.broadcast %600 : vector<4x1xf32> to vector<4x32xf32>
    %622 = arith.mulf %621, %620 : vector<4x32xf32>
    %cst_143 = arith.constant 1.000000e+00 : f32
    %623 = vector.broadcast %cst_143 : f32 to vector<4x1xf32>
    %624 = arith.subf %623, %600 : vector<4x1xf32>
    %625 = vector.broadcast %624 : vector<4x1xf32> to vector<4x32xf32>
    %626 = arith.mulf %625, %559 : vector<4x32xf32>
    %627 = arith.addf %622, %626 : vector<4x32xf32>
    %c5_i32_144 = arith.constant 5 : i32
    %628 = vector.broadcast %c5_i32_144 : i32 to vector<4x1xi32>
    %629 = arith.cmpi sgt, %5, %628 : vector<4x1xi32>
    %630 = arith.extui %629 : vector<4x1xi1> to vector<4x1xi32>
    %631 = arith.sitofp %630 : vector<4x1xi32> to vector<4x1xf32>
    %632 = vector.extract_strided_slice %593 {offsets = [0, 0], sizes = [4, 64], strides = [1, 1]} : vector<4x96xf32> to vector<4x64xf32>
    %633 = vector.extract_strided_slice %595 {offsets = [0, 0], sizes = [4, 64], strides = [1, 1]} : vector<4x96xf32> to vector<4x64xf32>
    %634 = arith.addf %632, %633 : vector<4x64xf32>
    %635 = arith.negf %634 : vector<4x64xf32>
    %636 = math.exp %635 : vector<4x64xf32>
    %cst_145 = arith.constant 1.000000e+00 : f32
    %637 = vector.broadcast %cst_145 : f32 to vector<4x64xf32>
    %638 = arith.addf %637, %636 : vector<4x64xf32>
    %639 = arith.divf %637, %638 : vector<4x64xf32>
    %640 = vector.extract_strided_slice %639 {offsets = [0, 0], sizes = [4, 32], strides = [1, 1]} : vector<4x64xf32> to vector<4x32xf32>
    %641 = vector.extract_strided_slice %639 {offsets = [0, 32], sizes = [4, 32], strides = [1, 1]} : vector<4x64xf32> to vector<4x32xf32>
    %642 = vector.extract_strided_slice %593 {offsets = [0, 64], sizes = [4, 32], strides = [1, 1]} : vector<4x96xf32> to vector<4x32xf32>
    %643 = vector.extract_strided_slice %595 {offsets = [0, 64], sizes = [4, 32], strides = [1, 1]} : vector<4x96xf32> to vector<4x32xf32>
    %644 = arith.mulf %640, %643 : vector<4x32xf32>
    %645 = arith.addf %642, %644 : vector<4x32xf32>
    %646 = math.tanh %645 : vector<4x32xf32>
    %cst_146 = arith.constant 1.000000e+00 : f32
    %647 = vector.broadcast %cst_146 : f32 to vector<4x32xf32>
    %648 = arith.subf %647, %641 : vector<4x32xf32>
    %649 = arith.mulf %648, %646 : vector<4x32xf32>
    %650 = arith.mulf %641, %590 : vector<4x32xf32>
    %651 = arith.addf %649, %650 : vector<4x32xf32>
    %652 = vector.broadcast %631 : vector<4x1xf32> to vector<4x32xf32>
    %653 = arith.mulf %652, %651 : vector<4x32xf32>
    %cst_147 = arith.constant 1.000000e+00 : f32
    %654 = vector.broadcast %cst_147 : f32 to vector<4x1xf32>
    %655 = arith.subf %654, %631 : vector<4x1xf32>
    %656 = vector.broadcast %655 : vector<4x1xf32> to vector<4x32xf32>
    %657 = arith.mulf %656, %590 : vector<4x32xf32>
    %658 = arith.addf %653, %657 : vector<4x32xf32>
    %659 = arith.truncf %627 : vector<4x32xf32> to vector<4x32xbf16>
    %cst_148 = arith.constant dense<0.000000e+00> : vector<4x192xf32>
    %660 = tpu.matmul %659, %216, %cst_148 {dimension_numbers = #tpu.dot_dimension_numbers<[1], [0], [0], [1], [0, 0, 1, 1], [], []>} : vector<4x32xbf16>, vector<32x192xbf16>, vector<4x192xf32> -> vector<4x192xf32>
    %661 = vector.extract_strided_slice %660 {offsets = [0, 96], sizes = [4, 96], strides = [1, 1]} : vector<4x192xf32> to vector<4x96xf32>
    %662 = arith.truncf %658 : vector<4x32xf32> to vector<4x32xbf16>
    %cst_149 = arith.constant dense<0.000000e+00> : vector<4x96xf32>
    %663 = tpu.matmul %662, %217, %cst_149 {dimension_numbers = #tpu.dot_dimension_numbers<[1], [0], [0], [1], [0, 0, 1, 1], [], []>} : vector<4x32xbf16>, vector<32x96xbf16>, vector<4x96xf32> -> vector<4x96xf32>
    %664 = vector.extract_strided_slice %660 {offsets = [0, 0], sizes = [4, 96], strides = [1, 1]} : vector<4x192xf32> to vector<4x96xf32>
    %c7_i32_150 = arith.constant 7 : i32
    %665 = vector.broadcast %c7_i32_150 : i32 to vector<4x1xi32>
    %666 = arith.cmpi sgt, %5, %665 : vector<4x1xi32>
    %667 = arith.extui %666 : vector<4x1xi1> to vector<4x1xi32>
    %668 = arith.sitofp %667 : vector<4x1xi32> to vector<4x1xf32>
    %669 = vector.extract_strided_slice %160 {offsets = [0, 0], sizes = [4, 64], strides = [1, 1]} : vector<4x96xf32> to vector<4x64xf32>
    %670 = vector.extract_strided_slice %664 {offsets = [0, 0], sizes = [4, 64], strides = [1, 1]} : vector<4x96xf32> to vector<4x64xf32>
    %671 = arith.addf %669, %670 : vector<4x64xf32>
    %672 = arith.negf %671 : vector<4x64xf32>
    %673 = math.exp %672 : vector<4x64xf32>
    %cst_151 = arith.constant 1.000000e+00 : f32
    %674 = vector.broadcast %cst_151 : f32 to vector<4x64xf32>
    %675 = arith.addf %674, %673 : vector<4x64xf32>
    %676 = arith.divf %674, %675 : vector<4x64xf32>
    %677 = vector.extract_strided_slice %676 {offsets = [0, 0], sizes = [4, 32], strides = [1, 1]} : vector<4x64xf32> to vector<4x32xf32>
    %678 = vector.extract_strided_slice %676 {offsets = [0, 32], sizes = [4, 32], strides = [1, 1]} : vector<4x64xf32> to vector<4x32xf32>
    %679 = vector.extract_strided_slice %160 {offsets = [0, 64], sizes = [4, 32], strides = [1, 1]} : vector<4x96xf32> to vector<4x32xf32>
    %680 = vector.extract_strided_slice %664 {offsets = [0, 64], sizes = [4, 32], strides = [1, 1]} : vector<4x96xf32> to vector<4x32xf32>
    %681 = arith.mulf %677, %680 : vector<4x32xf32>
    %682 = arith.addf %679, %681 : vector<4x32xf32>
    %683 = math.tanh %682 : vector<4x32xf32>
    %cst_152 = arith.constant 1.000000e+00 : f32
    %684 = vector.broadcast %cst_152 : f32 to vector<4x32xf32>
    %685 = arith.subf %684, %678 : vector<4x32xf32>
    %686 = arith.mulf %685, %683 : vector<4x32xf32>
    %687 = arith.mulf %678, %627 : vector<4x32xf32>
    %688 = arith.addf %686, %687 : vector<4x32xf32>
    %689 = vector.broadcast %668 : vector<4x1xf32> to vector<4x32xf32>
    %690 = arith.mulf %689, %688 : vector<4x32xf32>
    %cst_153 = arith.constant 1.000000e+00 : f32
    %691 = vector.broadcast %cst_153 : f32 to vector<4x1xf32>
    %692 = arith.subf %691, %668 : vector<4x1xf32>
    %693 = vector.broadcast %692 : vector<4x1xf32> to vector<4x32xf32>
    %694 = arith.mulf %693, %627 : vector<4x32xf32>
    %695 = arith.addf %690, %694 : vector<4x32xf32>
    %c6_i32_154 = arith.constant 6 : i32
    %696 = vector.broadcast %c6_i32_154 : i32 to vector<4x1xi32>
    %697 = arith.cmpi sgt, %5, %696 : vector<4x1xi32>
    %698 = arith.extui %697 : vector<4x1xi1> to vector<4x1xi32>
    %699 = arith.sitofp %698 : vector<4x1xi32> to vector<4x1xf32>
    %700 = vector.extract_strided_slice %661 {offsets = [0, 0], sizes = [4, 64], strides = [1, 1]} : vector<4x96xf32> to vector<4x64xf32>
    %701 = vector.extract_strided_slice %663 {offsets = [0, 0], sizes = [4, 64], strides = [1, 1]} : vector<4x96xf32> to vector<4x64xf32>
    %702 = arith.addf %700, %701 : vector<4x64xf32>
    %703 = arith.negf %702 : vector<4x64xf32>
    %704 = math.exp %703 : vector<4x64xf32>
    %cst_155 = arith.constant 1.000000e+00 : f32
    %705 = vector.broadcast %cst_155 : f32 to vector<4x64xf32>
    %706 = arith.addf %705, %704 : vector<4x64xf32>
    %707 = arith.divf %705, %706 : vector<4x64xf32>
    %708 = vector.extract_strided_slice %707 {offsets = [0, 0], sizes = [4, 32], strides = [1, 1]} : vector<4x64xf32> to vector<4x32xf32>
    %709 = vector.extract_strided_slice %707 {offsets = [0, 32], sizes = [4, 32], strides = [1, 1]} : vector<4x64xf32> to vector<4x32xf32>
    %710 = vector.extract_strided_slice %661 {offsets = [0, 64], sizes = [4, 32], strides = [1, 1]} : vector<4x96xf32> to vector<4x32xf32>
    %711 = vector.extract_strided_slice %663 {offsets = [0, 64], sizes = [4, 32], strides = [1, 1]} : vector<4x96xf32> to vector<4x32xf32>
    %712 = arith.mulf %708, %711 : vector<4x32xf32>
    %713 = arith.addf %710, %712 : vector<4x32xf32>
    %714 = math.tanh %713 : vector<4x32xf32>
    %cst_156 = arith.constant 1.000000e+00 : f32
    %715 = vector.broadcast %cst_156 : f32 to vector<4x32xf32>
    %716 = arith.subf %715, %709 : vector<4x32xf32>
    %717 = arith.mulf %716, %714 : vector<4x32xf32>
    %718 = arith.mulf %709, %658 : vector<4x32xf32>
    %719 = arith.addf %717, %718 : vector<4x32xf32>
    %720 = vector.broadcast %699 : vector<4x1xf32> to vector<4x32xf32>
    %721 = arith.mulf %720, %719 : vector<4x32xf32>
    %cst_157 = arith.constant 1.000000e+00 : f32
    %722 = vector.broadcast %cst_157 : f32 to vector<4x1xf32>
    %723 = arith.subf %722, %699 : vector<4x1xf32>
    %724 = vector.broadcast %723 : vector<4x1xf32> to vector<4x32xf32>
    %725 = arith.mulf %724, %658 : vector<4x32xf32>
    %726 = arith.addf %721, %725 : vector<4x32xf32>
    %727 = arith.truncf %695 : vector<4x32xf32> to vector<4x32xbf16>
    %cst_158 = arith.constant dense<0.000000e+00> : vector<4x192xf32>
    %728 = tpu.matmul %727, %216, %cst_158 {dimension_numbers = #tpu.dot_dimension_numbers<[1], [0], [0], [1], [0, 0, 1, 1], [], []>} : vector<4x32xbf16>, vector<32x192xbf16>, vector<4x192xf32> -> vector<4x192xf32>
    %729 = vector.extract_strided_slice %728 {offsets = [0, 96], sizes = [4, 96], strides = [1, 1]} : vector<4x192xf32> to vector<4x96xf32>
    %730 = arith.truncf %726 : vector<4x32xf32> to vector<4x32xbf16>
    %cst_159 = arith.constant dense<0.000000e+00> : vector<4x96xf32>
    %731 = tpu.matmul %730, %217, %cst_159 {dimension_numbers = #tpu.dot_dimension_numbers<[1], [0], [0], [1], [0, 0, 1, 1], [], []>} : vector<4x32xbf16>, vector<32x96xbf16>, vector<4x96xf32> -> vector<4x96xf32>
    %c7_i32_160 = arith.constant 7 : i32
    %732 = vector.broadcast %c7_i32_160 : i32 to vector<4x1xi32>
    %733 = arith.cmpi sgt, %5, %732 : vector<4x1xi32>
    %734 = arith.extui %733 : vector<4x1xi1> to vector<4x1xi32>
    %735 = arith.sitofp %734 : vector<4x1xi32> to vector<4x1xf32>
    %736 = vector.extract_strided_slice %729 {offsets = [0, 0], sizes = [4, 64], strides = [1, 1]} : vector<4x96xf32> to vector<4x64xf32>
    %737 = vector.extract_strided_slice %731 {offsets = [0, 0], sizes = [4, 64], strides = [1, 1]} : vector<4x96xf32> to vector<4x64xf32>
    %738 = arith.addf %736, %737 : vector<4x64xf32>
    %739 = arith.negf %738 : vector<4x64xf32>
    %740 = math.exp %739 : vector<4x64xf32>
    %cst_161 = arith.constant 1.000000e+00 : f32
    %741 = vector.broadcast %cst_161 : f32 to vector<4x64xf32>
    %742 = arith.addf %741, %740 : vector<4x64xf32>
    %743 = arith.divf %741, %742 : vector<4x64xf32>
    %744 = vector.extract_strided_slice %743 {offsets = [0, 0], sizes = [4, 32], strides = [1, 1]} : vector<4x64xf32> to vector<4x32xf32>
    %745 = vector.extract_strided_slice %743 {offsets = [0, 32], sizes = [4, 32], strides = [1, 1]} : vector<4x64xf32> to vector<4x32xf32>
    %746 = vector.extract_strided_slice %729 {offsets = [0, 64], sizes = [4, 32], strides = [1, 1]} : vector<4x96xf32> to vector<4x32xf32>
    %747 = vector.extract_strided_slice %731 {offsets = [0, 64], sizes = [4, 32], strides = [1, 1]} : vector<4x96xf32> to vector<4x32xf32>
    %748 = arith.mulf %744, %747 : vector<4x32xf32>
    %749 = arith.addf %746, %748 : vector<4x32xf32>
    %750 = math.tanh %749 : vector<4x32xf32>
    %cst_162 = arith.constant 1.000000e+00 : f32
    %751 = vector.broadcast %cst_162 : f32 to vector<4x32xf32>
    %752 = arith.subf %751, %745 : vector<4x32xf32>
    %753 = arith.mulf %752, %750 : vector<4x32xf32>
    %754 = arith.mulf %745, %726 : vector<4x32xf32>
    %755 = arith.addf %753, %754 : vector<4x32xf32>
    %756 = vector.broadcast %735 : vector<4x1xf32> to vector<4x32xf32>
    %757 = arith.mulf %756, %755 : vector<4x32xf32>
    %cst_163 = arith.constant 1.000000e+00 : f32
    %758 = vector.broadcast %cst_163 : f32 to vector<4x1xf32>
    %759 = arith.subf %758, %735 : vector<4x1xf32>
    %760 = vector.broadcast %759 : vector<4x1xf32> to vector<4x32xf32>
    %761 = arith.mulf %760, %726 : vector<4x32xf32>
    %762 = arith.addf %757, %761 : vector<4x32xf32>
    %cst_164 = arith.constant 0.000000e+00 : f32
    %763 = vector.broadcast %cst_164 : f32 to vector<4x32xf32>
    %764 = vector.extract_strided_slice %762 {offsets = [0, 0], sizes = [4, 1], strides = [1, 1]} : vector<4x32xf32> to vector<4x1xf32>
    %765 = vector.extract_strided_slice %215 {offsets = [0, 0], sizes = [4, 32], strides = [1, 1]} : vector<4x2048xf32> to vector<4x32xf32>
    %766 = vector.broadcast %764 : vector<4x1xf32> to vector<4x32xf32>
    %767 = arith.mulf %766, %765 : vector<4x32xf32>
    %768 = arith.addf %763, %767 : vector<4x32xf32>
    %769 = vector.extract_strided_slice %762 {offsets = [0, 1], sizes = [4, 1], strides = [1, 1]} : vector<4x32xf32> to vector<4x1xf32>
    %770 = vector.extract_strided_slice %215 {offsets = [0, 32], sizes = [4, 32], strides = [1, 1]} : vector<4x2048xf32> to vector<4x32xf32>
    %771 = vector.broadcast %769 : vector<4x1xf32> to vector<4x32xf32>
    %772 = arith.mulf %771, %770 : vector<4x32xf32>
    %773 = arith.addf %768, %772 : vector<4x32xf32>
    %774 = vector.extract_strided_slice %762 {offsets = [0, 2], sizes = [4, 1], strides = [1, 1]} : vector<4x32xf32> to vector<4x1xf32>
    %775 = vector.extract_strided_slice %215 {offsets = [0, 64], sizes = [4, 32], strides = [1, 1]} : vector<4x2048xf32> to vector<4x32xf32>
    %776 = vector.broadcast %774 : vector<4x1xf32> to vector<4x32xf32>
    %777 = arith.mulf %776, %775 : vector<4x32xf32>
    %778 = arith.addf %773, %777 : vector<4x32xf32>
    %779 = vector.extract_strided_slice %762 {offsets = [0, 3], sizes = [4, 1], strides = [1, 1]} : vector<4x32xf32> to vector<4x1xf32>
    %780 = vector.extract_strided_slice %215 {offsets = [0, 96], sizes = [4, 32], strides = [1, 1]} : vector<4x2048xf32> to vector<4x32xf32>
    %781 = vector.broadcast %779 : vector<4x1xf32> to vector<4x32xf32>
    %782 = arith.mulf %781, %780 : vector<4x32xf32>
    %783 = arith.addf %778, %782 : vector<4x32xf32>
    %784 = vector.extract_strided_slice %762 {offsets = [0, 4], sizes = [4, 1], strides = [1, 1]} : vector<4x32xf32> to vector<4x1xf32>
    %785 = vector.extract_strided_slice %215 {offsets = [0, 128], sizes = [4, 32], strides = [1, 1]} : vector<4x2048xf32> to vector<4x32xf32>
    %786 = vector.broadcast %784 : vector<4x1xf32> to vector<4x32xf32>
    %787 = arith.mulf %786, %785 : vector<4x32xf32>
    %788 = arith.addf %783, %787 : vector<4x32xf32>
    %789 = vector.extract_strided_slice %762 {offsets = [0, 5], sizes = [4, 1], strides = [1, 1]} : vector<4x32xf32> to vector<4x1xf32>
    %790 = vector.extract_strided_slice %215 {offsets = [0, 160], sizes = [4, 32], strides = [1, 1]} : vector<4x2048xf32> to vector<4x32xf32>
    %791 = vector.broadcast %789 : vector<4x1xf32> to vector<4x32xf32>
    %792 = arith.mulf %791, %790 : vector<4x32xf32>
    %793 = arith.addf %788, %792 : vector<4x32xf32>
    %794 = vector.extract_strided_slice %762 {offsets = [0, 6], sizes = [4, 1], strides = [1, 1]} : vector<4x32xf32> to vector<4x1xf32>
    %795 = vector.extract_strided_slice %215 {offsets = [0, 192], sizes = [4, 32], strides = [1, 1]} : vector<4x2048xf32> to vector<4x32xf32>
    %796 = vector.broadcast %794 : vector<4x1xf32> to vector<4x32xf32>
    %797 = arith.mulf %796, %795 : vector<4x32xf32>
    %798 = arith.addf %793, %797 : vector<4x32xf32>
    %799 = vector.extract_strided_slice %762 {offsets = [0, 7], sizes = [4, 1], strides = [1, 1]} : vector<4x32xf32> to vector<4x1xf32>
    %800 = vector.extract_strided_slice %215 {offsets = [0, 224], sizes = [4, 32], strides = [1, 1]} : vector<4x2048xf32> to vector<4x32xf32>
    %801 = vector.broadcast %799 : vector<4x1xf32> to vector<4x32xf32>
    %802 = arith.mulf %801, %800 : vector<4x32xf32>
    %803 = arith.addf %798, %802 : vector<4x32xf32>
    %804 = vector.extract_strided_slice %762 {offsets = [0, 8], sizes = [4, 1], strides = [1, 1]} : vector<4x32xf32> to vector<4x1xf32>
    %805 = vector.extract_strided_slice %215 {offsets = [0, 256], sizes = [4, 32], strides = [1, 1]} : vector<4x2048xf32> to vector<4x32xf32>
    %806 = vector.broadcast %804 : vector<4x1xf32> to vector<4x32xf32>
    %807 = arith.mulf %806, %805 : vector<4x32xf32>
    %808 = arith.addf %803, %807 : vector<4x32xf32>
    %809 = vector.extract_strided_slice %762 {offsets = [0, 9], sizes = [4, 1], strides = [1, 1]} : vector<4x32xf32> to vector<4x1xf32>
    %810 = vector.extract_strided_slice %215 {offsets = [0, 288], sizes = [4, 32], strides = [1, 1]} : vector<4x2048xf32> to vector<4x32xf32>
    %811 = vector.broadcast %809 : vector<4x1xf32> to vector<4x32xf32>
    %812 = arith.mulf %811, %810 : vector<4x32xf32>
    %813 = arith.addf %808, %812 : vector<4x32xf32>
    %814 = vector.extract_strided_slice %762 {offsets = [0, 10], sizes = [4, 1], strides = [1, 1]} : vector<4x32xf32> to vector<4x1xf32>
    %815 = vector.extract_strided_slice %215 {offsets = [0, 320], sizes = [4, 32], strides = [1, 1]} : vector<4x2048xf32> to vector<4x32xf32>
    %816 = vector.broadcast %814 : vector<4x1xf32> to vector<4x32xf32>
    %817 = arith.mulf %816, %815 : vector<4x32xf32>
    %818 = arith.addf %813, %817 : vector<4x32xf32>
    %819 = vector.extract_strided_slice %762 {offsets = [0, 11], sizes = [4, 1], strides = [1, 1]} : vector<4x32xf32> to vector<4x1xf32>
    %820 = vector.extract_strided_slice %215 {offsets = [0, 352], sizes = [4, 32], strides = [1, 1]} : vector<4x2048xf32> to vector<4x32xf32>
    %821 = vector.broadcast %819 : vector<4x1xf32> to vector<4x32xf32>
    %822 = arith.mulf %821, %820 : vector<4x32xf32>
    %823 = arith.addf %818, %822 : vector<4x32xf32>
    %824 = vector.extract_strided_slice %762 {offsets = [0, 12], sizes = [4, 1], strides = [1, 1]} : vector<4x32xf32> to vector<4x1xf32>
    %825 = vector.extract_strided_slice %215 {offsets = [0, 384], sizes = [4, 32], strides = [1, 1]} : vector<4x2048xf32> to vector<4x32xf32>
    %826 = vector.broadcast %824 : vector<4x1xf32> to vector<4x32xf32>
    %827 = arith.mulf %826, %825 : vector<4x32xf32>
    %828 = arith.addf %823, %827 : vector<4x32xf32>
    %829 = vector.extract_strided_slice %762 {offsets = [0, 13], sizes = [4, 1], strides = [1, 1]} : vector<4x32xf32> to vector<4x1xf32>
    %830 = vector.extract_strided_slice %215 {offsets = [0, 416], sizes = [4, 32], strides = [1, 1]} : vector<4x2048xf32> to vector<4x32xf32>
    %831 = vector.broadcast %829 : vector<4x1xf32> to vector<4x32xf32>
    %832 = arith.mulf %831, %830 : vector<4x32xf32>
    %833 = arith.addf %828, %832 : vector<4x32xf32>
    %834 = vector.extract_strided_slice %762 {offsets = [0, 14], sizes = [4, 1], strides = [1, 1]} : vector<4x32xf32> to vector<4x1xf32>
    %835 = vector.extract_strided_slice %215 {offsets = [0, 448], sizes = [4, 32], strides = [1, 1]} : vector<4x2048xf32> to vector<4x32xf32>
    %836 = vector.broadcast %834 : vector<4x1xf32> to vector<4x32xf32>
    %837 = arith.mulf %836, %835 : vector<4x32xf32>
    %838 = arith.addf %833, %837 : vector<4x32xf32>
    %839 = vector.extract_strided_slice %762 {offsets = [0, 15], sizes = [4, 1], strides = [1, 1]} : vector<4x32xf32> to vector<4x1xf32>
    %840 = vector.extract_strided_slice %215 {offsets = [0, 480], sizes = [4, 32], strides = [1, 1]} : vector<4x2048xf32> to vector<4x32xf32>
    %841 = vector.broadcast %839 : vector<4x1xf32> to vector<4x32xf32>
    %842 = arith.mulf %841, %840 : vector<4x32xf32>
    %843 = arith.addf %838, %842 : vector<4x32xf32>
    %844 = vector.extract_strided_slice %762 {offsets = [0, 16], sizes = [4, 1], strides = [1, 1]} : vector<4x32xf32> to vector<4x1xf32>
    %845 = vector.extract_strided_slice %215 {offsets = [0, 512], sizes = [4, 32], strides = [1, 1]} : vector<4x2048xf32> to vector<4x32xf32>
    %846 = vector.broadcast %844 : vector<4x1xf32> to vector<4x32xf32>
    %847 = arith.mulf %846, %845 : vector<4x32xf32>
    %848 = arith.addf %843, %847 : vector<4x32xf32>
    %849 = vector.extract_strided_slice %762 {offsets = [0, 17], sizes = [4, 1], strides = [1, 1]} : vector<4x32xf32> to vector<4x1xf32>
    %850 = vector.extract_strided_slice %215 {offsets = [0, 544], sizes = [4, 32], strides = [1, 1]} : vector<4x2048xf32> to vector<4x32xf32>
    %851 = vector.broadcast %849 : vector<4x1xf32> to vector<4x32xf32>
    %852 = arith.mulf %851, %850 : vector<4x32xf32>
    %853 = arith.addf %848, %852 : vector<4x32xf32>
    %854 = vector.extract_strided_slice %762 {offsets = [0, 18], sizes = [4, 1], strides = [1, 1]} : vector<4x32xf32> to vector<4x1xf32>
    %855 = vector.extract_strided_slice %215 {offsets = [0, 576], sizes = [4, 32], strides = [1, 1]} : vector<4x2048xf32> to vector<4x32xf32>
    %856 = vector.broadcast %854 : vector<4x1xf32> to vector<4x32xf32>
    %857 = arith.mulf %856, %855 : vector<4x32xf32>
    %858 = arith.addf %853, %857 : vector<4x32xf32>
    %859 = vector.extract_strided_slice %762 {offsets = [0, 19], sizes = [4, 1], strides = [1, 1]} : vector<4x32xf32> to vector<4x1xf32>
    %860 = vector.extract_strided_slice %215 {offsets = [0, 608], sizes = [4, 32], strides = [1, 1]} : vector<4x2048xf32> to vector<4x32xf32>
    %861 = vector.broadcast %859 : vector<4x1xf32> to vector<4x32xf32>
    %862 = arith.mulf %861, %860 : vector<4x32xf32>
    %863 = arith.addf %858, %862 : vector<4x32xf32>
    %864 = vector.extract_strided_slice %762 {offsets = [0, 20], sizes = [4, 1], strides = [1, 1]} : vector<4x32xf32> to vector<4x1xf32>
    %865 = vector.extract_strided_slice %215 {offsets = [0, 640], sizes = [4, 32], strides = [1, 1]} : vector<4x2048xf32> to vector<4x32xf32>
    %866 = vector.broadcast %864 : vector<4x1xf32> to vector<4x32xf32>
    %867 = arith.mulf %866, %865 : vector<4x32xf32>
    %868 = arith.addf %863, %867 : vector<4x32xf32>
    %869 = vector.extract_strided_slice %762 {offsets = [0, 21], sizes = [4, 1], strides = [1, 1]} : vector<4x32xf32> to vector<4x1xf32>
    %870 = vector.extract_strided_slice %215 {offsets = [0, 672], sizes = [4, 32], strides = [1, 1]} : vector<4x2048xf32> to vector<4x32xf32>
    %871 = vector.broadcast %869 : vector<4x1xf32> to vector<4x32xf32>
    %872 = arith.mulf %871, %870 : vector<4x32xf32>
    %873 = arith.addf %868, %872 : vector<4x32xf32>
    %874 = vector.extract_strided_slice %762 {offsets = [0, 22], sizes = [4, 1], strides = [1, 1]} : vector<4x32xf32> to vector<4x1xf32>
    %875 = vector.extract_strided_slice %215 {offsets = [0, 704], sizes = [4, 32], strides = [1, 1]} : vector<4x2048xf32> to vector<4x32xf32>
    %876 = vector.broadcast %874 : vector<4x1xf32> to vector<4x32xf32>
    %877 = arith.mulf %876, %875 : vector<4x32xf32>
    %878 = arith.addf %873, %877 : vector<4x32xf32>
    %879 = vector.extract_strided_slice %762 {offsets = [0, 23], sizes = [4, 1], strides = [1, 1]} : vector<4x32xf32> to vector<4x1xf32>
    %880 = vector.extract_strided_slice %215 {offsets = [0, 736], sizes = [4, 32], strides = [1, 1]} : vector<4x2048xf32> to vector<4x32xf32>
    %881 = vector.broadcast %879 : vector<4x1xf32> to vector<4x32xf32>
    %882 = arith.mulf %881, %880 : vector<4x32xf32>
    %883 = arith.addf %878, %882 : vector<4x32xf32>
    %884 = vector.extract_strided_slice %762 {offsets = [0, 24], sizes = [4, 1], strides = [1, 1]} : vector<4x32xf32> to vector<4x1xf32>
    %885 = vector.extract_strided_slice %215 {offsets = [0, 768], sizes = [4, 32], strides = [1, 1]} : vector<4x2048xf32> to vector<4x32xf32>
    %886 = vector.broadcast %884 : vector<4x1xf32> to vector<4x32xf32>
    %887 = arith.mulf %886, %885 : vector<4x32xf32>
    %888 = arith.addf %883, %887 : vector<4x32xf32>
    %889 = vector.extract_strided_slice %762 {offsets = [0, 25], sizes = [4, 1], strides = [1, 1]} : vector<4x32xf32> to vector<4x1xf32>
    %890 = vector.extract_strided_slice %215 {offsets = [0, 800], sizes = [4, 32], strides = [1, 1]} : vector<4x2048xf32> to vector<4x32xf32>
    %891 = vector.broadcast %889 : vector<4x1xf32> to vector<4x32xf32>
    %892 = arith.mulf %891, %890 : vector<4x32xf32>
    %893 = arith.addf %888, %892 : vector<4x32xf32>
    %894 = vector.extract_strided_slice %762 {offsets = [0, 26], sizes = [4, 1], strides = [1, 1]} : vector<4x32xf32> to vector<4x1xf32>
    %895 = vector.extract_strided_slice %215 {offsets = [0, 832], sizes = [4, 32], strides = [1, 1]} : vector<4x2048xf32> to vector<4x32xf32>
    %896 = vector.broadcast %894 : vector<4x1xf32> to vector<4x32xf32>
    %897 = arith.mulf %896, %895 : vector<4x32xf32>
    %898 = arith.addf %893, %897 : vector<4x32xf32>
    %899 = vector.extract_strided_slice %762 {offsets = [0, 27], sizes = [4, 1], strides = [1, 1]} : vector<4x32xf32> to vector<4x1xf32>
    %900 = vector.extract_strided_slice %215 {offsets = [0, 864], sizes = [4, 32], strides = [1, 1]} : vector<4x2048xf32> to vector<4x32xf32>
    %901 = vector.broadcast %899 : vector<4x1xf32> to vector<4x32xf32>
    %902 = arith.mulf %901, %900 : vector<4x32xf32>
    %903 = arith.addf %898, %902 : vector<4x32xf32>
    %904 = vector.extract_strided_slice %762 {offsets = [0, 28], sizes = [4, 1], strides = [1, 1]} : vector<4x32xf32> to vector<4x1xf32>
    %905 = vector.extract_strided_slice %215 {offsets = [0, 896], sizes = [4, 32], strides = [1, 1]} : vector<4x2048xf32> to vector<4x32xf32>
    %906 = vector.broadcast %904 : vector<4x1xf32> to vector<4x32xf32>
    %907 = arith.mulf %906, %905 : vector<4x32xf32>
    %908 = arith.addf %903, %907 : vector<4x32xf32>
    %909 = vector.extract_strided_slice %762 {offsets = [0, 29], sizes = [4, 1], strides = [1, 1]} : vector<4x32xf32> to vector<4x1xf32>
    %910 = vector.extract_strided_slice %215 {offsets = [0, 928], sizes = [4, 32], strides = [1, 1]} : vector<4x2048xf32> to vector<4x32xf32>
    %911 = vector.broadcast %909 : vector<4x1xf32> to vector<4x32xf32>
    %912 = arith.mulf %911, %910 : vector<4x32xf32>
    %913 = arith.addf %908, %912 : vector<4x32xf32>
    %914 = vector.extract_strided_slice %762 {offsets = [0, 30], sizes = [4, 1], strides = [1, 1]} : vector<4x32xf32> to vector<4x1xf32>
    %915 = vector.extract_strided_slice %215 {offsets = [0, 960], sizes = [4, 32], strides = [1, 1]} : vector<4x2048xf32> to vector<4x32xf32>
    %916 = vector.broadcast %914 : vector<4x1xf32> to vector<4x32xf32>
    %917 = arith.mulf %916, %915 : vector<4x32xf32>
    %918 = arith.addf %913, %917 : vector<4x32xf32>
    %919 = vector.extract_strided_slice %762 {offsets = [0, 31], sizes = [4, 1], strides = [1, 1]} : vector<4x32xf32> to vector<4x1xf32>
    %920 = vector.extract_strided_slice %215 {offsets = [0, 992], sizes = [4, 32], strides = [1, 1]} : vector<4x2048xf32> to vector<4x32xf32>
    %921 = vector.broadcast %919 : vector<4x1xf32> to vector<4x32xf32>
    %922 = arith.mulf %921, %920 : vector<4x32xf32>
    %923 = arith.addf %918, %922 : vector<4x32xf32>
    %924 = math.tanh %923 : vector<4x32xf32>
    %cst_165 = arith.constant 0.000000e+00 : f32
    %925 = vector.broadcast %cst_165 : f32 to vector<4x32xf32>
    %926 = vector.extract_strided_slice %924 {offsets = [0, 0], sizes = [4, 1], strides = [1, 1]} : vector<4x32xf32> to vector<4x1xf32>
    %927 = vector.extract_strided_slice %215 {offsets = [0, 1024], sizes = [4, 32], strides = [1, 1]} : vector<4x2048xf32> to vector<4x32xf32>
    %928 = vector.broadcast %926 : vector<4x1xf32> to vector<4x32xf32>
    %929 = arith.mulf %928, %927 : vector<4x32xf32>
    %930 = arith.addf %925, %929 : vector<4x32xf32>
    %931 = vector.extract_strided_slice %924 {offsets = [0, 1], sizes = [4, 1], strides = [1, 1]} : vector<4x32xf32> to vector<4x1xf32>
    %932 = vector.extract_strided_slice %215 {offsets = [0, 1056], sizes = [4, 32], strides = [1, 1]} : vector<4x2048xf32> to vector<4x32xf32>
    %933 = vector.broadcast %931 : vector<4x1xf32> to vector<4x32xf32>
    %934 = arith.mulf %933, %932 : vector<4x32xf32>
    %935 = arith.addf %930, %934 : vector<4x32xf32>
    %936 = vector.extract_strided_slice %924 {offsets = [0, 2], sizes = [4, 1], strides = [1, 1]} : vector<4x32xf32> to vector<4x1xf32>
    %937 = vector.extract_strided_slice %215 {offsets = [0, 1088], sizes = [4, 32], strides = [1, 1]} : vector<4x2048xf32> to vector<4x32xf32>
    %938 = vector.broadcast %936 : vector<4x1xf32> to vector<4x32xf32>
    %939 = arith.mulf %938, %937 : vector<4x32xf32>
    %940 = arith.addf %935, %939 : vector<4x32xf32>
    %941 = vector.extract_strided_slice %924 {offsets = [0, 3], sizes = [4, 1], strides = [1, 1]} : vector<4x32xf32> to vector<4x1xf32>
    %942 = vector.extract_strided_slice %215 {offsets = [0, 1120], sizes = [4, 32], strides = [1, 1]} : vector<4x2048xf32> to vector<4x32xf32>
    %943 = vector.broadcast %941 : vector<4x1xf32> to vector<4x32xf32>
    %944 = arith.mulf %943, %942 : vector<4x32xf32>
    %945 = arith.addf %940, %944 : vector<4x32xf32>
    %946 = vector.extract_strided_slice %924 {offsets = [0, 4], sizes = [4, 1], strides = [1, 1]} : vector<4x32xf32> to vector<4x1xf32>
    %947 = vector.extract_strided_slice %215 {offsets = [0, 1152], sizes = [4, 32], strides = [1, 1]} : vector<4x2048xf32> to vector<4x32xf32>
    %948 = vector.broadcast %946 : vector<4x1xf32> to vector<4x32xf32>
    %949 = arith.mulf %948, %947 : vector<4x32xf32>
    %950 = arith.addf %945, %949 : vector<4x32xf32>
    %951 = vector.extract_strided_slice %924 {offsets = [0, 5], sizes = [4, 1], strides = [1, 1]} : vector<4x32xf32> to vector<4x1xf32>
    %952 = vector.extract_strided_slice %215 {offsets = [0, 1184], sizes = [4, 32], strides = [1, 1]} : vector<4x2048xf32> to vector<4x32xf32>
    %953 = vector.broadcast %951 : vector<4x1xf32> to vector<4x32xf32>
    %954 = arith.mulf %953, %952 : vector<4x32xf32>
    %955 = arith.addf %950, %954 : vector<4x32xf32>
    %956 = vector.extract_strided_slice %924 {offsets = [0, 6], sizes = [4, 1], strides = [1, 1]} : vector<4x32xf32> to vector<4x1xf32>
    %957 = vector.extract_strided_slice %215 {offsets = [0, 1216], sizes = [4, 32], strides = [1, 1]} : vector<4x2048xf32> to vector<4x32xf32>
    %958 = vector.broadcast %956 : vector<4x1xf32> to vector<4x32xf32>
    %959 = arith.mulf %958, %957 : vector<4x32xf32>
    %960 = arith.addf %955, %959 : vector<4x32xf32>
    %961 = vector.extract_strided_slice %924 {offsets = [0, 7], sizes = [4, 1], strides = [1, 1]} : vector<4x32xf32> to vector<4x1xf32>
    %962 = vector.extract_strided_slice %215 {offsets = [0, 1248], sizes = [4, 32], strides = [1, 1]} : vector<4x2048xf32> to vector<4x32xf32>
    %963 = vector.broadcast %961 : vector<4x1xf32> to vector<4x32xf32>
    %964 = arith.mulf %963, %962 : vector<4x32xf32>
    %965 = arith.addf %960, %964 : vector<4x32xf32>
    %966 = vector.extract_strided_slice %924 {offsets = [0, 8], sizes = [4, 1], strides = [1, 1]} : vector<4x32xf32> to vector<4x1xf32>
    %967 = vector.extract_strided_slice %215 {offsets = [0, 1280], sizes = [4, 32], strides = [1, 1]} : vector<4x2048xf32> to vector<4x32xf32>
    %968 = vector.broadcast %966 : vector<4x1xf32> to vector<4x32xf32>
    %969 = arith.mulf %968, %967 : vector<4x32xf32>
    %970 = arith.addf %965, %969 : vector<4x32xf32>
    %971 = vector.extract_strided_slice %924 {offsets = [0, 9], sizes = [4, 1], strides = [1, 1]} : vector<4x32xf32> to vector<4x1xf32>
    %972 = vector.extract_strided_slice %215 {offsets = [0, 1312], sizes = [4, 32], strides = [1, 1]} : vector<4x2048xf32> to vector<4x32xf32>
    %973 = vector.broadcast %971 : vector<4x1xf32> to vector<4x32xf32>
    %974 = arith.mulf %973, %972 : vector<4x32xf32>
    %975 = arith.addf %970, %974 : vector<4x32xf32>
    %976 = vector.extract_strided_slice %924 {offsets = [0, 10], sizes = [4, 1], strides = [1, 1]} : vector<4x32xf32> to vector<4x1xf32>
    %977 = vector.extract_strided_slice %215 {offsets = [0, 1344], sizes = [4, 32], strides = [1, 1]} : vector<4x2048xf32> to vector<4x32xf32>
    %978 = vector.broadcast %976 : vector<4x1xf32> to vector<4x32xf32>
    %979 = arith.mulf %978, %977 : vector<4x32xf32>
    %980 = arith.addf %975, %979 : vector<4x32xf32>
    %981 = vector.extract_strided_slice %924 {offsets = [0, 11], sizes = [4, 1], strides = [1, 1]} : vector<4x32xf32> to vector<4x1xf32>
    %982 = vector.extract_strided_slice %215 {offsets = [0, 1376], sizes = [4, 32], strides = [1, 1]} : vector<4x2048xf32> to vector<4x32xf32>
    %983 = vector.broadcast %981 : vector<4x1xf32> to vector<4x32xf32>
    %984 = arith.mulf %983, %982 : vector<4x32xf32>
    %985 = arith.addf %980, %984 : vector<4x32xf32>
    %986 = vector.extract_strided_slice %924 {offsets = [0, 12], sizes = [4, 1], strides = [1, 1]} : vector<4x32xf32> to vector<4x1xf32>
    %987 = vector.extract_strided_slice %215 {offsets = [0, 1408], sizes = [4, 32], strides = [1, 1]} : vector<4x2048xf32> to vector<4x32xf32>
    %988 = vector.broadcast %986 : vector<4x1xf32> to vector<4x32xf32>
    %989 = arith.mulf %988, %987 : vector<4x32xf32>
    %990 = arith.addf %985, %989 : vector<4x32xf32>
    %991 = vector.extract_strided_slice %924 {offsets = [0, 13], sizes = [4, 1], strides = [1, 1]} : vector<4x32xf32> to vector<4x1xf32>
    %992 = vector.extract_strided_slice %215 {offsets = [0, 1440], sizes = [4, 32], strides = [1, 1]} : vector<4x2048xf32> to vector<4x32xf32>
    %993 = vector.broadcast %991 : vector<4x1xf32> to vector<4x32xf32>
    %994 = arith.mulf %993, %992 : vector<4x32xf32>
    %995 = arith.addf %990, %994 : vector<4x32xf32>
    %996 = vector.extract_strided_slice %924 {offsets = [0, 14], sizes = [4, 1], strides = [1, 1]} : vector<4x32xf32> to vector<4x1xf32>
    %997 = vector.extract_strided_slice %215 {offsets = [0, 1472], sizes = [4, 32], strides = [1, 1]} : vector<4x2048xf32> to vector<4x32xf32>
    %998 = vector.broadcast %996 : vector<4x1xf32> to vector<4x32xf32>
    %999 = arith.mulf %998, %997 : vector<4x32xf32>
    %1000 = arith.addf %995, %999 : vector<4x32xf32>
    %1001 = vector.extract_strided_slice %924 {offsets = [0, 15], sizes = [4, 1], strides = [1, 1]} : vector<4x32xf32> to vector<4x1xf32>
    %1002 = vector.extract_strided_slice %215 {offsets = [0, 1504], sizes = [4, 32], strides = [1, 1]} : vector<4x2048xf32> to vector<4x32xf32>
    %1003 = vector.broadcast %1001 : vector<4x1xf32> to vector<4x32xf32>
    %1004 = arith.mulf %1003, %1002 : vector<4x32xf32>
    %1005 = arith.addf %1000, %1004 : vector<4x32xf32>
    %1006 = vector.extract_strided_slice %924 {offsets = [0, 16], sizes = [4, 1], strides = [1, 1]} : vector<4x32xf32> to vector<4x1xf32>
    %1007 = vector.extract_strided_slice %215 {offsets = [0, 1536], sizes = [4, 32], strides = [1, 1]} : vector<4x2048xf32> to vector<4x32xf32>
    %1008 = vector.broadcast %1006 : vector<4x1xf32> to vector<4x32xf32>
    %1009 = arith.mulf %1008, %1007 : vector<4x32xf32>
    %1010 = arith.addf %1005, %1009 : vector<4x32xf32>
    %1011 = vector.extract_strided_slice %924 {offsets = [0, 17], sizes = [4, 1], strides = [1, 1]} : vector<4x32xf32> to vector<4x1xf32>
    %1012 = vector.extract_strided_slice %215 {offsets = [0, 1568], sizes = [4, 32], strides = [1, 1]} : vector<4x2048xf32> to vector<4x32xf32>
    %1013 = vector.broadcast %1011 : vector<4x1xf32> to vector<4x32xf32>
    %1014 = arith.mulf %1013, %1012 : vector<4x32xf32>
    %1015 = arith.addf %1010, %1014 : vector<4x32xf32>
    %1016 = vector.extract_strided_slice %924 {offsets = [0, 18], sizes = [4, 1], strides = [1, 1]} : vector<4x32xf32> to vector<4x1xf32>
    %1017 = vector.extract_strided_slice %215 {offsets = [0, 1600], sizes = [4, 32], strides = [1, 1]} : vector<4x2048xf32> to vector<4x32xf32>
    %1018 = vector.broadcast %1016 : vector<4x1xf32> to vector<4x32xf32>
    %1019 = arith.mulf %1018, %1017 : vector<4x32xf32>
    %1020 = arith.addf %1015, %1019 : vector<4x32xf32>
    %1021 = vector.extract_strided_slice %924 {offsets = [0, 19], sizes = [4, 1], strides = [1, 1]} : vector<4x32xf32> to vector<4x1xf32>
    %1022 = vector.extract_strided_slice %215 {offsets = [0, 1632], sizes = [4, 32], strides = [1, 1]} : vector<4x2048xf32> to vector<4x32xf32>
    %1023 = vector.broadcast %1021 : vector<4x1xf32> to vector<4x32xf32>
    %1024 = arith.mulf %1023, %1022 : vector<4x32xf32>
    %1025 = arith.addf %1020, %1024 : vector<4x32xf32>
    %1026 = vector.extract_strided_slice %924 {offsets = [0, 20], sizes = [4, 1], strides = [1, 1]} : vector<4x32xf32> to vector<4x1xf32>
    %1027 = vector.extract_strided_slice %215 {offsets = [0, 1664], sizes = [4, 32], strides = [1, 1]} : vector<4x2048xf32> to vector<4x32xf32>
    %1028 = vector.broadcast %1026 : vector<4x1xf32> to vector<4x32xf32>
    %1029 = arith.mulf %1028, %1027 : vector<4x32xf32>
    %1030 = arith.addf %1025, %1029 : vector<4x32xf32>
    %1031 = vector.extract_strided_slice %924 {offsets = [0, 21], sizes = [4, 1], strides = [1, 1]} : vector<4x32xf32> to vector<4x1xf32>
    %1032 = vector.extract_strided_slice %215 {offsets = [0, 1696], sizes = [4, 32], strides = [1, 1]} : vector<4x2048xf32> to vector<4x32xf32>
    %1033 = vector.broadcast %1031 : vector<4x1xf32> to vector<4x32xf32>
    %1034 = arith.mulf %1033, %1032 : vector<4x32xf32>
    %1035 = arith.addf %1030, %1034 : vector<4x32xf32>
    %1036 = vector.extract_strided_slice %924 {offsets = [0, 22], sizes = [4, 1], strides = [1, 1]} : vector<4x32xf32> to vector<4x1xf32>
    %1037 = vector.extract_strided_slice %215 {offsets = [0, 1728], sizes = [4, 32], strides = [1, 1]} : vector<4x2048xf32> to vector<4x32xf32>
    %1038 = vector.broadcast %1036 : vector<4x1xf32> to vector<4x32xf32>
    %1039 = arith.mulf %1038, %1037 : vector<4x32xf32>
    %1040 = arith.addf %1035, %1039 : vector<4x32xf32>
    %1041 = vector.extract_strided_slice %924 {offsets = [0, 23], sizes = [4, 1], strides = [1, 1]} : vector<4x32xf32> to vector<4x1xf32>
    %1042 = vector.extract_strided_slice %215 {offsets = [0, 1760], sizes = [4, 32], strides = [1, 1]} : vector<4x2048xf32> to vector<4x32xf32>
    %1043 = vector.broadcast %1041 : vector<4x1xf32> to vector<4x32xf32>
    %1044 = arith.mulf %1043, %1042 : vector<4x32xf32>
    %1045 = arith.addf %1040, %1044 : vector<4x32xf32>
    %1046 = vector.extract_strided_slice %924 {offsets = [0, 24], sizes = [4, 1], strides = [1, 1]} : vector<4x32xf32> to vector<4x1xf32>
    %1047 = vector.extract_strided_slice %215 {offsets = [0, 1792], sizes = [4, 32], strides = [1, 1]} : vector<4x2048xf32> to vector<4x32xf32>
    %1048 = vector.broadcast %1046 : vector<4x1xf32> to vector<4x32xf32>
    %1049 = arith.mulf %1048, %1047 : vector<4x32xf32>
    %1050 = arith.addf %1045, %1049 : vector<4x32xf32>
    %1051 = vector.extract_strided_slice %924 {offsets = [0, 25], sizes = [4, 1], strides = [1, 1]} : vector<4x32xf32> to vector<4x1xf32>
    %1052 = vector.extract_strided_slice %215 {offsets = [0, 1824], sizes = [4, 32], strides = [1, 1]} : vector<4x2048xf32> to vector<4x32xf32>
    %1053 = vector.broadcast %1051 : vector<4x1xf32> to vector<4x32xf32>
    %1054 = arith.mulf %1053, %1052 : vector<4x32xf32>
    %1055 = arith.addf %1050, %1054 : vector<4x32xf32>
    %1056 = vector.extract_strided_slice %924 {offsets = [0, 26], sizes = [4, 1], strides = [1, 1]} : vector<4x32xf32> to vector<4x1xf32>
    %1057 = vector.extract_strided_slice %215 {offsets = [0, 1856], sizes = [4, 32], strides = [1, 1]} : vector<4x2048xf32> to vector<4x32xf32>
    %1058 = vector.broadcast %1056 : vector<4x1xf32> to vector<4x32xf32>
    %1059 = arith.mulf %1058, %1057 : vector<4x32xf32>
    %1060 = arith.addf %1055, %1059 : vector<4x32xf32>
    %1061 = vector.extract_strided_slice %924 {offsets = [0, 27], sizes = [4, 1], strides = [1, 1]} : vector<4x32xf32> to vector<4x1xf32>
    %1062 = vector.extract_strided_slice %215 {offsets = [0, 1888], sizes = [4, 32], strides = [1, 1]} : vector<4x2048xf32> to vector<4x32xf32>
    %1063 = vector.broadcast %1061 : vector<4x1xf32> to vector<4x32xf32>
    %1064 = arith.mulf %1063, %1062 : vector<4x32xf32>
    %1065 = arith.addf %1060, %1064 : vector<4x32xf32>
    %1066 = vector.extract_strided_slice %924 {offsets = [0, 28], sizes = [4, 1], strides = [1, 1]} : vector<4x32xf32> to vector<4x1xf32>
    %1067 = vector.extract_strided_slice %215 {offsets = [0, 1920], sizes = [4, 32], strides = [1, 1]} : vector<4x2048xf32> to vector<4x32xf32>
    %1068 = vector.broadcast %1066 : vector<4x1xf32> to vector<4x32xf32>
    %1069 = arith.mulf %1068, %1067 : vector<4x32xf32>
    %1070 = arith.addf %1065, %1069 : vector<4x32xf32>
    %1071 = vector.extract_strided_slice %924 {offsets = [0, 29], sizes = [4, 1], strides = [1, 1]} : vector<4x32xf32> to vector<4x1xf32>
    %1072 = vector.extract_strided_slice %215 {offsets = [0, 1952], sizes = [4, 32], strides = [1, 1]} : vector<4x2048xf32> to vector<4x32xf32>
    %1073 = vector.broadcast %1071 : vector<4x1xf32> to vector<4x32xf32>
    %1074 = arith.mulf %1073, %1072 : vector<4x32xf32>
    %1075 = arith.addf %1070, %1074 : vector<4x32xf32>
    %1076 = vector.extract_strided_slice %924 {offsets = [0, 30], sizes = [4, 1], strides = [1, 1]} : vector<4x32xf32> to vector<4x1xf32>
    %1077 = vector.extract_strided_slice %215 {offsets = [0, 1984], sizes = [4, 32], strides = [1, 1]} : vector<4x2048xf32> to vector<4x32xf32>
    %1078 = vector.broadcast %1076 : vector<4x1xf32> to vector<4x32xf32>
    %1079 = arith.mulf %1078, %1077 : vector<4x32xf32>
    %1080 = arith.addf %1075, %1079 : vector<4x32xf32>
    %1081 = vector.extract_strided_slice %924 {offsets = [0, 31], sizes = [4, 1], strides = [1, 1]} : vector<4x32xf32> to vector<4x1xf32>
    %1082 = vector.extract_strided_slice %215 {offsets = [0, 2016], sizes = [4, 32], strides = [1, 1]} : vector<4x2048xf32> to vector<4x32xf32>
    %1083 = vector.broadcast %1081 : vector<4x1xf32> to vector<4x32xf32>
    %1084 = arith.mulf %1083, %1082 : vector<4x32xf32>
    %1085 = arith.addf %1080, %1084 : vector<4x32xf32>
    %1086 = arith.mulf %1085, %191 : vector<4x32xf32>
    %cst_166 = arith.constant dense<0.000000e+00> : vector<4xf32>
    %1087 = vector.multi_reduction <add>, %1086, %cst_166 [1] : vector<4x32xf32> to vector<4xf32>
    %1088 = vector.shape_cast %1087 : vector<4xf32> to vector<4x1xf32>
    %1089 = vector.shape_cast %1088 : vector<4x1xf32> to vector<4x1xf32>
    %1090 = vector.broadcast %1089 : vector<4x1xf32> to vector<4x128xf32>
    %c0_167 = arith.constant 0 : index
    %c0_168 = arith.constant 0 : index
    %1091 = vector.load %arg17[%c0_167, %c0_168] : memref<4x128xf32, #tpu.memory_space<vmem>>, vector<4x128xf32>
    tpu.vector_store %arg17[%c0_167, %c0_168], %1090 {strides = array<i32>} : memref<4x128xf32, #tpu.memory_space<vmem>>, vector<4x128xf32>,
    return
  }
  func.func @transform_0(%arg0: i32) -> (i32, i32) {
    %c0_i32 = arith.constant 0 : i32
    %c0_i32_0 = arith.constant 0 : i32
    %c0_i32_1 = arith.constant 0 : i32
    return %c0_i32, %c0_i32_0 : i32, i32
  }
  func.func @transform_1(%arg0: i32) -> (i32, i32) {
    %c0_i32 = arith.constant 0 : i32
    %c0_i32_0 = arith.constant 0 : i32
    %c0_i32_1 = arith.constant 0 : i32
    return %c0_i32, %c0_i32_0 : i32, i32
  }
  func.func @transform_2(%arg0: i32) -> (i32, i32) {
    %c0_i32 = arith.constant 0 : i32
    %c0_i32_0 = arith.constant 0 : i32
    %c0_i32_1 = arith.constant 0 : i32
    return %c0_i32, %c0_i32_0 : i32, i32
  }
  func.func @transform_3(%arg0: i32) -> (i32, i32) {
    %c0_i32 = arith.constant 0 : i32
    %c0_i32_0 = arith.constant 0 : i32
    %c0_i32_1 = arith.constant 0 : i32
    return %c0_i32, %c0_i32_0 : i32, i32
  }
  func.func @transform_4(%arg0: i32) -> (i32, i32) {
    %c0_i32 = arith.constant 0 : i32
    %c0_i32_0 = arith.constant 0 : i32
    %c0_i32_1 = arith.constant 0 : i32
    return %c0_i32, %c0_i32_0 : i32, i32
  }
  func.func @transform_5(%arg0: i32) -> (i32, i32) {
    %c0_i32 = arith.constant 0 : i32
    %c0_i32_0 = arith.constant 0 : i32
    %c0_i32_1 = arith.constant 0 : i32
    return %c0_i32, %c0_i32_0 : i32, i32
  }
  func.func @transform_6(%arg0: i32) -> (i32, i32) {
    %c0_i32 = arith.constant 0 : i32
    %c0_i32_0 = arith.constant 0 : i32
    %c0_i32_1 = arith.constant 0 : i32
    return %c0_i32, %c0_i32_0 : i32, i32
  }
  func.func @transform_7(%arg0: i32) -> (i32, i32) {
    %c0_i32 = arith.constant 0 : i32
    %c0_i32_0 = arith.constant 0 : i32
    %c0_i32_1 = arith.constant 0 : i32
    return %c0_i32, %c0_i32_0 : i32, i32
  }
  func.func @transform_8(%arg0: i32) -> (i32, i32) {
    %c0_i32 = arith.constant 0 : i32
    %c0_i32_0 = arith.constant 0 : i32
    %c0_i32_1 = arith.constant 0 : i32
    return %c0_i32, %c0_i32_0 : i32, i32
  }
  func.func @transform_9(%arg0: i32) -> (i32, i32) {
    %c0_i32 = arith.constant 0 : i32
    %c0_i32_0 = arith.constant 0 : i32
    %c0_i32_1 = arith.constant 0 : i32
    return %c0_i32, %c0_i32_0 : i32, i32
  }
  func.func @transform_10(%arg0: i32) -> (i32, i32) {
    %c0_i32 = arith.constant 0 : i32
    %c0_i32_0 = arith.constant 0 : i32
    %c0_i32_1 = arith.constant 0 : i32
    return %c0_i32, %c0_i32_0 : i32, i32
  }
  func.func @transform_11(%arg0: i32) -> (i32, i32) {
    %c0_i32 = arith.constant 0 : i32
    %c0_i32_0 = arith.constant 0 : i32
    %c0_i32_1 = arith.constant 0 : i32
    return %c0_i32, %c0_i32_0 : i32, i32
  }
  func.func @transform_12(%arg0: i32) -> (i32, i32) {
    %c0_i32 = arith.constant 0 : i32
    %c0_i32_0 = arith.constant 0 : i32
    %c0_i32_1 = arith.constant 0 : i32
    return %c0_i32, %c0_i32_0 : i32, i32
  }
  func.func @transform_13(%arg0: i32) -> (i32, i32) {
    %c0_i32 = arith.constant 0 : i32
    %c0_i32_0 = arith.constant 0 : i32
    %c0_i32_1 = arith.constant 0 : i32
    return %c0_i32, %c0_i32_0 : i32, i32
  }
  func.func @transform_14(%arg0: i32) -> (i32, i32) {
    %c0_i32 = arith.constant 0 : i32
    %c0_i32_0 = arith.constant 0 : i32
    %c0_i32_1 = arith.constant 0 : i32
    return %c0_i32, %c0_i32_0 : i32, i32
  }
  func.func @transform_15(%arg0: i32) -> (i32, i32) {
    %c0_i32 = arith.constant 0 : i32
    %c0_i32_0 = arith.constant 0 : i32
    %c0_i32_1 = arith.constant 0 : i32
    return %c0_i32, %c0_i32_0 : i32, i32
  }
  func.func @transform_16(%arg0: i32) -> (i32, i32) {
    %c0_i32 = arith.constant 0 : i32
    %c0_i32_0 = arith.constant 0 : i32
    %c0_i32_1 = arith.constant 0 : i32
    return %c0_i32, %c0_i32_0 : i32, i32
  }
}

</mosaic_0001>

<bundles_post_ra>
// kernel: gru4rec_forward.1
= control target key start
LH: loop header
LB: loop body
LE: loop exit
PB: predicated region body
PF: predicated region fallthrough
CT: control target
= control target key end

     0   :  { %v4625_v0 = vmov 0   ;;  %v4626_v2 = vmov 0.0   ;;  %vm4627_vm0 = vmmov 0   ;;  %v6059_v5 = vmov 2   ;;  %s4636_s30 = smov 127   ;;  %s4637_s17 = smov 64   ;;  %s6041_s0 = inlined_call_operand.vmem [shape: s32[4,8], index: 0, kind: input, shape index: {}]   ;;  %s6042_s2 = inlined_call_operand.vmem [shape: bf16[128,32], index: 2, kind: input, shape index: {}]   ;;  %s6043_s1 = inlined_call_operand.vmem [shape: s32[4,1], index: 1, kind: input, shape index: {}]   ;;  %s6044_s5 = inlined_call_operand.vmem [shape: bf16[32,96], index: 5, kind: input, shape index: {}]   ;;  %s6045_s4 = inlined_call_operand.vmem [shape: f32[1,2], index: 4, kind: input, shape index: {}]   ;;  %s6046_s3 = inlined_call_operand.vmem [shape: f32[8,32], index: 3, kind: input, shape index: {}]   ;;  %s6047_s12 = inlined_call_operand.vmem [shape: bf16[32,32], index: 12, kind: input, shape index: {}]   ;;  %s6048_s14 = inlined_call_operand.vmem [shape: bf16[32,32], index: 14, kind: input, shape index: {}]   ;;  %s6049_s8 = inlined_call_operand.vmem [shape: bf16[32,32], index: 8, kind: input, shape index: {}]   ;;  %s6050_s13 = inlined_call_operand.vmem [shape: f32[1,32], index: 13, kind: input, shape index: {}]   ;;  %s6051_s10 = inlined_call_operand.vmem [shape: bf16[32,2048], index: 10, kind: input, shape index: {}]   ;;  %s6052_s6 = inlined_call_operand.vmem [shape: bf16[32,192], index: 6, kind: input, shape index: {}]   ;;  %s6053_s9 = inlined_call_operand.vmem [shape: f32[1,32], index: 9, kind: input, shape index: {}]   ;;  %s6054_s11 = inlined_call_operand.vmem [shape: f32[1,2048], index: 11, kind: input, shape index: {}]   ;;  %s6055_s7 = inlined_call_operand.vmem [shape: bf16[32,96], index: 7, kind: input, shape index: {}]   ;;  %s6056_s15 = inlined_call_operand.vmem [shape: f32[1,32], index: 15, kind: input, shape index: {}]   ;;  %s6057_s16 = inlined_call_operand.vmem [shape: f32[4,128], index: 16, kind: output, shape index: {}]  }
   0x1   :  { %6069 = sst [smem:[#allocation2_spill]] %s6041_s0  ;;  %4385 = vset.pattern.permute.xlu0 %v4625_v0  ;;  %4022 = vmatprep.subr.bf16.mxu0 %v4626_v2  ;;  %v4757_v3 = vld [vmem:[%s6042_s2] sm:$0xff]   ;;  %v4764_v4 = vld [vmem:[%s6042_s2 + $0x8] sm:$0xff]   ;;  %v4776_v6 = vld [vmem:[%s6042_s2 + $0x10] sm:$0xff]   ;;  %v4629_v7 = vmov 1   ;;  %v4630_v8 = vmov 3   ;;  %v88_v27 = vlaneseq }
   0x2   :  { %s6070_s23 = sld [smem:[#allocation2_spill]]  ;;  %4042 = vmatprep.subr.bf16.mxu1 %v4626_v2  ;;  %4023 = vmatpush3.bf16.msra.mxu0 %v4757_v3  ;;  %v4785_v9 = vld [vmem:[%s6042_s2 + $0x18] sm:$0xff]   ;;  %v4631_v10 = vmov 5   ;;  %v6068_v11 = vmov 4   ;;  %v4794_v12 = vld [vmem:[%s6042_s2 + $0x20] sm:$0xff]   ;;  %v4805_v14 = vld [vmem:[%s6042_s2 + $0x28] sm:$0xff]  }
   0x3   :  { %4038 = vmatprep.mubr.msk.bf16.mxu0 %vm4627_vm0, %v4626_v2  ;;  %4024 = vmatprep.subr.bf16.mxu0 %v4626_v2  ;;  %v963_v13 = vld [vmem:[%s6043_s1] sm:$0xf]  ;;  %v4633_v15 = vmov 6   ;;  %v4813_v16 = vld [vmem:[%s6042_s2 + $0x30] sm:$0xff]   ;;  %v4634_v17 = vmov 7   ;;  %v4821_v18 = vld [vmem:[%s6042_s2 + $0x38] sm:$0xff]  }
   0x4   :  { %4387 = vset.pattern.permute.xlu1 %v6059_v5  ;;  %4046 = vmatprep.mubr.msk.bf16.mxu1 %vm4627_vm0, %v4626_v2  ;;  %vm57_vm2 = vcmask 60416   ;;  %v4831_v25 = vld [vmem:[%s6044_s5] sm:$0xff]   ;;  %v4837_v26 = vld [vmem:[%s6044_s5 + $0x8] sm:$0xff]   ;;  %v4843_v28 = vand.u32 127, %v88_v27  ;;  %v4635_v30 = vmov 1.0|1.0  }
   0x5   :  { %4043 = vmatpush3.bf16.msra.mxu1 %v4831_v25  ;;  %vm201_vm5 = vcmask 261120   ;;  %v3789_v47 = vld [vmem:[%s6045_s4] ss:$0 sm:$0xff]  ;;  %s4638_s20 = smov 96  }
   0x6   :  { %4025 = vmatpush3.bf16.msra.mxu0 %v4764_v4  ;;  %4044 = vmatprep.subr.bf16.mxu1 %v4626_v2  ;;  %4483 = vrcp.f32 %v3789_v47 }
   0x7   :  { %4026 = vmatprep.subr.bf16.mxu0 %v4626_v2 }
   0x8   :  { %v54_v1 = vld [vmem:[%s6070_s23] sm:$0xf] }
   0x9   :  { %95 = vperm.xlu0 %4385, %v54_v1   ;;  %358 = vperm.xlu1 %4387, %v54_v1   ;;  %vm55_vm1 = vcmp.ne.s32.totalorder %v54_v1, 0 }
   0xa   :  { %4027 = vmatpush3.bf16.msra.mxu0 %v4776_v6  ;;  %v56_v19 = vsel %vm55_vm1, 1, %v4625_v0  ;;  %4045 = vmatpush3.bf16.msra.mxu1 %v4837_v26 }
   0xb   :  { %4028 = vmatprep.subr.bf16.mxu0 %v4626_v2  ;;  %v58_v20 = vsel %vm57_vm2, %v56_v19, 0  ;;  %4050 = vmatprep.subr.bf16.mxu1 %v4626_v2 }
   0xc   :  { %v59_v21 = vand.u32 65535, %v58_v20  ;;  %v60_v23 = vshrl.u32 %v58_v20, 16 }
   0xd   :  { %4386 = vset.pattern.permute.xlu0 %v4629_v7  ;;  %4388 = vset.pattern.permute.xlu1 %v4630_v8 }
   0xe   :  { %257 = vperm.xlu0 %4386, %v54_v1   ;;  %459 = vperm.xlu1 %4388, %v54_v1   ;;  %v61_v22 = vcvt.s32.f32 %v59_v21  ;;  %v62_v24 = vcvt.s32.f32 %v60_v23  ;;  %v3742_v21 = vld [vmem:[%s6046_s3] ss:$0 sm:$0xff] }
   0xf   :  { %4029 = vmatpush3.bf16.msra.mxu0 %v4785_v9 }
  0x10   :  { %4030 = vmatprep.subr.bf16.mxu0 %v4626_v2  ;;  %v4484_v53 = vpop.eup %4483 }
  0x12   :  { %4390 = vset.pattern.permute.xlu0 %v4631_v10  ;;  %4389 = vset.pattern.permute.xlu1 %v6068_v11 }
  0x13   :  { %661 = vperm.xlu0 %4390, %v54_v1   ;;  %560 = vperm.xlu1 %4389, %v54_v1  }
  0x14   :  { %4031 = vmatpush3.bf16.msra.mxu0 %v4794_v12 }
  0x15   :  { %4032 = vmatprep.subr.bf16.mxu0 %v4626_v2 }
  0x17   :  { %4393 = vset.pattern.permute.xlu0 %v4625_v0  ;;  %4391 = vset.pattern.permute.xlu1 %v4633_v15 }
  0x18   :  { %762 = vperm.xlu1 %4391, %v54_v1   ;;  %965 = vperm.xlu0 %4393, %v963_v13  }
  0x19   :  { %4033 = vmatpush3.bf16.msra.mxu0 %v4805_v14 }
  0x1a   :  { %4034 = vmatprep.subr.bf16.mxu0 %v4626_v2 }
  0x1c   :  { %4392 = vset.pattern.permute.xlu1 %v4634_v17 }
  0x1d   :  { %863 = vperm.xlu1 %4392, %v54_v1   ;;  %4035 = vmatpush3.bf16.msra.mxu0 %v4813_v16 }
  0x1e   :  { %4036 = vmatprep.subr.bf16.mxu0 %v4626_v2 }
  0x21   :  { %4394 = vset.pattern.permute.xlu1 %v4629_v7  ;;  %4037 = vmatpush3.bf16.msra.mxu0 %v4821_v18 }
  0x22   :  { %4070 = vmatprep.subr.bf16.mxu0 %v4626_v2 }
  0x37   :  { %63 = vadd.xlane.f32.xlu0 %v61_v22  ;;  %v3747_v22 = vld [vmem:[%s6046_s3 + $0x1] ss:$0 sm:$0xff] }
  0x41   :  { %65 = vadd.xlane.f32.xlu1 %v62_v24 }
  0x88   :  { %v96_v29 = vpop.permute.xlu0 %95  ;;  %v4884_v37 = vpop.permute.xlu1 %358 }
  0x89   :  { %vm97_vm3 = vcmp.eq.s32.totalorder %v4843_v28, %v96_v29  ;;  %vm360_vm10 = vcmp.eq.s32.totalorder %v4843_v28, %v4884_v37 }
  0x8a   :  { %vm3736_vm4 = vmpackc.low %vm97_vm3, %vm97_vm3 }
  0x8b   :  { %4039 = vmatmul.mubr.msk.bf16.vlgmr.msra.gmra.mrb[0].mxu0 %vm3736_vm4, %v4635_v30  ;;  %vm3748_vm11 = vmpackc.low %vm360_vm10, %vm360_vm10 }
  0x8c   :  { %4071 = vmatpush3.bf16.msra.mxu0 %v4831_v25  ;;  %4074 = vmatprep.mubr.msk.bf16.mxu0 %vm4627_vm0, %v4626_v2 }
  0x8d   :  { %4072 = vmatprep.subr.bf16.mxu0 %v4626_v2  ;;  %v258_v36 = vpop.permute.xlu0 %257  ;;  %v4886_v38 = vpop.permute.xlu1 %459 }
  0x8e   :  { %vm259_vm6 = vcmp.eq.s32.totalorder %v4843_v28, %v258_v36  ;;  %vm461_vm14 = vcmp.eq.s32.totalorder %v4843_v28, %v4886_v38 }
  0x8f   :  { %vm3743_vm7 = vmpackc.low %vm259_vm6, %vm259_vm6 }
  0x90   :  { %4073 = vmatpush3.bf16.msra.mxu0 %v4837_v26  ;;  %vm3753_vm15 = vmpackc.low %vm461_vm14, %vm461_vm14 }
  0x91   :  { %4078 = vmatprep.subr.bf16.mxu0 %v4626_v2 }
  0x92   :  { %v4888_v39 = vpop.permute.xlu1 %560  ;;  %v4892_v41 = vpop.permute.xlu0 %661 }
  0x93   :  { %vm562_vm2 = vcmp.eq.s32.totalorder %v4843_v28, %v4888_v39  ;;  %vm663_vm6 = vcmp.eq.s32.totalorder %v4843_v28, %v4892_v41 }
  0x94   :  { %vm3758_vm3 = vmpackc.low %vm562_vm2, %vm562_vm2 }
  0x97   :  { %v4890_v40 = vpop.permute.xlu1 %762  ;;  %v4896_v43 = vpop.permute.xlu0 %965 }
  0x9c   :  { %v4894_v42 = vpop.permute.xlu1 %863 }
  0xc4   :  { %v64_v46 = vpop.xlane.xlu0 %63 }
  0xc5   :  { %v67_v49 = vcvt.f32.s32 %v64_v46 }
  0xce   :  { %v66_v44 = vpop.xlane.xlu1 %65 }
  0xcf   :  { %v68_v45 = vcvt.f32.s32 %v66_v44 }
  0xd1   :  { %v69_v48 = vshll.u32 %v68_v45, 16 }
  0xd3   :  { %v4901_v50 = vadd.s32 %v69_v48, %v67_v49 }
  0xd5   :  { %v71_v51 = vcvt.s32.f32 %v4901_v50  ;;  %vm245_vm8 = vcmp.eq.s32.totalorder %v4901_v50, 1  ;;  %vm346_vm9 = vcmp.eq.s32.totalorder %v4901_v50, 2  ;;  %vm1852_vm12 = vcmp.gt.s32.totalorder %v4901_v50, 0 }
  0xd6   :  { %v3741_v24 = vsel %vm245_vm8, 1.0, %v4626_v2  ;;  %vm447_vm13 = vcmp.eq.s32.totalorder %v4901_v50, 3  ;;  %vm548_vm1 = vcmp.eq.s32.totalorder %v4901_v50, 4  ;;  %vm649_vm4 = vcmp.eq.s32.totalorder %v4901_v50, 5 }
  0xd7   :  { %v3788_v52 = vadd.f32 -8.0, %v71_v51  ;;  %vm750_vm8 = vcmp.eq.s32.totalorder %v4901_v50, 6  ;;  %vm952_vm14 = vcmp.eq.s32.totalorder %v4901_v50, 8  ;;  %vm1948_vm2 = vcmp.gt.s32.totalorder %v4901_v50, 1 }
  0xd9   :  { %v1154_v54 = vmul.f32 %v4484_v53, %v3788_v52 }
  0xdb   :  { %v1155_v55 = vmul.f32 1.442695, %v1154_v54  ;;  %v4950_v54 = vsel %vm1852_vm12, 1.0, %v4626_v2  ;;  %vm865_vm12 = vcmp.eq.s32.totalorder %v4843_v28, %v4894_v42  ;;  %v3777_v42 = vld [vmem:[%s6046_s3 + $0x7] ss:$0 sm:$0xff] }
  0xdd   :  { %4485 = vpow2.f32 %v1155_v55 }
  0xe7   :  { %v4486_v56 = vpop.eup %4485 }
  0xe8   :  { %1158 = vrot.lane.b32.xlu1 %v4486_v56, %s4636_s30  ;;  %v1877_v56 = vsub.f32 1.0, %v4950_v54 }
 0x15a   :  { %v1159_v62 = vpop.permute.xlu1 %1158 }
 0x15b   :  { %v1161_v1 = vmul.f32 %v3789_v47, %v1159_v62  ;;  %v3752_v62 = vld [vmem:[%s6046_s3 + $0x2] ss:$0 sm:$0xff] }
 0x15d   :  { %1164 = vperm.xlu0 %4393, %v1161_v1  }
 0x15e   :  { %v4853_v31 = vpop.f32.mrb[0].mxu0 }
 0x15f   :  { %v188_v32 = vpack.c.bf16 %v4853_v31, %v4853_v31  ;;  %v4040_v33 = vpop.f32.mrb[1].mxu0  ;;  %v253_v23 = vadd.f32 %v3742_v21, %v4853_v31 }
 0x160   :  { %v185_v34 = vpop.f32.mrb[2].mxu0 }
 0x161   :  { %v4041_v35 = vpop.f32.mrb[3].mxu0  ;;  %4047 = vmatmul.mubr.msk.bf16.vlgmr.msra.gmra.mrb[0].mxu1 %vm201_vm5, %v188_v32  ;;  %4395 = vset.pattern.permute.xlu0 %v6059_v5  ;;  %v3746_v32 = vsel %vm346_vm9, 1.0, %v4626_v2  ;;  %v254_v44 = vmul.f32 %v3741_v24, %v253_v23  ;;  %vm764_vm9 = vcmp.eq.s32.totalorder %v4843_v28, %v4890_v40 }
 0x162   :  { %4051 = vmatpush3.bf16.msra.mxu1 %v4757_v3  ;;  %4066 = vmatprep.mubr.msk.bf16.mxu1 %vm4627_vm0, %v4626_v2  ;;  %vm3768_vm10 = vmpackc.low %vm764_vm9, %vm764_vm9 }
 0x163   :  { %4052 = vmatprep.subr.bf16.mxu1 %v4626_v2 }
 0x166   :  { %4053 = vmatpush3.bf16.msra.mxu1 %v4764_v4 }
 0x167   :  { %4054 = vmatprep.subr.bf16.mxu1 %v4626_v2 }
 0x16a   :  { %4055 = vmatpush3.bf16.msra.mxu1 %v4776_v6 }
 0x16b   :  { %4056 = vmatprep.subr.bf16.mxu1 %v4626_v2 }
 0x16e   :  { %4057 = vmatpush3.bf16.msra.mxu1 %v4785_v9 }
 0x16f   :  { %4058 = vmatprep.subr.bf16.mxu1 %v4626_v2 }
 0x172   :  { %4059 = vmatpush3.bf16.msra.mxu1 %v4794_v12 }
 0x173   :  { %4060 = vmatprep.subr.bf16.mxu1 %v4626_v2 }
 0x176   :  { %4061 = vmatpush3.bf16.msra.mxu1 %v4805_v14 }
 0x177   :  { %4062 = vmatprep.subr.bf16.mxu1 %v4626_v2 }
 0x17a   :  { %4063 = vmatpush3.bf16.msra.mxu1 %v4813_v16 }
 0x17b   :  { %4064 = vmatprep.subr.bf16.mxu1 %v4626_v2 }
 0x17e   :  { %4065 = vmatpush3.bf16.msra.mxu1 %v4821_v18 }
 0x17f   :  { %4098 = vmatprep.subr.bf16.mxu1 %v4626_v2 }
 0x181   :  { %4067 = vmatmul.mubr.msk.bf16.vlgmr.msra.gmra.mrb[4].mxu1 %vm3743_vm7, %v4635_v30  ;;  %vm3763_vm7 = vmpackc.low %vm663_vm6, %vm663_vm6  ;;  %vm2444_vm6 = vcmp.gt.s32.totalorder %v4901_v50, 4 }
 0x182   :  { %4099 = vmatpush3.bf16.msra.mxu1 %v4831_v25  ;;  %4102 = vmatprep.mubr.msk.bf16.mxu1 %vm4627_vm0, %v4626_v2 }
 0x183   :  { %4100 = vmatprep.subr.bf16.mxu1 %v4626_v2 }
 0x186   :  { %4101 = vmatpush3.bf16.msra.mxu1 %v4837_v26 }
 0x187   :  { %4106 = vmatprep.subr.bf16.mxu1 %v4626_v2 }
 0x234   :  { %v239_v57 = vpop.f32.mrb[0].mxu1 }
 0x235   :  { %v3835_v58 = vmul.f32 -1.442695, %v239_v57  ;;  %v4048_v59 = vpop.f32.mrb[1].mxu1 }
 0x236   :  { %v242_v60 = vpop.f32.mrb[2].mxu1  ;;  %v4953_v59 = vmul.f32 0.0, %v1877_v56 }
 0x237   :  { %4487 = vpow2.f32 %v3835_v58  ;;  %v4049_v61 = vpop.f32.mrb[3].mxu1 }
 0x241   :  { %v4488_v63 = vpop.eup %4487 }
 0x242   :  { %v1859_v13 = vadd.f32 1.0, %v4488_v63 }
 0x244   :  { %4489 = vrcp.f32 %v1859_v13  ;;  %v3751_v13 = vsel %vm447_vm13, 1.0, %v4626_v2  ;;  %vm3773_vm13 = vmpackc.low %vm865_vm12, %vm865_vm12 }
 0x24e   :  { %v4490_v19 = vpop.eup %4489 }
 0x24f   :  { %v1862_v20 = vmul.f32 0.0, %v4490_v19  ;;  %v1869_v55 = vsub.f32 1.0, %v4490_v19 }
 0x251   :  { %1864 = vrot.lane.b32.xlu1 %v1862_v20, %s4637_s17 }
 0x254   :  { %v296_v29 = vpop.f32.mrb[4].mxu1 }
 0x255   :  { %v302_v33 = vpack.c.bf16 %v296_v29, %v296_v29  ;;  %v354_v34 = vadd.f32 %v3747_v22, %v296_v29  ;;  %v4068_v35 = vpop.f32.mrb[5].mxu1 }
 0x256   :  { %v299_v36 = vpop.f32.mrb[6].mxu1 }
 0x257   :  { %v355_v45 = vmul.f32 %v3746_v32, %v354_v34  ;;  %v4069_v46 = vpop.f32.mrb[7].mxu1  ;;  %4075 = vmatmul.mubr.msk.bf16.vlgmr.msra.gmra.mrb[4].mxu0 %vm201_vm5, %v302_v33  ;;  %v3757_v36 = vld [vmem:[%s6046_s3 + $0x3] ss:$0 sm:$0xff] }
 0x258   :  { %4079 = vmatpush3.bf16.msra.mxu0 %v4757_v3  ;;  %4094 = vmatprep.mubr.msk.bf16.mxu0 %vm4627_vm0, %v4626_v2 }
 0x259   :  { %v356_v31 = vadd.f32 %v355_v45, %v254_v44  ;;  %4080 = vmatprep.subr.bf16.mxu0 %v4626_v2  ;;  %v3756_v45 = vsel %vm548_vm1, 1.0, %v4626_v2 }
 0x25c   :  { %4081 = vmatpush3.bf16.msra.mxu0 %v4764_v4 }
 0x25d   :  { %4082 = vmatprep.subr.bf16.mxu0 %v4626_v2 }
 0x260   :  { %4083 = vmatpush3.bf16.msra.mxu0 %v4776_v6 }
 0x261   :  { %4084 = vmatprep.subr.bf16.mxu0 %v4626_v2 }
 0x264   :  { %4085 = vmatpush3.bf16.msra.mxu0 %v4785_v9 }
 0x265   :  { %4086 = vmatprep.subr.bf16.mxu0 %v4626_v2 }
 0x268   :  { %4087 = vmatpush3.bf16.msra.mxu0 %v4794_v12 }
 0x269   :  { %4088 = vmatprep.subr.bf16.mxu0 %v4626_v2 }
 0x26c   :  { %4089 = vmatpush3.bf16.msra.mxu0 %v4805_v14 }
 0x26d   :  { %4090 = vmatprep.subr.bf16.mxu0 %v4626_v2 }
 0x270   :  { %4091 = vmatpush3.bf16.msra.mxu0 %v4813_v16 }
 0x271   :  { %4092 = vmatprep.subr.bf16.mxu0 %v4626_v2 }
 0x274   :  { %4093 = vmatpush3.bf16.msra.mxu0 %v4821_v18 }
 0x275   :  { %4126 = vmatprep.subr.bf16.mxu0 %v4626_v2 }
 0x277   :  { %4095 = vmatmul.mubr.msk.bf16.vlgmr.msra.gmra.mrb[8].mxu0 %vm3748_vm11, %v4635_v30  ;;  %vm851_vm11 = vcmp.eq.s32.totalorder %v4901_v50, 7 }
 0x278   :  { %4127 = vmatpush3.bf16.msra.mxu0 %v4831_v25  ;;  %4130 = vmatprep.mubr.msk.bf16.mxu0 %vm4627_vm0, %v4626_v2 }
 0x279   :  { %4128 = vmatprep.subr.bf16.mxu0 %v4626_v2 }
 0x27c   :  { %4129 = vmatpush3.bf16.msra.mxu0 %v4837_v26 }
 0x27d   :  { %4134 = vmatprep.subr.bf16.mxu0 %v4626_v2 }
 0x2c3   :  { %v1865_v37 = vpop.permute.xlu1 %1864 }
 0x2c4   :  { %v1867_v47 = vadd.f32 %v1865_v37, %v239_v57 }
 0x2c6   :  { %4491 = vtanh.f32 %v1867_v47 }
 0x2d0   :  { %v4492_v48 = vpop.eup %4491 }
 0x2d1   :  { %1871 = vrot.lane.b32.xlu1 %v4492_v48, %s4638_s20 }
 0x32a   :  { %v4946_v49 = vpop.f32.mrb[4].mxu0 }
 0x32b   :  { %v4076_v51 = vpop.f32.mrb[5].mxu0 }
 0x32c   :  { %v343_v52 = vpop.f32.mrb[6].mxu0 }
 0x32d   :  { %v4077_v53 = vpop.f32.mrb[7].mxu0 }
 0x343   :  { %v1872_v58 = vpop.permute.xlu1 %1871 }
 0x344   :  { %v1874_v57 = vmul.f32 %v1872_v58, %v1869_v55  ;;  %v3762_v58 = vld [vmem:[%s6046_s3 + $0x4] ss:$0 sm:$0xff] }
 0x346   :  { %v1875_v60 = vadd.f32 %v1874_v57, %v1862_v20 }
 0x348   :  { %v1876_v61 = vmul.f32 %v4950_v54, %v1875_v60  ;;  %v3761_v60 = vsel %vm649_vm4, 1.0, %v4626_v2  ;;  %vm2280_vm4 = vcmp.gt.s32.totalorder %v4901_v50, 3 }
 0x34a   :  { %v4961_v63 = vadd.f32 %v4953_v59, %v1876_v61  ;;  %v397_v1 = vpop.f32.mrb[8].mxu0 }
 0x34b   :  { %v403_v19 = vpack.c.bf16 %v397_v1, %v397_v1  ;;  %v455_v21 = vadd.f32 %v3752_v62, %v397_v1  ;;  %v4096_v22 = vpop.f32.mrb[9].mxu0 }
 0x34c   :  { %v400_v23 = vpop.f32.mrb[10].mxu0  ;;  %v1880_v20 = vpack.c.bf16 %v4961_v63, %v4961_v63 }
 0x34d   :  { %v456_v24 = vmul.f32 %v3751_v13, %v455_v21  ;;  %v4097_v29 = vpop.f32.mrb[11].mxu0  ;;  %4103 = vmatmul.mubr.msk.bf16.vlgmr.msra.gmra.mrb[8].mxu1 %vm201_vm5, %v403_v19 }
 0x34e   :  { %4107 = vmatpush3.bf16.msra.mxu1 %v4757_v3  ;;  %1882 = vrot.lane.b32.xlu0 %v1880_v20, %s4638_s20  ;;  %v3767_v29 = vld [vmem:[%s6046_s3 + $0x5] ss:$0 sm:$0xff] }
 0x34f   :  { %v457_v32 = vadd.f32 %v456_v24, %v356_v31  ;;  %4108 = vmatprep.subr.bf16.mxu1 %v4626_v2  ;;  %4122 = vmatprep.mubr.msk.bf16.mxu1 %vm4627_vm0, %v4626_v2 }
 0x352   :  { %4109 = vmatpush3.bf16.msra.mxu1 %v4764_v4 }
 0x353   :  { %4110 = vmatprep.subr.bf16.mxu1 %v4626_v2 }
 0x356   :  { %4111 = vmatpush3.bf16.msra.mxu1 %v4776_v6 }
 0x357   :  { %4112 = vmatprep.subr.bf16.mxu1 %v4626_v2 }
 0x35a   :  { %4113 = vmatpush3.bf16.msra.mxu1 %v4785_v9 }
 0x35b   :  { %4114 = vmatprep.subr.bf16.mxu1 %v4626_v2 }
 0x35e   :  { %4115 = vmatpush3.bf16.msra.mxu1 %v4794_v12 }
 0x35f   :  { %4116 = vmatprep.subr.bf16.mxu1 %v4626_v2 }
 0x362   :  { %4117 = vmatpush3.bf16.msra.mxu1 %v4805_v14 }
 0x363   :  { %4118 = vmatprep.subr.bf16.mxu1 %v4626_v2 }
 0x366   :  { %4119 = vmatpush3.bf16.msra.mxu1 %v4813_v16 }
 0x367   :  { %4120 = vmatprep.subr.bf16.mxu1 %v4626_v2 }
 0x36a   :  { %4121 = vmatpush3.bf16.msra.mxu1 %v4821_v18 }
 0x36b   :  { %4154 = vmatprep.subr.bf16.mxu1 %v4626_v2 }
 0x36d   :  { %4123 = vmatmul.mubr.msk.bf16.vlgmr.msra.gmra.mrb[12].mxu1 %vm3753_vm15, %v4635_v30  ;;  %vm967_vm15 = vcmp.eq.s32.totalorder %v4843_v28, %v4896_v43 }
 0x36e   :  { %4155 = vmatpush3.bf16.msra.mxu1 %v4831_v25  ;;  %4158 = vmatprep.mubr.msk.bf16.mxu1 %vm4627_vm0, %v4626_v2  ;;  %vm3778_vm1 = vmpackc.low %vm967_vm15, %vm967_vm15 }
 0x36f   :  { %4156 = vmatprep.subr.bf16.mxu1 %v4626_v2 }
 0x372   :  { %4157 = vmatpush3.bf16.msra.mxu1 %v4837_v26 }
 0x373   :  { %4162 = vmatprep.subr.bf16.mxu1 %v4626_v2 }
 0x420   :  { %v4995_v38 = vpop.f32.mrb[8].mxu1 }
 0x421   :  { %v4104_v33 = vpop.f32.mrb[9].mxu1 }
 0x422   :  { %v444_v34 = vpop.f32.mrb[10].mxu1  ;;  %v3766_v33 = vsel %vm750_vm8, 1.0, %v4626_v2  ;;  %vm2772_vm8 = vcmp.gt.s32.totalorder %v4901_v50, 6 }
 0x423   :  { %v4105_v35 = vpop.f32.mrb[11].mxu1 }
 0x440   :  { %v498_v44 = vpop.f32.mrb[12].mxu1 }
 0x441   :  { %v504_v46 = vpack.c.bf16 %v498_v44, %v498_v44  ;;  %v556_v31 = vadd.f32 %v3757_v36, %v498_v44  ;;  %v4124_v37 = vpop.f32.mrb[13].mxu1 }
 0x442   :  { %v501_v47 = vpop.f32.mrb[14].mxu1 }
 0x443   :  { %v557_v48 = vmul.f32 %v3756_v45, %v556_v31  ;;  %v4125_v51 = vpop.f32.mrb[15].mxu1  ;;  %4131 = vmatmul.mubr.msk.bf16.vlgmr.msra.gmra.mrb[12].mxu0 %vm201_vm5, %v504_v46 }
 0x444   :  { %4135 = vmatpush3.bf16.msra.mxu0 %v4757_v3  ;;  %4150 = vmatprep.mubr.msk.bf16.mxu0 %vm4627_vm0, %v4626_v2 }
 0x445   :  { %v558_v52 = vadd.f32 %v557_v48, %v457_v32  ;;  %4136 = vmatprep.subr.bf16.mxu0 %v4626_v2 }
 0x448   :  { %4137 = vmatpush3.bf16.msra.mxu0 %v4764_v4 }
 0x449   :  { %4138 = vmatprep.subr.bf16.mxu0 %v4626_v2 }
 0x44c   :  { %4139 = vmatpush3.bf16.msra.mxu0 %v4776_v6 }
 0x44d   :  { %4140 = vmatprep.subr.bf16.mxu0 %v4626_v2 }
 0x450   :  { %4141 = vmatpush3.bf16.msra.mxu0 %v4785_v9 }
 0x451   :  { %4142 = vmatprep.subr.bf16.mxu0 %v4626_v2 }
 0x454   :  { %4143 = vmatpush3.bf16.msra.mxu0 %v4794_v12 }
 0x455   :  { %4144 = vmatprep.subr.bf16.mxu0 %v4626_v2 }
 0x458   :  { %4145 = vmatpush3.bf16.msra.mxu0 %v4805_v14 }
 0x459   :  { %4146 = vmatprep.subr.bf16.mxu0 %v4626_v2 }
 0x45c   :  { %4147 = vmatpush3.bf16.msra.mxu0 %v4813_v16 }
 0x45d   :  { %4148 = vmatprep.subr.bf16.mxu0 %v4626_v2 }
 0x460   :  { %4149 = vmatpush3.bf16.msra.mxu0 %v4821_v18 }
 0x461   :  { %4182 = vmatprep.subr.bf16.mxu0 %v4626_v2 }
 0x463   :  { %4151 = vmatmul.mubr.msk.bf16.vlgmr.msra.gmra.mrb[16].mxu0 %vm3758_vm3, %v4635_v30  ;;  %vm2116_vm3 = vcmp.gt.s32.totalorder %v4901_v50, 2 }
 0x464   :  { %4183 = vmatpush3.bf16.msra.mxu0 %v4831_v25  ;;  %4186 = vmatprep.mubr.msk.bf16.mxu0 %vm4627_vm0, %v4626_v2 }
 0x465   :  { %4184 = vmatprep.subr.bf16.mxu0 %v4626_v2 }
 0x468   :  { %4185 = vmatpush3.bf16.msra.mxu0 %v4837_v26 }
 0x469   :  { %4190 = vmatprep.subr.bf16.mxu0 %v4626_v2 }
 0x516   :  { %v5030_v39 = vpop.f32.mrb[12].mxu0 }
 0x517   :  { %v4132_v53 = vpop.f32.mrb[13].mxu0 }
 0x518   :  { %v545_v55 = vpop.f32.mrb[14].mxu0 }
 0x519   :  { %v4133_v56 = vpop.f32.mrb[15].mxu0 }
 0x536   :  { %v599_v57 = vpop.f32.mrb[16].mxu0 }
 0x537   :  { %v605_v61 = vpack.c.bf16 %v599_v57, %v599_v57  ;;  %v657_v62 = vadd.f32 %v3762_v58, %v599_v57  ;;  %v4152_v1 = vpop.f32.mrb[17].mxu0 }
 0x538   :  { %v602_v13 = vpop.f32.mrb[18].mxu0 }
 0x539   :  { %v658_v19 = vmul.f32 %v3761_v60, %v657_v62  ;;  %v4153_v21 = vpop.f32.mrb[19].mxu0  ;;  %4159 = vmatmul.mubr.msk.bf16.vlgmr.msra.gmra.mrb[16].mxu1 %vm201_vm5, %v605_v61 }
 0x53a   :  { %4163 = vmatpush3.bf16.msra.mxu1 %v4757_v3  ;;  %4178 = vmatprep.mubr.msk.bf16.mxu1 %vm4627_vm0, %v4626_v2  ;;  %v3776_v21 = vsel %vm952_vm14, 1.0, %v4626_v2 }
 0x53b   :  { %v659_v22 = vadd.f32 %v658_v19, %v558_v52  ;;  %4164 = vmatprep.subr.bf16.mxu1 %v4626_v2  ;;  %v3771_v52 = vsel %vm851_vm11, 1.0, %v4626_v2 }
 0x53e   :  { %4165 = vmatpush3.bf16.msra.mxu1 %v4764_v4 }
 0x53f   :  { %4166 = vmatprep.subr.bf16.mxu1 %v4626_v2 }
 0x542   :  { %4167 = vmatpush3.bf16.msra.mxu1 %v4776_v6 }
 0x543   :  { %4168 = vmatprep.subr.bf16.mxu1 %v4626_v2 }
 0x546   :  { %4169 = vmatpush3.bf16.msra.mxu1 %v4785_v9 }
 0x547   :  { %4170 = vmatprep.subr.bf16.mxu1 %v4626_v2 }
 0x54a   :  { %4171 = vmatpush3.bf16.msra.mxu1 %v4794_v12 }
 0x54b   :  { %4172 = vmatprep.subr.bf16.mxu1 %v4626_v2 }
 0x54e   :  { %4173 = vmatpush3.bf16.msra.mxu1 %v4805_v14 }
 0x54f   :  { %4174 = vmatprep.subr.bf16.mxu1 %v4626_v2 }
 0x552   :  { %4175 = vmatpush3.bf16.msra.mxu1 %v4813_v16 }
 0x553   :  { %4176 = vmatprep.subr.bf16.mxu1 %v4626_v2 }
 0x556   :  { %4177 = vmatpush3.bf16.msra.mxu1 %v4821_v18 }
 0x557   :  { %4210 = vmatprep.subr.bf16.mxu1 %v4626_v2 }
 0x559   :  { %4179 = vmatmul.mubr.msk.bf16.vlgmr.msra.gmra.mrb[20].mxu1 %vm3763_vm7, %v4635_v30  ;;  %vm2608_vm7 = vcmp.gt.s32.totalorder %v4901_v50, 5 }
 0x55a   :  { %4211 = vmatpush3.bf16.msra.mxu1 %v4831_v25  ;;  %4214 = vmatprep.mubr.msk.bf16.mxu1 %vm4627_vm0, %v4626_v2 }
 0x55b   :  { %4212 = vmatprep.subr.bf16.mxu1 %v4626_v2 }
 0x55e   :  { %4213 = vmatpush3.bf16.msra.mxu1 %v4837_v26 }
 0x55f   :  { %4218 = vmatprep.subr.bf16.mxu1 %v4626_v2 }
 0x60c   :  { %v5065_v41 = vpop.f32.mrb[16].mxu1 }
 0x60d   :  { %v4160_v23 = vpop.f32.mrb[17].mxu1 }
 0x60e   :  { %v646_v20 = vpop.f32.mrb[18].mxu1 }
 0x60f   :  { %v4161_v24 = vpop.f32.mrb[19].mxu1 }
 0x62c   :  { %v700_v32 = vpop.f32.mrb[20].mxu1 }
 0x62d   :  { %v706_v34 = vpack.c.bf16 %v700_v32, %v700_v32  ;;  %v758_v35 = vadd.f32 %v3767_v29, %v700_v32  ;;  %v4180_v36 = vpop.f32.mrb[21].mxu1 }
 0x62e   :  { %v703_v44 = vpop.f32.mrb[22].mxu1  ;;  %v3780_v36 = vld [vmem:[%s6050_s13] ss:$0 sm:$0xff] }
 0x62f   :  { %v759_v45 = vmul.f32 %v3766_v33, %v758_v35  ;;  %v4181_v46 = vpop.f32.mrb[23].mxu1  ;;  %4187 = vmatmul.mubr.msk.bf16.vlgmr.msra.gmra.mrb[20].mxu0 %vm201_vm5, %v706_v34  ;;  %v4471_v34 = vld [vmem:[%s6048_s14] sm:$0xff]   ;;  %v4472_v35 = vld [vmem:[%s6048_s14 + $0x8] sm:$0xff]  }
 0x630   :  { %4191 = vmatpush3.bf16.msra.mxu0 %v4757_v3  ;;  %4206 = vmatprep.mubr.msk.bf16.mxu0 %vm4627_vm0, %v4626_v2 }
 0x631   :  { %v760_v31 = vadd.f32 %v759_v45, %v659_v22  ;;  %4192 = vmatprep.subr.bf16.mxu0 %v4626_v2 }
 0x634   :  { %4193 = vmatpush3.bf16.msra.mxu0 %v4764_v4 }
 0x635   :  { %4194 = vmatprep.subr.bf16.mxu0 %v4626_v2 }
 0x638   :  { %4195 = vmatpush3.bf16.msra.mxu0 %v4776_v6 }
 0x639   :  { %4196 = vmatprep.subr.bf16.mxu0 %v4626_v2 }
 0x63c   :  { %4197 = vmatpush3.bf16.msra.mxu0 %v4785_v9 }
 0x63d   :  { %4198 = vmatprep.subr.bf16.mxu0 %v4626_v2 }
 0x640   :  { %4199 = vmatpush3.bf16.msra.mxu0 %v4794_v12 }
 0x641   :  { %4200 = vmatprep.subr.bf16.mxu0 %v4626_v2 }
 0x644   :  { %4201 = vmatpush3.bf16.msra.mxu0 %v4805_v14 }
 0x645   :  { %4202 = vmatprep.subr.bf16.mxu0 %v4626_v2 }
 0x648   :  { %4203 = vmatpush3.bf16.msra.mxu0 %v4813_v16 }
 0x649   :  { %4204 = vmatprep.subr.bf16.mxu0 %v4626_v2 }
 0x64c   :  { %4205 = vmatpush3.bf16.msra.mxu0 %v4821_v18 }
 0x64d   :  { %4238 = vmatprep.subr.bf16.mxu0 %v4626_v2 }
 0x64f   :  { %4207 = vmatmul.mubr.msk.bf16.vlgmr.msra.gmra.mrb[24].mxu0 %vm3768_vm10, %v4635_v30 }
 0x650   :  { %4239 = vmatpush3.bf16.msra.mxu0 %v4831_v25  ;;  %4242 = vmatprep.mubr.msk.bf16.mxu0 %vm4627_vm0, %v4626_v2  ;;  %v3772_v25 = vld [vmem:[%s6046_s3 + $0x6] ss:$0 sm:$0xff] }
 0x651   :  { %4240 = vmatprep.subr.bf16.mxu0 %v4626_v2 }
 0x654   :  { %4241 = vmatpush3.bf16.msra.mxu0 %v4837_v26 }
 0x655   :  { %4246 = vmatprep.subr.bf16.mxu0 %v4626_v2 }
 0x702   :  { %v5100_v40 = vpop.f32.mrb[20].mxu0 }
 0x703   :  { %v4188_v37 = vpop.f32.mrb[21].mxu0 }
 0x704   :  { %v747_v47 = vpop.f32.mrb[22].mxu0 }
 0x705   :  { %v4189_v48 = vpop.f32.mrb[23].mxu0 }
 0x706   :  { %v4473_v48 = vld [vmem:[%s6049_s8] sm:$0xff]  }
 0x722   :  { %v801_v51 = vpop.f32.mrb[24].mxu0 }
 0x723   :  { %v807_v53 = vpack.c.bf16 %v801_v51, %v801_v51  ;;  %v859_v55 = vadd.f32 %v3772_v25, %v801_v51  ;;  %v4208_v56 = vpop.f32.mrb[25].mxu0  ;;  %v1165_v51 = vpop.permute.xlu0 %1164 }
 0x724   :  { %v804_v26 = vpop.f32.mrb[26].mxu0  ;;  %v1237_v56 = vld [vmem:[%s6051_s10] sm:$0xff] }
 0x725   :  { %v860_v58 = vmul.f32 %v3771_v52, %v859_v55  ;;  %v4209_v57 = vpop.f32.mrb[27].mxu0  ;;  %4215 = vmatmul.mubr.msk.bf16.vlgmr.msra.gmra.mrb[24].mxu1 %vm201_vm5, %v807_v53  ;;  %v4474_v52 = vld [vmem:[%s6049_s8 + $0x8] sm:$0xff]   ;;  %v1245_v26 = vld [vmem:[%s6051_s10 + $0x40] sm:$0xff] }
 0x726   :  { %4219 = vmatpush3.bf16.msra.mxu1 %v4757_v3  ;;  %4234 = vmatprep.mubr.msk.bf16.mxu1 %vm4627_vm0, %v4626_v2  ;;  %v3795_v57 = vcombine.high %v1237_v56, %v1245_v26 }
 0x727   :  { %v861_v60 = vadd.f32 %v860_v58, %v760_v31  ;;  %4220 = vmatprep.subr.bf16.mxu1 %v4626_v2  ;;  %v1238_v58 = vld [vmem:[%s6051_s10 + $0x8] sm:$0xff] }
 0x72a   :  { %4221 = vmatpush3.bf16.msra.mxu1 %v4764_v4 }
 0x72b   :  { %4222 = vmatprep.subr.bf16.mxu1 %v4626_v2 }
 0x72e   :  { %4223 = vmatpush3.bf16.msra.mxu1 %v4776_v6 }
 0x72f   :  { %4224 = vmatprep.subr.bf16.mxu1 %v4626_v2 }
 0x732   :  { %4225 = vmatpush3.bf16.msra.mxu1 %v4785_v9 }
 0x733   :  { %4226 = vmatprep.subr.bf16.mxu1 %v4626_v2 }
 0x736   :  { %4227 = vmatpush3.bf16.msra.mxu1 %v4794_v12 }
 0x737   :  { %4228 = vmatprep.subr.bf16.mxu1 %v4626_v2 }
 0x73a   :  { %4229 = vmatpush3.bf16.msra.mxu1 %v4805_v14 }
 0x73b   :  { %4230 = vmatprep.subr.bf16.mxu1 %v4626_v2 }
 0x73e   :  { %4231 = vmatpush3.bf16.msra.mxu1 %v4813_v16 }
 0x73f   :  { %4232 = vmatprep.subr.bf16.mxu1 %v4626_v2 }
 0x742   :  { %4233 = vmatpush3.bf16.msra.mxu1 %v4821_v18 }
 0x743   :  { %4266 = vmatprep.subr.bf16.mxu1 %v4626_v2 }
 0x745   :  { %4235 = vmatmul.mubr.msk.bf16.vlgmr.msra.gmra.mrb[28].mxu1 %vm3773_vm13, %v4635_v30 }
 0x746   :  { %4270 = vmatprep.mubr.msk.bf16.mxu1 %vm4627_vm0, %v4626_v2 }
 0x7f8   :  { %v5131_v61 = vpop.f32.mrb[24].mxu1 }
 0x7f9   :  { %v4216_v62 = vpop.f32.mrb[25].mxu1 }
 0x7fa   :  { %v848_v1 = vpop.f32.mrb[26].mxu1  ;;  %v3794_v62 = vcombine.low %v1237_v56, %v1245_v26  ;;  %v1249_v56 = vld [vmem:[%s6051_s10 + $0x60] sm:$0xff]  ;;  %v1242_v26 = vld [vmem:[%s6051_s10 + $0x28] sm:$0xff] }
 0x7fb   :  { %v4217_v13 = vpop.f32.mrb[27].mxu1 }
 0x818   :  { %v902_v19 = vpop.f32.mrb[28].mxu1 }
 0x819   :  { %v908_v22 = vpack.c.bf16 %v902_v19, %v902_v19  ;;  %v960_v23 = vadd.f32 %v3777_v42, %v902_v19  ;;  %v4236_v20 = vpop.f32.mrb[29].mxu1  ;;  %v1253_v42 = vld [vmem:[%s6051_s10 + $0x80] sm:$0xff] }
 0x81a   :  { %v905_v24 = vpop.f32.mrb[30].mxu1  ;;  %v1261_v19 = vld [vmem:[%s6051_s10 + $0xc0] sm:$0xff] }
 0x81b   :  { %v961_v29 = vmul.f32 %v3776_v21, %v960_v23  ;;  %v4237_v32 = vpop.f32.mrb[31].mxu1  ;;  %4243 = vmatmul.mubr.msk.bf16.vlgmr.msra.gmra.mrb[28].mxu0 %vm201_vm5, %v908_v22  ;;  %v1254_v21 = vld [vmem:[%s6051_s10 + $0x88] sm:$0xff]  ;;  %v3811_v22 = vcombine.high %v1253_v42, %v1261_v19  ;;  %v3810_v20 = vcombine.low %v1253_v42, %v1261_v19  ;;  %v1265_v42 = vld [vmem:[%s6051_s10 + $0xe0] sm:$0xff] }
 0x81c   :  { %4247 = vmatpush3.bf16.msra.mxu0 %v4757_v3  ;;  %4262 = vmatprep.mubr.msk.bf16.mxu0 %vm4627_vm0, %v4626_v2  ;;  %v4469_v3 = vld [vmem:[%s6047_s12] sm:$0xff]   ;;  %v1262_v23 = vld [vmem:[%s6051_s10 + $0xc8] sm:$0xff]  ;;  %v1239_v32 = vld [vmem:[%s6051_s10 + $0x10] sm:$0xff] }
 0x81d   :  { %v962_v33 = vadd.f32 %v961_v29, %v861_v60  ;;  %4248 = vmatprep.subr.bf16.mxu0 %v4626_v2  ;;  %4267 = vmatpush3.bf16.msra.mxu1 %v4469_v3  ;;  %v1246_v60 = vld [vmem:[%s6051_s10 + $0x48] sm:$0xff]  ;;  %v3812_v24 = vcombine.low %v1254_v21, %v1262_v23  ;;  %v3813_v29 = vcombine.high %v1254_v21, %v1262_v23  ;;  %v1240_v3 = vld [vmem:[%s6051_s10 + $0x18] sm:$0xff] }
 0x81e   :  { %4268 = vmatprep.subr.bf16.mxu1 %v4626_v2  ;;  %v3796_v1 = vcombine.low %v1238_v58, %v1246_v60  ;;  %v3797_v13 = vcombine.high %v1238_v58, %v1246_v60  ;;  %v1250_v58 = vld [vmem:[%s6051_s10 + $0x68] sm:$0xff] }
 0x81f   :  { %v1167_v53 = vmul.f32 %v1165_v51, %v962_v33  ;;  %v1247_v33 = vld [vmem:[%s6051_s10 + $0x50] sm:$0xff]  ;;  %v1258_v19 = vld [vmem:[%s6051_s10 + $0xa8] sm:$0xff]  ;;  %v3804_v23 = vcombine.low %v1242_v26, %v1250_v58 }
 0x820   :  { %4249 = vmatpush3.bf16.msra.mxu0 %v4764_v4  ;;  %v4470_v4 = vld [vmem:[%s6047_s12 + $0x8] sm:$0xff]  }
 0x821   :  { %4250 = vmatprep.subr.bf16.mxu0 %v4626_v2  ;;  %4269 = vmatpush3.bf16.msra.mxu1 %v4470_v4  ;;  %v1168_v55 = vpack.c.bf16 %v1167_v53, %v1167_v53  ;;  %v3798_v4 = vcombine.low %v1239_v32, %v1247_v33  ;;  %v1266_v21 = vld [vmem:[%s6051_s10 + $0xe8] sm:$0xff] }
 0x822   :  { %4274 = vmatprep.subr.bf16.mxu1 %v4626_v2 }
 0x824   :  { %4251 = vmatpush3.bf16.msra.mxu0 %v4776_v6 }
 0x825   :  { %4252 = vmatprep.subr.bf16.mxu0 %v4626_v2 }
 0x828   :  { %4253 = vmatpush3.bf16.msra.mxu0 %v4785_v9 }
 0x829   :  { %4254 = vmatprep.subr.bf16.mxu0 %v4626_v2 }
 0x82c   :  { %4255 = vmatpush3.bf16.msra.mxu0 %v4794_v12 }
 0x82d   :  { %4256 = vmatprep.subr.bf16.mxu0 %v4626_v2 }
 0x830   :  { %4257 = vmatpush3.bf16.msra.mxu0 %v4805_v14 }
 0x831   :  { %4258 = vmatprep.subr.bf16.mxu0 %v4626_v2 }
 0x834   :  { %4259 = vmatpush3.bf16.msra.mxu0 %v4813_v16 }
 0x835   :  { %4260 = vmatprep.subr.bf16.mxu0 %v4626_v2 }
 0x838   :  { %4261 = vmatpush3.bf16.msra.mxu0 %v4821_v18 }
 0x839   :  { %1557 = vmatprep.subr.bf16.mxu0 %v3797_v13  ;;  %v1257_v13 = vld [vmem:[%s6051_s10 + $0xa0] sm:$0xff] }
 0x83b   :  { %4263 = vmatmul.mubr.msk.bf16.vlgmr.msra.gmra.mrb[32].mxu0 %vm3778_vm1, %v4635_v30 }
 0x83c   :  { %1589 = vmatprep.mubr.bf16.mxu0 %v4625_v0  ;;  %1558 = vmatpush1.bf16.msra.mxu0 %v3796_v1  ;;  %v3805_v1 = vcombine.high %v1242_v26, %v1250_v58 }
 0x83d   :  { %1559 = vmatprep.subr.bf16.mxu0 %v3813_v29  ;;  %v1243_v29 = vld [vmem:[%s6051_s10 + $0x30] sm:$0xff] }
 0x840   :  { %1560 = vmatpush1.bf16.msra.mxu0 %v3812_v24  ;;  %v3821_v24 = vcombine.high %v1258_v19, %v1266_v21 }
 0x8ee   :  { %v5168_v6 = vpop.f32.mrb[28].mxu0 }
 0x8ef   :  { %v4244_v9 = vpop.f32.mrb[29].mxu0 }
 0x8f0   :  { %v949_v12 = vpop.f32.mrb[30].mxu0  ;;  %v3799_v9 = vcombine.high %v1239_v32, %v1247_v33  ;;  %v1251_v32 = vld [vmem:[%s6051_s10 + $0x70] sm:$0xff]  ;;  %v1244_v33 = vld [vmem:[%s6051_s10 + $0x38] sm:$0xff] }
 0x8f1   :  { %v4245_v14 = vpop.f32.mrb[31].mxu0  ;;  %v1248_v12 = vld [vmem:[%s6051_s10 + $0x58] sm:$0xff] }
 0x8f2   :  { %v3800_v14 = vcombine.low %v1240_v3, %v1248_v12 }
 0x90e   :  { %v1004_v16 = vpop.f32.mrb[32].mxu0 }
 0x90f   :  { %v1010_v18 = vpack.c.bf16 %v1004_v16, %v1004_v16  ;;  %v4264_v28 = vpop.f32.mrb[33].mxu0  ;;  %v3801_v16 = vcombine.high %v1240_v3, %v1248_v12  ;;  %v1252_v3 = vld [vmem:[%s6051_s10 + $0x78] sm:$0xff]  ;;  %v3807_v12 = vcombine.high %v1243_v29, %v1251_v32 }
 0x910   :  { %v1007_v30 = vpop.f32.mrb[34].mxu0 }
 0x911   :  { %v4265_v43 = vpop.f32.mrb[35].mxu0  ;;  %4271 = vmatmul.mubr.msk.bf16.vlgmr.msra.gmra.mrb[32].mxu1 %vm201_vm5, %v1010_v18  ;;  %1639 = vmatprep.subr.bf16.mxu0 %v3801_v16  ;;  %v1259_v16 = vld [vmem:[%s6051_s10 + $0xb0] sm:$0xff] }
 0x912   :  { %4278 = vmatprep.mubr.msk.bf16.mxu1 %vm4627_vm0, %v4626_v2  ;;  %4275 = vmatpush3.bf16.msra.mxu1 %v4471_v34  ;;  %v3790_v34 = vld [vmem:[%s6053_s9] ss:$0 sm:$0xff] }
 0x913   :  { %4276 = vmatprep.subr.bf16.mxu1 %v4626_v2 }
 0x916   :  { %4277 = vmatpush3.bf16.msra.mxu1 %v4472_v35 }
 0x917   :  { %4282 = vmatprep.subr.bf16.mxu1 %v4626_v2 }
 0x9e4   :  { %v1071_v44 = vpop.f32.mrb[32].mxu1 }
 0x9e5   :  { %v1072_v45 = vadd.f32 %v3780_v36, %v1071_v44  ;;  %v4272_v46 = vpop.f32.mrb[33].mxu1 }
 0x9e6   :  { %v1074_v31 = vpop.f32.mrb[34].mxu1 }
 0x9e7   :  { %4493 = vtanh.f32 %v1072_v45  ;;  %v4273_v37 = vpop.f32.mrb[35].mxu1  ;;  %v1255_v31 = vld [vmem:[%s6051_s10 + $0x90] sm:$0xff] }
 0x9e8   :  { %v1263_v37 = vld [vmem:[%s6051_s10 + $0xd0] sm:$0xff] }
 0x9f1   :  { %v4494_v47 = vpop.eup %4493 }
 0x9f2   :  { %v1078_v25 = vpack.c.bf16 %v4494_v47, %v4494_v47  ;;  %v1256_v47 = vld [vmem:[%s6051_s10 + $0x98] sm:$0xff] }
 0x9f4   :  { %4279 = vmatmul.mubr.msk.bf16.vlgmr.msra.gmra.mrb[36].mxu1 %vm201_vm5, %v1078_v25 }
 0x9f5   :  { %4283 = vmatpush3.bf16.msra.mxu1 %v4473_v48  ;;  %4286 = vmatprep.mubr.msk.bf16.mxu1 %vm4627_vm0, %v4626_v2  ;;  %v1264_v48 = vld [vmem:[%s6051_s10 + $0xd8] sm:$0xff] }
 0x9f6   :  { %4284 = vmatprep.subr.bf16.mxu1 %v4626_v2  ;;  %v3817_v53 = vcombine.high %v1256_v47, %v1264_v48  ;;  %v3816_v60 = vcombine.low %v1256_v47, %v1264_v48  ;;  %v5331_v47 = vld [vmem:[%s6052_s6 + $0x14] ss:$8 sps:$4 sm:$0xff]   ;;  %v5342_v48 = vld [vmem:[%s6052_s6 + $0x10] ss:$8 sps:$4 sm:$0xff]  }
 0x9f9   :  { %4285 = vmatpush3.bf16.msra.mxu1 %v4474_v52  ;;  %v3815_v52 = vcombine.high %v1255_v31, %v1263_v37 }
 0x9fa   :  { %1516 = vmatprep.subr.bf16.mxu1 %v3795_v57  ;;  %v3814_v57 = vcombine.low %v1255_v31, %v1263_v37  ;;  %v5318_v31 = vld [vmem:[%s6052_s6 + $0x4] ss:$8 sps:$4 sm:$0xff]   ;;  %v5325_v37 = vld [vmem:[%s6052_s6] ss:$8 sps:$4 sm:$0xff]  }
 0x9fc   :  { %4287 = vmatmul.mubr.msk.bf16.vlgmr.msra.gmra.mrb[40].mxu1 %vm201_vm5, %v1168_v55  ;;  %v1241_v55 = vld [vmem:[%s6051_s10 + $0x20] sm:$0xff] }
 0x9fd   :  { %1548 = vmatprep.mubr.bf16.mxu1 %v4625_v0  ;;  %1517 = vmatpush1.bf16.msra.mxu1 %v3794_v62  ;;  %v3803_v62 = vcombine.high %v1241_v55, %v1249_v56 }
 0x9fe   :  { %1518 = vmatprep.subr.bf16.mxu1 %v3811_v22  ;;  %v3802_v22 = vcombine.low %v1241_v55, %v1249_v56 }
 0xa01   :  { %1519 = vmatpush1.bf16.msra.mxu1 %v3810_v20  ;;  %v3819_v20 = vcombine.high %v1257_v13, %v1265_v42 }
 0xa02   :  { %1598 = vmatprep.subr.bf16.mxu1 %v3799_v9  ;;  %v3820_v9 = vcombine.low %v1258_v19, %v1266_v21 }
 0xac7   :  { %v5232_v18 = vpop.f32.mrb[36].mxu1 }
 0xac8   :  { %v4280_v28 = vpop.f32.mrb[37].mxu1 }
 0xac9   :  { %v1142_v30 = vpop.f32.mrb[38].mxu1  ;;  %v1267_v28 = vld [vmem:[%s6051_s10 + $0xf0] sm:$0xff] }
 0xaca   :  { %v4281_v43 = vpop.f32.mrb[39].mxu1  ;;  %v1260_v30 = vld [vmem:[%s6051_s10 + $0xb8] sm:$0xff] }
 0xacb   :  { %v1268_v43 = vld [vmem:[%s6051_s10 + $0xf8] sm:$0xff] }
 0xacf   :  { %v1229_v35 = vpop.f32.mrb[40].mxu1 }
 0xad0   :  { %v1230_v36 = vadd.f32 %v3790_v34, %v1229_v35  ;;  %v4288_v44 = vpop.f32.mrb[41].mxu1  ;;  %v3806_v34 = vcombine.low %v1243_v29, %v1251_v32  ;;  %v3808_v35 = vcombine.low %v1244_v33, %v1252_v3 }
 0xad1   :  { %v1232_v45 = vpop.f32.mrb[42].mxu1  ;;  %v3825_v44 = vcombine.high %v1260_v30, %v1268_v43 }
 0xad2   :  { %4495 = vtanh.f32 %v1230_v36  ;;  %v4289_v46 = vpop.f32.mrb[43].mxu1  ;;  %v3823_v36 = vcombine.high %v1259_v16, %v1267_v28  ;;  %v3822_v45 = vcombine.low %v1259_v16, %v1267_v28 }
 0xad3   :  { %v3824_v46 = vcombine.low %v1260_v30, %v1268_v43 }
 0xadc   :  { %v4496_v25 = vpop.eup %4495 }
 0xadd   :  { %v5249_v51 = vpack.c.bf16 %v4496_v25, %v4496_v25  ;;  %v1883_v25 = vpop.permute.xlu0 %1882 }
 0xadf   :  { %3826 = vmatmul.mubr.msk.bf16.vlgmr.msra.gmra.mrb[44].mxu1 %vm201_vm5, %v5249_v51  ;;  %3827 = vmatmul.mubr.msk.bf16.vlgmr.msra.gmra.mrb[36].mxu0 %vm201_vm5, %v5249_v51 }
 0xae0   :  { %1599 = vmatpush1.bf16.msra.mxu1 %v3798_v4  ;;  %1640 = vmatpush1.bf16.msra.mxu0 %v3800_v14  ;;  %v3818_v4 = vcombine.low %v1257_v13, %v1265_v42  ;;  %v3809_v14 = vcombine.high %v1244_v33, %v1252_v3 }
 0xae1   :  { %1600 = vmatprep.subr.bf16.mxu1 %v3815_v52  ;;  %1641 = vmatprep.subr.bf16.mxu0 %v3817_v53  ;;  %v1270_v53 = vld [vmem:[%s6054_s11 + $0x8] sm:$0xff] }
 0xae2   :  { %1630 = vmatprep.mubr.bf16.mxu1 %v4625_v0  ;;  %1671 = vmatprep.mubr.bf16.mxu0 %v4625_v0 }
 0xae4   :  { %1601 = vmatpush1.bf16.msra.mxu1 %v3814_v57  ;;  %1642 = vmatpush1.bf16.msra.mxu0 %v3816_v60 }
 0xae5   :  { %1680 = vmatprep.subr.bf16.mxu1 %v3803_v62  ;;  %1721 = vmatprep.subr.bf16.mxu0 %v3805_v1 }
 0xae7   :  { %3828 = vmatmul.mubr.msk.bf16.vlgmr.msra.gmra.mrb[48].mxu1 %vm201_vm5, %v5249_v51  ;;  %3829 = vmatmul.mubr.msk.bf16.vlgmr.msra.gmra.mrb[40].mxu0 %vm201_vm5, %v5249_v51 }
 0xae8   :  { %1681 = vmatpush1.bf16.msra.mxu1 %v3802_v22  ;;  %1722 = vmatpush1.bf16.msra.mxu0 %v3804_v23 }
 0xae9   :  { %1682 = vmatprep.subr.bf16.mxu1 %v3819_v20  ;;  %1723 = vmatprep.subr.bf16.mxu0 %v3821_v24 }
 0xaea   :  { %1712 = vmatprep.mubr.bf16.mxu1 %v4625_v0  ;;  %1753 = vmatprep.mubr.bf16.mxu0 %v4625_v0 }
 0xaec   :  { %1683 = vmatpush1.bf16.msra.mxu1 %v3818_v4  ;;  %1724 = vmatpush1.bf16.msra.mxu0 %v3820_v9 }
 0xaed   :  { %1762 = vmatprep.subr.bf16.mxu1 %v3807_v12  ;;  %1803 = vmatprep.subr.bf16.mxu0 %v3809_v14 }
 0xaef   :  { %3830 = vmatmul.mubr.msk.bf16.vlgmr.msra.gmra.mrb[52].mxu1 %vm201_vm5, %v5249_v51  ;;  %3831 = vmatmul.mubr.msk.bf16.vlgmr.msra.gmra.mrb[44].mxu0 %vm201_vm5, %v5249_v51 }
 0xaf0   :  { %1763 = vmatpush1.bf16.msra.mxu1 %v3806_v34  ;;  %1804 = vmatpush1.bf16.msra.mxu0 %v3808_v35 }
 0xaf1   :  { %1764 = vmatprep.subr.bf16.mxu1 %v3823_v36  ;;  %1805 = vmatprep.subr.bf16.mxu0 %v3825_v44 }
 0xaf2   :  { %1794 = vmatprep.mubr.bf16.mxu1 %v4625_v0  ;;  %1835 = vmatprep.mubr.bf16.mxu0 %v4625_v0 }
 0xaf4   :  { %1765 = vmatpush1.bf16.msra.mxu1 %v3822_v45  ;;  %1806 = vmatpush1.bf16.msra.mxu0 %v3824_v46 }
 0xaf5   :  { %1907 = vmatprep.subr.bf16.mxu1 %v5318_v31  ;;  %2019 = vmatprep.subr.bf16.mxu0 %v5318_v31 }
 0xaf7   :  { %3832 = vmatmul.mubr.msk.bf16.vlgmr.msra.gmra.mrb[56].mxu1 %vm201_vm5, %v5249_v51  ;;  %3833 = vmatmul.mubr.msk.bf16.vlgmr.msra.gmra.mrb[48].mxu0 %vm201_vm5, %v5249_v51  ;;  %v5357_v51 = vshrl.u32 %v88_v27, 7 }
 0xaf8   :  { %1908 = vmatpush1.bf16.msra.mxu1 %v5325_v37  ;;  %1939 = vmatprep.mubr.bf16.mxu1 %v4625_v0 }
 0xaf9   :  { %1909 = vmatprep.subr.bf16.mxu1 %v5331_v47  ;;  %2020 = vmatpush1.bf16.msra.mxu0 %v5325_v37  ;;  %v6058_v52 = vsub.s32 7, %v5357_v51  ;;  %v1283_v20 = vsub.s32 2, %v5357_v51  ;;  %v1279_v32 = vsub.s32 1, %v5357_v51  ;;  %v1287_v33 = vsub.s32 3, %v5357_v51 }
 0xafa   :  { %2021 = vmatprep.subr.bf16.mxu0 %v5331_v47  ;;  %2051 = vmatprep.mubr.bf16.mxu0 %v4625_v0  ;;  %v1291_v44 = vsub.s32 4, %v5357_v51  ;;  %v6060_v45 = vsub.s32 6, %v5357_v51 }
 0xafb   :  { %v1336_v55 = vrot.slane %v1270_v53, %v6058_v52  ;;  %v1316_v3 = vrot.slane %v1270_v53, %v1283_v20  ;;  %v1312_v4 = vrot.slane %v1270_v53, %v1279_v32  ;;  %v1320_v9 = vrot.slane %v1270_v53, %v1287_v33 }
 0xafc   :  { %1910 = vmatpush1.bf16.msra.mxu1 %v5342_v48 }
 0xafd   :  { %2022 = vmatpush1.bf16.msra.mxu0 %v5342_v48  ;;  %4290 = vmatprep.subr.bf16.mxu1 %v4626_v2 }
 0xafe   :  { %2195 = vmatprep.subr.bf16.mxu0 %v5318_v31 }
 0xaff   :  { %3840 = vmatmul.mubr.msk.bf16.vlgmr.msra.gmra.mrb[60].mxu1 %vm201_vm5, %v1883_v25 }
 0xb00   :  { %4294 = vmatprep.mubr.msk.bf16.mxu1 %vm4627_vm0, %v4626_v2 }
 0xbb2   :  { %v5365_v56 = vpop.f32.mrb[44].mxu1  ;;  %v5367_v26 = vpop.f32.mrb[36].mxu0 }
 0xbb3   :  { %v5369_v58 = vpop.f32.mrb[45].mxu1  ;;  %v5371_v57 = vpop.f32.mrb[37].mxu0 }
 0xbb4   :  { %v1554_v60 = vpop.f32.mrb[46].mxu1  ;;  %v1595_v27 = vpop.f32.mrb[38].mxu0 }
 0xbb5   :  { %v1555_v62 = vpop.f32.mrb[47].mxu1  ;;  %v1596_v1 = vpop.f32.mrb[39].mxu0  ;;  %v6061_v60 = vsub.s32 5, %v5357_v51  ;;  %v1324_v27 = vrot.slane %v1270_v53, %v1291_v44 }
 0xbb6   :  { %v1332_v62 = vrot.slane %v1270_v53, %v6060_v45 }
 0xbb7   :  { %v1328_v1 = vrot.slane %v1270_v53, %v6061_v60 }
 0xbba   :  { %v5373_v13 = vpop.f32.mrb[48].mxu1  ;;  %v5375_v42 = vpop.f32.mrb[40].mxu0 }
 0xbbb   :  { %v5377_v19 = vpop.f32.mrb[49].mxu1  ;;  %v5379_v21 = vpop.f32.mrb[41].mxu0 }
 0xbbc   :  { %v1636_v22 = vpop.f32.mrb[50].mxu1  ;;  %v1677_v23 = vpop.f32.mrb[42].mxu0 }
 0xbbd   :  { %v1637_v24 = vpop.f32.mrb[51].mxu1  ;;  %v1678_v29 = vpop.f32.mrb[43].mxu0 }
 0xbc2   :  { %v5390_v12 = vpop.f32.mrb[52].mxu1  ;;  %v1755_v14 = vpop.f32.mrb[44].mxu0 }
 0xbc3   :  { %v5392_v16 = vadd.f32 %v1755_v14, %v1316_v3  ;;  %v1716_v28 = vpop.f32.mrb[53].mxu1  ;;  %v1757_v30 = vpop.f32.mrb[45].mxu0 }
 0xbc4   :  { %v5394_v43 = vadd.f32 %v1716_v28, %v1312_v4  ;;  %v5396_v34 = vadd.f32 %v1757_v30, %v1320_v9  ;;  %v1718_v35 = vpop.f32.mrb[54].mxu1  ;;  %v1759_v36 = vpop.f32.mrb[46].mxu0 }
 0xbc5   :  { %v1719_v46 = vpop.f32.mrb[55].mxu1  ;;  %v1760_v25 = vpop.f32.mrb[47].mxu0 }
 0xbca   :  { %v1796_v22 = vpop.f32.mrb[56].mxu1  ;;  %v1837_v23 = vpop.f32.mrb[48].mxu0 }
 0xbcb   :  { %v5407_v24 = vadd.f32 %v1796_v22, %v1324_v27  ;;  %v5409_v29 = vadd.f32 %v1837_v23, %v1332_v62  ;;  %v1798_v3 = vpop.f32.mrb[57].mxu1  ;;  %v1839_v4 = vpop.f32.mrb[49].mxu0 }
 0xbcc   :  { %v5411_v9 = vadd.f32 %v1798_v3, %v1328_v1  ;;  %v5413_v14 = vadd.f32 %v1839_v4, %v1336_v55  ;;  %v1800_v28 = vpop.f32.mrb[58].mxu1  ;;  %v1841_v30 = vpop.f32.mrb[50].mxu0 }
 0xbcd   :  { %v1801_v35 = vpop.f32.mrb[59].mxu1  ;;  %v1842_v36 = vpop.f32.mrb[51].mxu0 }
 0xbd2   :  { %v1941_v46 = vpop.f32.mrb[60].mxu1 }
 0xbd3   :  { %v1951_v25 = vadd.f32 %v1941_v46, %v4946_v49  ;;  %1959 = vrot.lane.b32.xlu1 %v1941_v46, %s4637_s17  ;;  %v1943_v53 = vpop.f32.mrb[61].mxu1  ;;  %v3843_v4 = vmul.f32 -1.442695, %v1941_v46 }
 0xbd4   :  { %v1945_v27 = vpop.f32.mrb[62].mxu1 }
 0xbd5   :  { %v1946_v22 = vpop.f32.mrb[63].mxu1  ;;  %v3842_v62 = vmul.f32 -1.442695, %v1951_v25 }
 0xbd7   :  { %4497 = vpow2.f32 %v3842_v62 }
 0xbe1   :  { %v4498_v23 = vpop.eup %4497 }
 0xbe2   :  { %v1955_v52 = vadd.f32 1.0, %v4498_v23 }
 0xbe4   :  { %4499 = vrcp.f32 %v1955_v52  ;;  %v5423_v52 = vsel %vm1948_vm2, 1.0, %v4626_v2 }
 0xbe5   :  { %4501 = vpow2.f32 %v3843_v4 }
 0xbee   :  { %v4500_v1 = vpop.eup %4499 }
 0xbef   :  { %v4502_v28 = vpop.eup %4501  ;;  %v1969_v46 = vsub.f32 1.0, %v4500_v1  ;;  %v1975_v23 = vmul.f32 %v4500_v1, %v4961_v63 }
 0xbf0   :  { %v1989_v30 = vadd.f32 1.0, %v4502_v28 }
 0xbf2   :  { %4503 = vrcp.f32 %v1989_v30 }
 0xbfc   :  { %v4504_v27 = vpop.eup %4503 }
 0xbfd   :  { %v1995_v22 = vmul.f32 0.0, %v4504_v27 }
 0xc45   :  { %v1960_v55 = vpop.permute.xlu1 %1959 }
 0xc46   :  { %v1962_v3 = vmul.f32 %v4500_v1, %v1960_v55 }
 0xc48   :  { %1964 = vrot.lane.b32.xlu0 %v1962_v3, %s4637_s17 }
 0xcba   :  { %v1965_v35 = vpop.permute.xlu0 %1964 }
 0xcbb   :  { %v1967_v36 = vadd.f32 %v1965_v35, %v4946_v49  ;;  %v1978_v49 = vsub.f32 1.0, %v5423_v52 }
 0xcbd   :  { %4505 = vtanh.f32 %v1967_v36  ;;  %v1979_v28 = vmul.f32 %v1978_v49, %v4961_v63  ;;  %v5434_v36 = vld [vmem:[%s6055_s7] sm:$0xff]   ;;  %v5445_v63 = vld [vmem:[%s6055_s7 + $0x8] sm:$0xff]   ;;  %s4639_s7 = smov 32  }
 0xcbe   :  { %4291 = vmatpush3.bf16.msra.mxu1 %v5434_v36 }
 0xcbf   :  { %4292 = vmatprep.subr.bf16.mxu1 %v4626_v2 }
 0xcc2   :  { %4293 = vmatpush3.bf16.msra.mxu1 %v5445_v63 }
 0xcc3   :  { %4298 = vmatprep.subr.bf16.mxu1 %v4626_v2 }
 0xcc7   :  { %v4506_v25 = vpop.eup %4505 }
 0xcc8   :  { %1971 = vrot.lane.b32.xlu1 %v4506_v25, %s4638_s20 }
 0xccc   :  { %1997 = vrot.lane.b32.xlu1 %v1995_v22, %s4637_s17  ;;  %v3844_v22 = vmul.f32 -1.442695, %v1943_v53 }
 0xd3a   :  { %v1972_v62 = vpop.permute.xlu1 %1971 }
 0xd3b   :  { %v1974_v55 = vmul.f32 %v1972_v62, %v1969_v46 }
 0xd3d   :  { %v1976_v3 = vadd.f32 %v1975_v23, %v1974_v55 }
 0xd3e   :  { %v1998_v4 = vpop.permute.xlu1 %1997 }
 0xd3f   :  { %v1977_v30 = vmul.f32 %v5423_v52, %v1976_v3  ;;  %v2000_v35 = vadd.f32 %v1998_v4, %v1943_v53 }
 0xd41   :  { %v5436_v27 = vadd.f32 %v1979_v28, %v1977_v30  ;;  %4507 = vtanh.f32 %v2000_v35 }
 0xd42   :  { %4509 = vpow2.f32 %v3844_v22 }
 0xd43   :  { %v2012_v1 = vpack.c.bf16 %v5436_v27, %v5436_v27 }
 0xd45   :  { %2014 = vrot.lane.b32.xlu0 %v2012_v1, %s4638_s20 }
 0xd4b   :  { %v4508_v25 = vpop.eup %4507 }
 0xd4c   :  { %2004 = vrot.lane.b32.xlu0 %v4508_v25, %s4638_s20  ;;  %v4510_v46 = vpop.eup %4509 }
 0xd4d   :  { %v1990_v62 = vadd.f32 1.0, %v4510_v46 }
 0xd4f   :  { %4511 = vrcp.f32 %v1990_v62 }
 0xd59   :  { %v4512_v55 = vpop.eup %4511 }
 0xd5a   :  { %v2002_v3 = vsub.f32 1.0, %v4512_v55  ;;  %v2008_v28 = vmul.f32 0.0, %v4512_v55 }
 0xdb7   :  { %v2015_v23 = vpop.permute.xlu0 %2014 }
 0xdb8   :  { %3845 = vmatmul.mubr.msk.bf16.vlgmr.msra.gmra.mrb[52].mxu0 %vm201_vm5, %v2015_v23 }
 0xdb9   :  { %2196 = vmatpush1.bf16.msra.mxu0 %v5325_v37  ;;  %2227 = vmatprep.mubr.bf16.mxu0 %v4625_v0 }
 0xdba   :  { %2197 = vmatprep.subr.bf16.mxu0 %v5331_v47 }
 0xdbd   :  { %2198 = vmatpush1.bf16.msra.mxu0 %v5342_v48 }
 0xdbe   :  { %v2005_v4 = vpop.permute.xlu0 %2004  ;;  %2359 = vmatprep.subr.bf16.mxu0 %v5318_v31 }
 0xdbf   :  { %v2007_v53 = vmul.f32 %v2005_v4, %v2002_v3 }
 0xdc1   :  { %v2009_v30 = vadd.f32 %v2008_v28, %v2007_v53 }
 0xdc3   :  { %v2010_v35 = vmul.f32 %v4950_v54, %v2009_v30 }
 0xdc5   :  { %v5459_v1 = vadd.f32 %v2010_v35, %v4953_v59 }
 0xdc7   :  { %v2060_v25 = vpack.c.bf16 %v5459_v1, %v5459_v1 }
 0xdc9   :  { %4295 = vmatmul.mubr.msk.bf16.vlgmr.msra.gmra.mrb[64].mxu1 %vm201_vm5, %v2060_v25 }
 0xdca   :  { %4299 = vmatpush3.bf16.msra.mxu1 %v5434_v36  ;;  %4302 = vmatprep.mubr.msk.bf16.mxu1 %vm4627_vm0, %v4626_v2 }
 0xdcb   :  { %4300 = vmatprep.subr.bf16.mxu1 %v4626_v2 }
 0xdce   :  { %4301 = vmatpush3.bf16.msra.mxu1 %v5445_v63 }
 0xdcf   :  { %4306 = vmatprep.subr.bf16.mxu1 %v4626_v2 }
 0xe8b   :  { %v2053_v54 = vpop.f32.mrb[52].mxu0 }
 0xe8c   :  { %v2119_v59 = vadd.f32 %v2053_v54, %v4995_v38  ;;  %2127 = vrot.lane.b32.xlu1 %v2053_v54, %s4637_s17  ;;  %v2055_v22 = vpop.f32.mrb[53].mxu0 }
 0xe8d   :  { %v2057_v46 = vpop.f32.mrb[54].mxu0 }
 0xe8e   :  { %v2058_v62 = vpop.f32.mrb[55].mxu0  ;;  %v3850_v53 = vmul.f32 -1.442695, %v2119_v59 }
 0xe90   :  { %4513 = vpow2.f32 %v3850_v53 }
 0xe9a   :  { %v4514_v28 = vpop.eup %4513 }
 0xe9b   :  { %v2123_v30 = vadd.f32 1.0, %v4514_v28 }
 0xe9c   :  { %v2110_v23 = vpop.f32.mrb[64].mxu1 }
 0xe9d   :  { %2150 = vrot.lane.b32.xlu1 %v2110_v23, %s4638_s20  ;;  %v4296_v55 = vpop.f32.mrb[65].mxu1  ;;  %4515 = vrcp.f32 %v2123_v30  ;;  %v5480_v30 = vsel %vm2116_vm3, 1.0, %v4626_v2 }
 0xe9e   :  { %v2113_v3 = vpop.f32.mrb[66].mxu1 }
 0xe9f   :  { %v4297_v4 = vpop.f32.mrb[67].mxu1 }
 0xea1   :  { %2167 = vrot.lane.b32.xlu1 %v2110_v23, %s4639_s7 }
 0xea7   :  { %v4516_v35 = vpop.eup %4515 }
 0xefe   :  { %v2128_v25 = vpop.permute.xlu1 %2127 }
 0xeff   :  { %v2130_v5 = vmul.f32 %v4516_v35, %v2128_v25 }
 0xf01   :  { %2132 = vrot.lane.b32.xlu0 %v2130_v5, %s4637_s17 }
 0xf0f   :  { %v2151_v46 = vpop.permute.xlu1 %2150 }
 0xf10   :  { %v2153_v62 = vadd.f32 %v2151_v46, %v2053_v54  ;;  %v2137_v54 = vsub.f32 1.0, %v4516_v35 }
 0xf12   :  { %v3851_v45 = vmul.f32 -1.442695, %v2153_v62 }
 0xf13   :  { %v2168_v60 = vpop.permute.xlu1 %2167 }
 0xf14   :  { %4517 = vpow2.f32 %v3851_v45 }
 0xf1e   :  { %v4518_v55 = vpop.eup %4517 }
 0xf1f   :  { %v2161_v3 = vadd.f32 1.0, %v4518_v55  ;;  %v2146_v55 = vsub.f32 1.0, %v5480_v30 }
 0xf21   :  { %4519 = vrcp.f32 %v2161_v3 }
 0xf2b   :  { %v4520_v4 = vpop.eup %4519 }
 0xf2c   :  { %v2170_v23 = vmul.f32 %v4520_v4, %v2168_v60  ;;  %v2143_v60 = vmul.f32 %v4516_v35, %v5436_v27  ;;  %v2154_v35 = vadd.f32 %v2151_v46, %v2055_v22 }
 0xf2e   :  { %2172 = vrot.lane.b32.xlu1 %v2170_v23, %s4637_s17 }
 0xf73   :  { %v2133_v59 = vpop.permute.xlu0 %2132 }
 0xf74   :  { %v2135_v53 = vadd.f32 %v2133_v59, %v4995_v38  ;;  %v2147_v38 = vmul.f32 %v2146_v55, %v5436_v27 }
 0xf76   :  { %4521 = vtanh.f32 %v2135_v53 }
 0xf80   :  { %v4522_v28 = vpop.eup %4521 }
 0xf81   :  { %2139 = vrot.lane.b32.xlu0 %v4522_v28, %s4638_s20  ;;  %v3852_v28 = vmul.f32 -1.442695, %v2154_v35 }
 0xfa0   :  { %v2173_v5 = vpop.permute.xlu1 %2172 }
 0xfa1   :  { %v2175_v45 = vadd.f32 %v2173_v5, %v2055_v22 }
 0xfa3   :  { %4523 = vtanh.f32 %v2175_v45 }
 0xfa4   :  { %4525 = vpow2.f32 %v3852_v28 }
 0xfad   :  { %v4524_v53 = vpop.eup %4523 }
 0xfae   :  { %v4526_v5 = vpop.eup %4525 }
 0xff3   :  { %v2140_v25 = vpop.permute.xlu0 %2139 }
 0xff4   :  { %v2142_v62 = vmul.f32 %v2140_v25, %v2137_v54  ;;  %v2162_v54 = vadd.f32 1.0, %v4526_v5 }
 0xff6   :  { %v2144_v3 = vadd.f32 %v2143_v60, %v2142_v62  ;;  %4527 = vrcp.f32 %v2162_v54 }
 0xff8   :  { %v2145_v4 = vmul.f32 %v5480_v30, %v2144_v3  ;;  %v2186_v3 = vmul.f32 %v5459_v1, %v1978_v49 }
 0xffa   :  { %v5488_v23 = vadd.f32 %v2147_v38, %v2145_v4 }
 0xffc   :  { %v2188_v59 = vpack.c.bf16 %v5488_v23, %v5488_v23 }
 0xffe   :  { %2190 = vrot.lane.b32.xlu0 %v2188_v59, %s4638_s20 }
0x1000   :  { %v4528_v45 = vpop.eup %4527 }
0x1001   :  { %v2177_v25 = vsub.f32 1.0, %v4528_v45  ;;  %v2183_v62 = vmul.f32 %v4528_v45, %v5459_v1 }
0x1002   :  { %2179 = vrot.lane.b32.xlu0 %v4524_v53, %s4638_s20 }
0x1070   :  { %v2191_v27 = vpop.permute.xlu0 %2190 }
0x1071   :  { %3853 = vmatmul.mubr.msk.bf16.vlgmr.msra.gmra.mrb[56].mxu0 %vm201_vm5, %v2191_v27 }
0x1072   :  { %2360 = vmatpush1.bf16.msra.mxu0 %v5325_v37  ;;  %2391 = vmatprep.mubr.bf16.mxu0 %v4625_v0 }
0x1073   :  { %2361 = vmatprep.subr.bf16.mxu0 %v5331_v47 }
0x1074   :  { %v2180_v60 = vpop.permute.xlu0 %2179 }
0x1075   :  { %v2182_v22 = vmul.f32 %v2180_v60, %v2177_v25 }
0x1076   :  { %2362 = vmatpush1.bf16.msra.mxu0 %v5342_v48 }
0x1077   :  { %v2184_v46 = vadd.f32 %v2183_v62, %v2182_v22  ;;  %2523 = vmatprep.subr.bf16.mxu0 %v5318_v31 }
0x1079   :  { %v2185_v38 = vmul.f32 %v5423_v52, %v2184_v46 }
0x107b   :  { %v5505_v4 = vadd.f32 %v2186_v3, %v2185_v38 }
0x107d   :  { %v2236_v59 = vpack.c.bf16 %v5505_v4, %v5505_v4 }
0x107f   :  { %4303 = vmatmul.mubr.msk.bf16.vlgmr.msra.gmra.mrb[68].mxu1 %vm201_vm5, %v2236_v59 }
0x1080   :  { %4307 = vmatpush3.bf16.msra.mxu1 %v5434_v36  ;;  %4310 = vmatprep.mubr.msk.bf16.mxu1 %vm4627_vm0, %v4626_v2 }
0x1081   :  { %4308 = vmatprep.subr.bf16.mxu1 %v4626_v2 }
0x1084   :  { %4309 = vmatpush3.bf16.msra.mxu1 %v5445_v63 }
0x1085   :  { %4314 = vmatprep.subr.bf16.mxu1 %v4626_v2 }
0x1144   :  { %v2229_v49 = vpop.f32.mrb[56].mxu0 }
0x1145   :  { %v2283_v52 = vadd.f32 %v2229_v49, %v5030_v39  ;;  %v2231_v1 = vpop.f32.mrb[57].mxu0  ;;  %2291 = vrot.lane.b32.xlu1 %v2229_v49, %s4637_s17 }
0x1146   :  { %v2233_v53 = vpop.f32.mrb[58].mxu0 }
0x1147   :  { %v2234_v35 = vpop.f32.mrb[59].mxu0  ;;  %v3856_v27 = vmul.f32 -1.442695, %v2283_v52 }
0x1149   :  { %4529 = vpow2.f32 %v3856_v27 }
0x1152   :  { %v2274_v28 = vpop.f32.mrb[68].mxu1 }
0x1153   :  { %2314 = vrot.lane.b32.xlu1 %v2274_v28, %s4638_s20  ;;  %v4304_v5 = vpop.f32.mrb[69].mxu1  ;;  %v4530_v25 = vpop.eup %4529 }
0x1154   :  { %v2277_v54 = vpop.f32.mrb[70].mxu1  ;;  %v2287_v60 = vadd.f32 1.0, %v4530_v25 }
0x1155   :  { %v4305_v45 = vpop.f32.mrb[71].mxu1 }
0x1156   :  { %4531 = vrcp.f32 %v2287_v60 }
0x1160   :  { %v4532_v62 = vpop.eup %4531 }
0x11b7   :  { %v2292_v22 = vpop.permute.xlu1 %2291 }
0x11b8   :  { %v2294_v46 = vmul.f32 %v4532_v62, %v2292_v22  ;;  %v5526_v22 = vsel %vm2280_vm4, 1.0, %v4626_v2 }
0x11ba   :  { %2296 = vrot.lane.b32.xlu0 %v2294_v46, %s4637_s17 }
0x11be   :  { %2331 = vrot.lane.b32.xlu0 %v2274_v28, %s4639_s7 }
0x11c5   :  { %v2315_v3 = vpop.permute.xlu1 %2314 }
0x11c6   :  { %v2317_v38 = vadd.f32 %v2315_v3, %v2229_v49  ;;  %v2301_v49 = vsub.f32 1.0, %v4532_v62 }
0x11c8   :  { %v3857_v59 = vmul.f32 -1.442695, %v2317_v38 }
0x11ca   :  { %4533 = vpow2.f32 %v3857_v59  ;;  %v2310_v59 = vsub.f32 1.0, %v5526_v22 }
0x11d4   :  { %v4534_v53 = vpop.eup %4533 }
0x11d5   :  { %v2325_v35 = vadd.f32 1.0, %v4534_v53 }
0x11d7   :  { %4535 = vrcp.f32 %v2325_v35  ;;  %v2311_v35 = vmul.f32 %v2310_v59, %v5488_v23 }
0x11e1   :  { %v4536_v54 = vpop.eup %4535 }
0x122c   :  { %v2297_v5 = vpop.permute.xlu0 %2296 }
0x122d   :  { %v2299_v52 = vadd.f32 %v2297_v5, %v5030_v39  ;;  %v2307_v39 = vmul.f32 %v4532_v62, %v5488_v23  ;;  %v2318_v62 = vadd.f32 %v2315_v3, %v2231_v1 }
0x122f   :  { %4537 = vtanh.f32 %v2299_v52 }
0x1230   :  { %v2332_v45 = vpop.permute.xlu0 %2331 }
0x1231   :  { %v2334_v27 = vmul.f32 %v4536_v54, %v2332_v45 }
0x1233   :  { %2336 = vrot.lane.b32.xlu0 %v2334_v27, %s4637_s17  ;;  %v3858_v27 = vmul.f32 -1.442695, %v2318_v62 }
0x1239   :  { %v4538_v25 = vpop.eup %4537 }
0x123a   :  { %2303 = vrot.lane.b32.xlu1 %v4538_v25, %s4638_s20 }
0x12a5   :  { %v2337_v28 = vpop.permute.xlu0 %2336 }
0x12a6   :  { %v2339_v60 = vadd.f32 %v2337_v28, %v2231_v1 }
0x12a8   :  { %4539 = vtanh.f32 %v2339_v60 }
0x12a9   :  { %4541 = vpow2.f32 %v3858_v27 }
0x12ac   :  { %v2304_v46 = vpop.permute.xlu1 %2303 }
0x12ad   :  { %v2306_v38 = vmul.f32 %v2304_v46, %v2301_v49 }
0x12af   :  { %v2308_v53 = vadd.f32 %v2307_v39, %v2306_v38 }
0x12b1   :  { %v2309_v5 = vmul.f32 %v5526_v22, %v2308_v53 }
0x12b2   :  { %v4540_v52 = vpop.eup %4539 }
0x12b3   :  { %v5534_v54 = vadd.f32 %v2311_v35, %v2309_v5  ;;  %2343 = vrot.lane.b32.xlu0 %v4540_v52, %s4638_s20  ;;  %v4542_v25 = vpop.eup %4541  ;;  %v2350_v35 = vmul.f32 %v5505_v4, %v2146_v55 }
0x12b4   :  { %v2326_v28 = vadd.f32 1.0, %v4542_v25 }
0x12b5   :  { %v2352_v45 = vpack.c.bf16 %v5534_v54, %v5534_v54 }
0x12b6   :  { %4543 = vrcp.f32 %v2326_v28 }
0x12b7   :  { %2354 = vrot.lane.b32.xlu1 %v2352_v45, %s4638_s20 }
0x12c0   :  { %v4544_v60 = vpop.eup %4543 }
0x12c1   :  { %v2341_v23 = vsub.f32 1.0, %v4544_v60  ;;  %v2347_v46 = vmul.f32 %v4544_v60, %v5505_v4 }
0x1325   :  { %v2344_v49 = vpop.permute.xlu0 %2343 }
0x1326   :  { %v2346_v39 = vmul.f32 %v2344_v49, %v2341_v23 }
0x1328   :  { %v2348_v38 = vadd.f32 %v2347_v46, %v2346_v39 }
0x1329   :  { %v2355_v53 = vpop.permute.xlu1 %2354 }
0x132a   :  { %v2349_v5 = vmul.f32 %v5480_v30, %v2348_v38  ;;  %3859 = vmatmul.mubr.msk.bf16.vlgmr.msra.gmra.mrb[60].mxu0 %vm201_vm5, %v2355_v53 }
0x132b   :  { %2524 = vmatpush1.bf16.msra.mxu0 %v5325_v37  ;;  %2555 = vmatprep.mubr.bf16.mxu0 %v4625_v0 }
0x132c   :  { %v5548_v1 = vadd.f32 %v2350_v35, %v2349_v5  ;;  %2525 = vmatprep.subr.bf16.mxu0 %v5331_v47 }
0x132e   :  { %v2400_v3 = vpack.c.bf16 %v5548_v1, %v5548_v1 }
0x132f   :  { %2526 = vmatpush1.bf16.msra.mxu0 %v5342_v48 }
0x1330   :  { %4311 = vmatmul.mubr.msk.bf16.vlgmr.msra.gmra.mrb[72].mxu1 %vm201_vm5, %v2400_v3  ;;  %2687 = vmatprep.subr.bf16.mxu0 %v5318_v31 }
0x1331   :  { %4315 = vmatpush3.bf16.msra.mxu1 %v5434_v36  ;;  %4318 = vmatprep.mubr.msk.bf16.mxu1 %vm4627_vm0, %v4626_v2 }
0x1332   :  { %4316 = vmatprep.subr.bf16.mxu1 %v4626_v2 }
0x1335   :  { %4317 = vmatpush3.bf16.msra.mxu1 %v5445_v63 }
0x1336   :  { %4322 = vmatprep.subr.bf16.mxu1 %v4626_v2 }
0x13fd   :  { %v2393_v30 = vpop.f32.mrb[60].mxu0 }
0x13fe   :  { %v2447_v55 = vadd.f32 %v2393_v30, %v5065_v41  ;;  %2455 = vrot.lane.b32.xlu1 %v2393_v30, %s4637_s17  ;;  %v2395_v4 = vpop.f32.mrb[61].mxu0 }
0x13ff   :  { %v2397_v52 = vpop.f32.mrb[62].mxu0 }
0x1400   :  { %v2398_v45 = vpop.f32.mrb[63].mxu0  ;;  %v3862_v60 = vmul.f32 -1.442695, %v2447_v55 }
0x1402   :  { %4545 = vpow2.f32 %v3862_v60 }
0x1403   :  { %v2438_v62 = vpop.f32.mrb[72].mxu1 }
0x1404   :  { %2478 = vrot.lane.b32.xlu1 %v2438_v62, %s4638_s20  ;;  %v4312_v27 = vpop.f32.mrb[73].mxu1 }
0x1405   :  { %v2441_v25 = vpop.f32.mrb[74].mxu1 }
0x1406   :  { %v4313_v28 = vpop.f32.mrb[75].mxu1 }
0x140c   :  { %v4546_v23 = vpop.eup %4545 }
0x140d   :  { %v2451_v49 = vadd.f32 1.0, %v4546_v23 }
0x140f   :  { %4547 = vrcp.f32 %v2451_v49  ;;  %v5572_v49 = vsel %vm2444_vm6, 1.0, %v4626_v2 }
0x1419   :  { %v4548_v46 = vpop.eup %4547 }
0x1470   :  { %v2456_v39 = vpop.permute.xlu1 %2455 }
0x1471   :  { %v2458_v38 = vmul.f32 %v4548_v46, %v2456_v39 }
0x1473   :  { %2460 = vrot.lane.b32.xlu0 %v2458_v38, %s4637_s17 }
0x1476   :  { %v2479_v53 = vpop.permute.xlu1 %2478 }
0x1477   :  { %2495 = vrot.lane.b32.xlu0 %v2438_v62, %s4639_s7  ;;  %v2481_v35 = vadd.f32 %v2479_v53, %v2393_v30  ;;  %v2465_v30 = vsub.f32 1.0, %v4548_v46 }
0x1479   :  { %v3863_v5 = vmul.f32 -1.442695, %v2481_v35  ;;  %v2474_v35 = vsub.f32 1.0, %v5572_v49 }
0x147b   :  { %4549 = vpow2.f32 %v3863_v5 }
0x1485   :  { %v4550_v3 = vpop.eup %4549 }
0x1486   :  { %v2489_v52 = vadd.f32 1.0, %v4550_v3  ;;  %v2475_v3 = vmul.f32 %v2474_v35, %v5534_v54 }
0x1488   :  { %4551 = vrcp.f32 %v2489_v52 }
0x1492   :  { %v4552_v27 = vpop.eup %4551 }
0x14e5   :  { %v2461_v45 = vpop.permute.xlu0 %2460 }
0x14e6   :  { %v2463_v55 = vadd.f32 %v2461_v45, %v5065_v41  ;;  %v2471_v41 = vmul.f32 %v4548_v46, %v5534_v54  ;;  %v2482_v46 = vadd.f32 %v2479_v53, %v2395_v4 }
0x14e8   :  { %4553 = vtanh.f32 %v2463_v55 }
0x14e9   :  { %v2496_v25 = vpop.permute.xlu0 %2495 }
0x14ea   :  { %v2498_v28 = vmul.f32 %v4552_v27, %v2496_v25  ;;  %v3864_v25 = vmul.f32 -1.442695, %v2482_v46 }
0x14ec   :  { %2500 = vrot.lane.b32.xlu0 %v2498_v28, %s4637_s17 }
0x14f2   :  { %v4554_v60 = vpop.eup %4553 }
0x14f3   :  { %2467 = vrot.lane.b32.xlu1 %v4554_v60, %s4638_s20 }
0x155e   :  { %v2501_v62 = vpop.permute.xlu0 %2500 }
0x155f   :  { %v2503_v23 = vadd.f32 %v2501_v62, %v2395_v4 }
0x1561   :  { %4555 = vtanh.f32 %v2503_v23 }
0x1562   :  { %4557 = vpow2.f32 %v3864_v25 }
0x1565   :  { %v2468_v39 = vpop.permute.xlu1 %2467 }
0x1566   :  { %v2470_v38 = vmul.f32 %v2468_v39, %v2465_v30 }
0x1568   :  { %v2472_v5 = vadd.f32 %v2471_v41, %v2470_v38 }
0x156a   :  { %v2473_v52 = vmul.f32 %v5572_v49, %v2472_v5  ;;  %v2514_v5 = vmul.f32 %v5548_v1, %v2310_v59 }
0x156b   :  { %v4556_v45 = vpop.eup %4555 }
0x156c   :  { %v5580_v55 = vadd.f32 %v2475_v3, %v2473_v52  ;;  %2507 = vrot.lane.b32.xlu0 %v4556_v45, %s4638_s20  ;;  %v4558_v28 = vpop.eup %4557 }
0x156d   :  { %v2490_v60 = vadd.f32 1.0, %v4558_v28 }
0x156e   :  { %v2516_v27 = vpack.c.bf16 %v5580_v55, %v5580_v55 }
0x156f   :  { %4559 = vrcp.f32 %v2490_v60 }
0x1570   :  { %2518 = vrot.lane.b32.xlu1 %v2516_v27, %s4638_s20 }
0x1579   :  { %v4560_v62 = vpop.eup %4559 }
0x157a   :  { %v2505_v54 = vsub.f32 1.0, %v4560_v62  ;;  %v2511_v30 = vmul.f32 %v4560_v62, %v5548_v1 }
0x15de   :  { %v2508_v23 = vpop.permute.xlu0 %2507 }
0x15df   :  { %v2510_v39 = vmul.f32 %v2508_v23, %v2505_v54 }
0x15e1   :  { %v2512_v41 = vadd.f32 %v2511_v30, %v2510_v39 }
0x15e2   :  { %v2519_v38 = vpop.permute.xlu1 %2518 }
0x15e3   :  { %v2513_v3 = vmul.f32 %v5526_v22, %v2512_v41  ;;  %3865 = vmatmul.mubr.msk.bf16.vlgmr.msra.gmra.mrb[64].mxu0 %vm201_vm5, %v2519_v38 }
0x15e4   :  { %2688 = vmatpush1.bf16.msra.mxu0 %v5325_v37  ;;  %2719 = vmatprep.mubr.bf16.mxu0 %v4625_v0 }
0x15e5   :  { %v5594_v4 = vadd.f32 %v2514_v5, %v2513_v3  ;;  %2689 = vmatprep.subr.bf16.mxu0 %v5331_v47 }
0x15e7   :  { %v2564_v53 = vpack.c.bf16 %v5594_v4, %v5594_v4 }
0x15e8   :  { %2690 = vmatpush1.bf16.msra.mxu0 %v5342_v48 }
0x15e9   :  { %4319 = vmatmul.mubr.msk.bf16.vlgmr.msra.gmra.mrb[76].mxu1 %vm201_vm5, %v2564_v53  ;;  %2851 = vmatprep.subr.bf16.mxu0 %v5318_v31 }
0x15ea   :  { %4323 = vmatpush3.bf16.msra.mxu1 %v5434_v36  ;;  %4326 = vmatprep.mubr.msk.bf16.mxu1 %vm4627_vm0, %v4626_v2 }
0x15eb   :  { %4324 = vmatprep.subr.bf16.mxu1 %v4626_v2 }
0x15ee   :  { %4325 = vmatpush3.bf16.msra.mxu1 %v5445_v63 }
0x15ef   :  { %4330 = vmatprep.subr.bf16.mxu1 %v4626_v2 }
0x16b6   :  { %v2557_v22 = vpop.f32.mrb[64].mxu0 }
0x16b7   :  { %v2611_v59 = vadd.f32 %v2557_v22, %v5100_v40  ;;  %2619 = vrot.lane.b32.xlu1 %v2557_v22, %s4637_s17  ;;  %v2559_v1 = vpop.f32.mrb[65].mxu0 }
0x16b8   :  { %v2561_v52 = vpop.f32.mrb[66].mxu0 }
0x16b9   :  { %v2562_v45 = vpop.f32.mrb[67].mxu0  ;;  %v3868_v60 = vmul.f32 -1.442695, %v2611_v59 }
0x16bb   :  { %4561 = vpow2.f32 %v3868_v60 }
0x16bc   :  { %v2602_v27 = vpop.f32.mrb[76].mxu1 }
0x16bd   :  { %2642 = vrot.lane.b32.xlu0 %v2602_v27, %s4638_s20  ;;  %v4320_v46 = vpop.f32.mrb[77].mxu1 }
0x16be   :  { %v2605_v25 = vpop.f32.mrb[78].mxu1 }
0x16bf   :  { %v4321_v28 = vpop.f32.mrb[79].mxu1 }
0x16c1   :  { %2659 = vrot.lane.b32.xlu0 %v2602_v27, %s4639_s7 }
0x16c5   :  { %v4562_v62 = vpop.eup %4561 }
0x16c6   :  { %v2615_v54 = vadd.f32 1.0, %v4562_v62 }
0x16c8   :  { %4563 = vrcp.f32 %v2615_v54 }
0x16d2   :  { %v4564_v23 = vpop.eup %4563 }
0x1729   :  { %v2620_v30 = vpop.permute.xlu1 %2619 }
0x172a   :  { %v2622_v39 = vmul.f32 %v4564_v23, %v2620_v30  ;;  %v2629_v30 = vsub.f32 1.0, %v4564_v23 }
0x172c   :  { %2624 = vrot.lane.b32.xlu1 %v2622_v39, %s4637_s17  ;;  %v5619_v39 = vsel %vm2608_vm7, 1.0, %v4626_v2 }
0x172f   :  { %v2643_v41 = vpop.permute.xlu0 %2642 }
0x1730   :  { %v2645_v38 = vadd.f32 %v2643_v41, %v2557_v22  ;;  %v2646_v62 = vadd.f32 %v2643_v41, %v2559_v1 }
0x1732   :  { %v3869_v5 = vmul.f32 -1.442695, %v2645_v38  ;;  %v3870_v54 = vmul.f32 -1.442695, %v2646_v62 }
0x1733   :  { %v2660_v45 = vpop.permute.xlu0 %2659 }
0x1734   :  { %4565 = vpow2.f32 %v3869_v5 }
0x173e   :  { %v4566_v3 = vpop.eup %4565 }
0x173f   :  { %v2653_v53 = vadd.f32 1.0, %v4566_v3  ;;  %v2638_v3 = vsub.f32 1.0, %v5619_v39 }
0x1741   :  { %4567 = vrcp.f32 %v2653_v53 }
0x174b   :  { %v4568_v52 = vpop.eup %4567 }
0x174c   :  { %v2662_v27 = vmul.f32 %v4568_v52, %v2660_v45  ;;  %v2639_v52 = vmul.f32 %v2638_v3, %v5580_v55 }
0x174e   :  { %2664 = vrot.lane.b32.xlu1 %v2662_v27, %s4637_s17 }
0x179e   :  { %v2625_v59 = vpop.permute.xlu1 %2624 }
0x179f   :  { %v2627_v46 = vadd.f32 %v2625_v59, %v5100_v40  ;;  %v2635_v40 = vmul.f32 %v4564_v23, %v5580_v55  ;;  %v2678_v55 = vmul.f32 %v5594_v4, %v2474_v35 }
0x17a1   :  { %4569 = vtanh.f32 %v2627_v46 }
0x17ab   :  { %v4570_v25 = vpop.eup %4569 }
0x17ac   :  { %2631 = vrot.lane.b32.xlu0 %v4570_v25, %s4638_s20 }
0x17c0   :  { %v2665_v28 = vpop.permute.xlu1 %2664 }
0x17c1   :  { %v2667_v60 = vadd.f32 %v2665_v28, %v2559_v1 }
0x17c3   :  { %4571 = vtanh.f32 %v2667_v60 }
0x17c4   :  { %4573 = vpow2.f32 %v3870_v54 }
0x17cd   :  { %v4572_v22 = vpop.eup %4571 }
0x17ce   :  { %2671 = vrot.lane.b32.xlu1 %v4572_v22, %s4638_s20  ;;  %v4574_v27 = vpop.eup %4573 }
0x17cf   :  { %v2654_v23 = vadd.f32 1.0, %v4574_v27 }
0x17d1   :  { %4575 = vrcp.f32 %v2654_v23 }
0x17db   :  { %v4576_v59 = vpop.eup %4575 }
0x17dc   :  { %v2669_v46 = vsub.f32 1.0, %v4576_v59  ;;  %v2675_v28 = vmul.f32 %v4576_v59, %v5594_v4 }
0x181e   :  { %v2632_v38 = vpop.permute.xlu0 %2631 }
0x181f   :  { %v2634_v5 = vmul.f32 %v2632_v38, %v2629_v30 }
0x1821   :  { %v2636_v53 = vadd.f32 %v2635_v40, %v2634_v5 }
0x1823   :  { %v2637_v1 = vmul.f32 %v5619_v39, %v2636_v53 }
0x1825   :  { %v5627_v41 = vadd.f32 %v2639_v52, %v2637_v1 }
0x1827   :  { %v2680_v45 = vpack.c.bf16 %v5627_v41, %v5627_v41 }
0x1829   :  { %2682 = vrot.lane.b32.xlu0 %v2680_v45, %s4638_s20 }
0x1840   :  { %v2672_v25 = vpop.permute.xlu1 %2671 }
0x1841   :  { %v2674_v60 = vmul.f32 %v2672_v25, %v2669_v46 }
0x1843   :  { %v2676_v22 = vadd.f32 %v2675_v28, %v2674_v60 }
0x1845   :  { %v2677_v62 = vmul.f32 %v5572_v49, %v2676_v22 }
0x1847   :  { %v5637_v54 = vadd.f32 %v2678_v55, %v2677_v62 }
0x1849   :  { %v2728_v30 = vpack.c.bf16 %v5637_v54, %v5637_v54 }
0x184b   :  { %4327 = vmatmul.mubr.msk.bf16.vlgmr.msra.gmra.mrb[80].mxu1 %vm201_vm5, %v2728_v30 }
0x184c   :  { %4331 = vmatpush3.bf16.msra.mxu1 %v5434_v36  ;;  %4334 = vmatprep.mubr.msk.bf16.mxu1 %vm4627_vm0, %v4626_v2 }
0x184d   :  { %4332 = vmatprep.subr.bf16.mxu1 %v4626_v2 }
0x1850   :  { %4333 = vmatpush3.bf16.msra.mxu1 %v5445_v63 }
0x1851   :  { %4338 = vmatprep.subr.bf16.mxu1 %v4626_v2 }
0x189b   :  { %v2683_v35 = vpop.permute.xlu0 %2682 }
0x189c   :  { %3871 = vmatmul.mubr.msk.bf16.vlgmr.msra.gmra.mrb[68].mxu0 %vm201_vm5, %v2683_v35 }
0x189d   :  { %2852 = vmatpush1.bf16.msra.mxu0 %v5325_v37  ;;  %2883 = vmatprep.mubr.bf16.mxu0 %v4625_v0 }
0x189e   :  { %2853 = vmatprep.subr.bf16.mxu0 %v5331_v47 }
0x18a1   :  { %2854 = vmatpush1.bf16.msra.mxu0 %v5342_v48 }
0x18a2   :  { %3015 = vmatprep.subr.bf16.mxu0 %v5318_v31 }
0x191e   :  { %v2766_v49 = vpop.f32.mrb[80].mxu1 }
0x191f   :  { %2806 = vrot.lane.b32.xlu0 %v2766_v49, %s4638_s20  ;;  %v4328_v4 = vpop.f32.mrb[81].mxu1 }
0x1920   :  { %v2769_v38 = vpop.f32.mrb[82].mxu1 }
0x1921   :  { %v4329_v40 = vpop.f32.mrb[83].mxu1 }
0x196f   :  { %v2721_v5 = vpop.f32.mrb[68].mxu0 }
0x1970   :  { %v2775_v53 = vadd.f32 %v2721_v5, %v5131_v61  ;;  %2783 = vrot.lane.b32.xlu1 %v2721_v5, %s4637_s17  ;;  %v2723_v37 = vpop.f32.mrb[69].mxu0 }
0x1971   :  { %v2725_v52 = vpop.f32.mrb[70].mxu0 }
0x1972   :  { %v2726_v1 = vpop.f32.mrb[71].mxu0  ;;  %v3874_v48 = vmul.f32 -1.442695, %v2775_v53 }
0x1974   :  { %2823 = vrot.lane.b32.xlu1 %v2766_v49, %s4639_s7  ;;  %4577 = vpow2.f32 %v3874_v48 }
0x197e   :  { %v4578_v27 = vpop.eup %4577 }
0x197f   :  { %v2779_v23 = vadd.f32 1.0, %v4578_v27 }
0x1991   :  { %v2807_v47 = vpop.permute.xlu0 %2806 }
0x1992   :  { %v2809_v45 = vadd.f32 %v2807_v47, %v2721_v5  ;;  %v2810_v5 = vadd.f32 %v2807_v47, %v2723_v37 }
0x1994   :  { %v3875_v31 = vmul.f32 -1.442695, %v2809_v45  ;;  %v3876_v53 = vmul.f32 -1.442695, %v2810_v5  ;;  %v5665_v45 = vsel %vm2772_vm8, 1.0, %v4626_v2 }
0x1996   :  { %4579 = vpow2.f32 %v3875_v31 }
0x1997   :  { %4581 = vrcp.f32 %v2779_v23 }
0x19a0   :  { %v4580_v59 = vpop.eup %4579 }
0x19a1   :  { %v2817_v46 = vadd.f32 1.0, %v4580_v59  ;;  %v4582_v25 = vpop.eup %4581  ;;  %v2802_v59 = vsub.f32 1.0, %v5665_v45 }
0x19a2   :  { %v2793_v48 = vsub.f32 1.0, %v4582_v25  ;;  %v2799_v27 = vmul.f32 %v4582_v25, %v5627_v41 }
0x19a3   :  { %4583 = vrcp.f32 %v2817_v46 }
0x19ad   :  { %v4584_v22 = vpop.eup %4583 }
0x19e2   :  { %v2784_v28 = vpop.permute.xlu1 %2783 }
0x19e3   :  { %v2786_v60 = vmul.f32 %v4582_v25, %v2784_v28  ;;  %v2803_v28 = vmul.f32 %v2802_v59, %v5627_v41  ;;  %v2842_v25 = vmul.f32 %v5637_v54, %v2638_v3  ;;  %v4621_v3 = vld [vmem:[%s6052_s6] ss:$8 sps:$4 sm:$0xff]  }
0x19e5   :  { %2788 = vrot.lane.b32.xlu0 %v2786_v60, %s4637_s17 }
0x19e6   :  { %v2824_v55 = vpop.permute.xlu1 %2823 }
0x19e7   :  { %v2826_v62 = vmul.f32 %v4584_v22, %v2824_v55 }
0x19e9   :  { %2828 = vrot.lane.b32.xlu1 %v2826_v62, %s4637_s17 }
0x1a57   :  { %v2789_v30 = vpop.permute.xlu0 %2788 }
0x1a58   :  { %v2791_v35 = vadd.f32 %v2789_v30, %v5131_v61 }
0x1a5a   :  { %4585 = vtanh.f32 %v2791_v35 }
0x1a5b   :  { %v2829_v49 = vpop.permute.xlu1 %2828 }
0x1a5c   :  { %v2831_v4 = vadd.f32 %v2829_v49, %v2723_v37 }
0x1a5e   :  { %4587 = vtanh.f32 %v2831_v4 }
0x1a5f   :  { %4589 = vpow2.f32 %v3876_v53 }
0x1a64   :  { %v4586_v38 = vpop.eup %4585 }
0x1a65   :  { %2795 = vrot.lane.b32.xlu0 %v4586_v38, %s4638_s20 }
0x1a68   :  { %v4588_v40 = vpop.eup %4587 }
0x1a69   :  { %2835 = vrot.lane.b32.xlu1 %v4588_v40, %s4638_s20  ;;  %v4590_v52 = vpop.eup %4589 }
0x1a6a   :  { %v2818_v1 = vadd.f32 1.0, %v4590_v52 }
0x1a6c   :  { %4591 = vrcp.f32 %v2818_v1 }
0x1a76   :  { %v4592_v61 = vpop.eup %4591 }
0x1a77   :  { %v2833_v37 = vsub.f32 1.0, %v4592_v61  ;;  %v2839_v22 = vmul.f32 %v4592_v61, %v5637_v54  ;;  %v4623_v54 = vld [vmem:[%s6052_s6 + $0x10] ss:$8 sps:$4 sm:$0xff]  }
0x1ad7   :  { %v2796_v31 = vpop.permute.xlu0 %2795 }
0x1ad8   :  { %v2798_v23 = vmul.f32 %v2796_v31, %v2793_v48 }
0x1ada   :  { %v2800_v46 = vadd.f32 %v2799_v27, %v2798_v23 }
0x1adb   :  { %v2836_v47 = vpop.permute.xlu1 %2835 }
0x1adc   :  { %v2801_v60 = vmul.f32 %v5665_v45, %v2800_v46  ;;  %v2838_v55 = vmul.f32 %v2836_v47, %v2833_v37 }
0x1ade   :  { %v5674_v62 = vadd.f32 %v2803_v28, %v2801_v60  ;;  %v2840_v30 = vadd.f32 %v2839_v22, %v2838_v55 }
0x1ae0   :  { %v2841_v35 = vmul.f32 %v5619_v39, %v2840_v30  ;;  %v2844_v49 = vpack.c.bf16 %v5674_v62, %v5674_v62 }
0x1ae2   :  { %v5682_v4 = vadd.f32 %v2842_v25, %v2841_v35  ;;  %2846 = vrot.lane.b32.xlu0 %v2844_v49, %s4638_s20 }
0x1ae4   :  { %v2892_v41 = vpack.c.bf16 %v5682_v4, %v5682_v4 }
0x1ae6   :  { %4335 = vmatmul.mubr.msk.bf16.vlgmr.msra.gmra.mrb[84].mxu1 %vm201_vm5, %v2892_v41 }
0x1ae7   :  { %4339 = vmatpush3.bf16.msra.mxu1 %v5434_v36  ;;  %4342 = vmatprep.mubr.msk.bf16.mxu1 %vm4627_vm0, %v4626_v2  ;;  %v4622_v36 = vld [vmem:[%s6052_s6 + $0x14] ss:$8 sps:$4 sm:$0xff]   ;;  %vm2936_vm0 = vcmp.gt.s32.totalorder %v4901_v50, 7 }
0x1ae8   :  { %4340 = vmatprep.subr.bf16.mxu1 %v4626_v2 }
0x1aeb   :  { %4341 = vmatpush3.bf16.msra.mxu1 %v5445_v63 }
0x1b54   :  { %v2847_v39 = vpop.permute.xlu0 %2846 }
0x1b55   :  { %3877 = vmatmul.mubr.msk.bf16.vlgmr.msra.gmra.mrb[72].mxu0 %vm201_vm5, %v2847_v39 }
0x1b56   :  { %3016 = vmatpush1.bf16.msra.mxu0 %v4621_v3  ;;  %3047 = vmatprep.mubr.bf16.mxu0 %v4625_v0 }
0x1b57   :  { %3017 = vmatprep.subr.bf16.mxu0 %v4622_v36 }
0x1b5a   :  { %3018 = vmatpush1.bf16.msra.mxu0 %v4623_v54 }
0x1bb9   :  { %v2930_v63 = vpop.f32.mrb[84].mxu1 }
0x1bba   :  { %2970 = vrot.lane.b32.xlu1 %v2930_v63, %s4638_s20  ;;  %v4336_v38 = vpop.f32.mrb[85].mxu1 }
0x1bbb   :  { %v2933_v40 = vpop.f32.mrb[86].mxu1 }
0x1bbc   :  { %v4337_v5 = vpop.f32.mrb[87].mxu1 }
0x1bbe   :  { %2987 = vrot.lane.b32.xlu1 %v2930_v63, %s4639_s7 }
0x1c28   :  { %v2885_v53 = vpop.f32.mrb[72].mxu0 }
0x1c29   :  { %v2939_v52 = vadd.f32 %v2885_v53, %v5168_v6  ;;  %2947 = vrot.lane.b32.xlu0 %v2885_v53, %s4637_s17  ;;  %v2887_v1 = vpop.f32.mrb[73].mxu0 }
0x1c2a   :  { %v2889_v48 = vpop.f32.mrb[74].mxu0 }
0x1c2b   :  { %v2890_v61 = vpop.f32.mrb[75].mxu0  ;;  %v3880_v22 = vmul.f32 -1.442695, %v2939_v52 }
0x1c2c   :  { %v2971_v31 = vpop.permute.xlu1 %2970 }
0x1c2d   :  { %v2973_v27 = vadd.f32 %v2971_v31, %v2885_v53  ;;  %v2974_v63 = vadd.f32 %v2971_v31, %v2887_v1 }
0x1c2f   :  { %v3881_v23 = vmul.f32 -1.442695, %v2973_v27  ;;  %v3882_v38 = vmul.f32 -1.442695, %v2974_v63 }
0x1c30   :  { %v2988_v28 = vpop.permute.xlu1 %2987 }
0x1c31   :  { %4593 = vpow2.f32 %v3881_v23 }
0x1c3b   :  { %v4594_v46 = vpop.eup %4593 }
0x1c3c   :  { %v2981_v37 = vadd.f32 1.0, %v4594_v46 }
0x1c3e   :  { %4595 = vrcp.f32 %v2981_v37 }
0x1c3f   :  { %4597 = vpow2.f32 %v3880_v22 }
0x1c48   :  { %v4596_v47 = vpop.eup %4595 }
0x1c49   :  { %v2990_v60 = vmul.f32 %v4596_v47, %v2988_v28  ;;  %v4598_v55 = vpop.eup %4597  ;;  %v3879_v28 = vsel %vm2936_vm0, 1.0, %v4626_v2 }
0x1c4a   :  { %v2943_v30 = vadd.f32 1.0, %v4598_v55 }
0x1c4b   :  { %2992 = vrot.lane.b32.xlu1 %v2990_v60, %s4637_s17 }
0x1c4c   :  { %4599 = vrcp.f32 %v2943_v30 }
0x1c56   :  { %v4600_v25 = vpop.eup %4599 }
0x1c57   :  { %v2957_v47 = vsub.f32 1.0, %v4600_v25  ;;  %v2963_v22 = vmul.f32 %v4600_v25, %v5674_v62 }
0x1c9b   :  { %v2948_v35 = vpop.permute.xlu0 %2947 }
0x1c9c   :  { %v2950_v49 = vmul.f32 %v4600_v25, %v2948_v35  ;;  %v2966_v35 = vsub.f32 1.0, %v3879_v28 }
0x1c9e   :  { %2952 = vrot.lane.b32.xlu0 %v2950_v49, %s4637_s17 }
0x1cbd   :  { %v2993_v41 = vpop.permute.xlu1 %2992 }
0x1cbe   :  { %v2995_v39 = vadd.f32 %v2993_v41, %v2887_v1 }
0x1cc0   :  { %4601 = vtanh.f32 %v2995_v39 }
0x1cca   :  { %v4602_v3 = vpop.eup %4601 }
0x1ccb   :  { %2999 = vrot.lane.b32.xlu1 %v4602_v3, %s4638_s20 }
0x1d10   :  { %v2953_v36 = vpop.permute.xlu0 %2952 }
0x1d11   :  { %v2955_v54 = vadd.f32 %v2953_v36, %v5168_v6  ;;  %v3006_v6 = vmul.f32 %v5682_v4, %v2802_v59  ;;  %v2967_v59 = vmul.f32 %v2966_v35, %v5674_v62 }
0x1d13   :  { %4603 = vtanh.f32 %v2955_v54 }
0x1d14   :  { %4605 = vpow2.f32 %v3882_v38 }
0x1d1d   :  { %v4604_v40 = vpop.eup %4603 }
0x1d1e   :  { %2959 = vrot.lane.b32.xlu0 %v4604_v40, %s4638_s20  ;;  %v4606_v5 = vpop.eup %4605 }
0x1d1f   :  { %v2982_v53 = vadd.f32 1.0, %v4606_v5 }
0x1d21   :  { %4607 = vrcp.f32 %v2982_v53 }
0x1d2b   :  { %v4608_v52 = vpop.eup %4607 }
0x1d2c   :  { %v2997_v48 = vsub.f32 1.0, %v4608_v52  ;;  %v3003_v27 = vmul.f32 %v4608_v52, %v5682_v4 }
0x1d3d   :  { %v3000_v61 = vpop.permute.xlu1 %2999 }
0x1d3e   :  { %v3002_v23 = vmul.f32 %v3000_v61, %v2997_v48 }
0x1d40   :  { %v3004_v46 = vadd.f32 %v3003_v27, %v3002_v23 }
0x1d42   :  { %v3005_v1 = vmul.f32 %v5665_v45, %v3004_v46 }
0x1d44   :  { %v3007_v31 = vadd.f32 %v3006_v6, %v3005_v1 }
0x1d46   :  { %v3056_v37 = vpack.c.bf16 %v3007_v31, %v3007_v31 }
0x1d48   :  { %4343 = vmatmul.mubr.msk.bf16.vlgmr.msra.gmra.mrb[88].mxu1 %vm201_vm5, %v3056_v37 }
0x1d90   :  { %v2960_v60 = vpop.permute.xlu0 %2959 }
0x1d91   :  { %v2962_v55 = vmul.f32 %v2960_v60, %v2957_v47 }
0x1d93   :  { %v2964_v30 = vadd.f32 %v2963_v22, %v2962_v55 }
0x1d95   :  { %v2965_v49 = vmul.f32 %v3879_v28, %v2964_v30 }
0x1d97   :  { %v2968_v4 = vadd.f32 %v2967_v59, %v2965_v49 }
0x1d99   :  { %v3008_v45 = vpack.c.bf16 %v2968_v4, %v2968_v4  ;;  %v3137_v4 = vmul.f32 %v3007_v31, %v2966_v35  ;;  %v4643_v35 = vmov 9  }
0x1d9b   :  { %3010 = vrot.lane.b32.xlu0 %v3008_v45, %s4638_s20 }
0x1e0d   :  { %v3011_v41 = vpop.permute.xlu0 %3010 }
0x1e0e   :  { %3883 = vmatmul.mubr.msk.bf16.vlgmr.msra.gmra.mrb[76].mxu0 %vm201_vm5, %v3011_v41  ;;  %vm3719_vm5 = vcmask 257024  }
0x1e1b   :  { %v3094_v50 = vpop.f32.mrb[88].mxu1 }
0x1e1c   :  { %3118 = vrot.lane.b32.xlu0 %v3094_v50, %s4639_s7  ;;  %3101 = vrot.lane.b32.xlu1 %v3094_v50, %s4638_s20  ;;  %v4344_v2 = vpop.f32.mrb[89].mxu1  ;;  %v4640_v50 = vmov 10  }
0x1e1d   :  { %v3097_v25 = vpop.f32.mrb[90].mxu1  ;;  %v4644_v2 = vmov 22  }
0x1e1e   :  { %v4345_v39 = vpop.f32.mrb[91].mxu1  ;;  %v4645_v25 = vmov 11  }
0x1e1f   :  { %v4646_v39 = vmov 26  }
0x1e8e   :  { %v3102_v3 = vpop.permute.xlu1 %3101  ;;  %v3119_v48 = vpop.permute.xlu0 %3118 }
0x1ee1   :  { %v3049_v36 = vpop.f32.mrb[76].mxu0 }
0x1ee2   :  { %v3104_v54 = vadd.f32 %v3102_v3, %v3049_v36  ;;  %v3051_v63 = vpop.f32.mrb[77].mxu0  ;;  %v4648_v36 = vmov 15  }
0x1ee3   :  { %v3053_v62 = vpop.f32.mrb[78].mxu0  ;;  %v3105_v6 = vadd.f32 %v3102_v3, %v3051_v63  ;;  %v4647_v3 = vmov 13  }
0x1ee4   :  { %v3885_v38 = vmul.f32 -1.442695, %v3104_v54  ;;  %v3054_v40 = vpop.f32.mrb[79].mxu0  ;;  %v4649_v54 = vmov 17   ;;  %v4651_v62 = vmov 21  }
0x1ee5   :  { %v3886_v1 = vmul.f32 -1.442695, %v3105_v6  ;;  %v4653_v40 = vmov 25  }
0x1ee6   :  { %4609 = vpow2.f32 %v3885_v38  ;;  %v4652_v38 = vmov 23  }
0x1ef0   :  { %v4610_v5 = vpop.eup %4609 }
0x1ef1   :  { %v3112_v53 = vadd.f32 1.0, %v4610_v5  ;;  %v4654_v5 = vmov 27  }
0x1ef3   :  { %4611 = vrcp.f32 %v3112_v53  ;;  %v4656_v53 = vmov 30  }
0x1efd   :  { %v4612_v52 = vpop.eup %4611 }
0x1efe   :  { %v3121_v61 = vmul.f32 %v4612_v52, %v3119_v48  ;;  %v4657_v52 = vmov 31   ;;  %v4658_v48 = vmov 8  }
0x1f00   :  { %3123 = vrot.lane.b32.xlu1 %v3121_v61, %s4637_s17  ;;  %v6066_v61 = vsub.s32 0, %v5357_v51 }
0x1f72   :  { %v3124_v27 = vpop.permute.xlu1 %3123 }
0x1f73   :  { %v3126_v23 = vadd.f32 %v3124_v27, %v3051_v63  ;;  %v4650_v63 = vmov 19   ;;  %v5787_v27 = vld [vmem:[%s6054_s11] sm:$0xff] }
0x1f75   :  { %4613 = vtanh.f32 %v3126_v23  ;;  %v1276_v23 = vrot.slane %v5787_v27, %v6066_v61 }
0x1f76   :  { %4615 = vpow2.f32 %v3886_v1 }
0x1f7f   :  { %v4614_v46 = vpop.eup %4613 }
0x1f80   :  { %3130 = vrot.lane.b32.xlu0 %v4614_v46, %s4638_s20  ;;  %v4616_v37 = vpop.eup %4615  ;;  %v5793_v46 = vadd.f32 %v5365_v56, %v1276_v23  ;;  %v6067_v23 = vmov 12  }
0x1f81   :  { %v3113_v47 = vadd.f32 1.0, %v4616_v37 }
0x1f83   :  { %4617 = vrcp.f32 %v3113_v47  ;;  %v1280_v47 = vrot.slane %v5787_v27, %v1279_v32 }
0x1f85   :  { %v5805_v56 = vadd.f32 %v5369_v58, %v1280_v47 }
0x1f8d   :  { %v4618_v60 = vpop.eup %4617 }
0x1f8e   :  { %v3128_v22 = vsub.f32 1.0, %v4618_v60  ;;  %v3134_v30 = vmul.f32 %v4618_v60, %v3007_v31  ;;  %v4641_v31 = vmov 14  }
0x1ff2   :  { %v3131_v55 = vpop.permute.xlu0 %3130 }
0x1ff3   :  { %v3133_v49 = vmul.f32 %v3131_v55, %v3128_v22 }
0x1ff5   :  { %v3135_v59 = vadd.f32 %v3134_v30, %v3133_v49 }
0x1ff7   :  { %v3136_v45 = vmul.f32 %v3879_v28, %v3135_v59  ;;  %v4642_v28 = vmov 18  }
0x1ff9   :  { %v5729_v41 = vadd.f32 %v3137_v4, %v3136_v45  ;;  %v1284_v4 = vrot.slane %v5787_v27, %v1283_v20 }
0x1ffb   :  { %3157 = vperm.xlu0 %4395, %v5729_v41   ;;  %3147 = vperm.xlu1 %4394, %v5729_v41  }
0x1fff   :  { %4398 = vset.pattern.permute.xlu0 %v4633_v15  ;;  %4396 = vset.pattern.permute.xlu1 %v4630_v8 }
0x2000   :  { %3193 = vperm.xlu0 %4398, %v5729_v41   ;;  %3167 = vperm.xlu1 %4396, %v5729_v41  }
0x2004   :  { %4401 = vset.pattern.permute.xlu0 %v4640_v50  ;;  %4397 = vset.pattern.permute.xlu1 %v4631_v10 }
0x2005   :  { %3229 = vperm.xlu0 %4401, %v5729_v41   ;;  %3183 = vperm.xlu1 %4397, %v5729_v41  }
0x2009   :  { %4404 = vset.pattern.permute.xlu0 %v4641_v31  ;;  %4399 = vset.pattern.permute.xlu1 %v4634_v17 }
0x200a   :  { %3265 = vperm.xlu0 %4404, %v5729_v41   ;;  %3203 = vperm.xlu1 %4399, %v5729_v41  }
0x200e   :  { %4407 = vset.pattern.permute.xlu0 %v4642_v28  ;;  %4400 = vset.pattern.permute.xlu1 %v4643_v35 }
0x200f   :  { %3301 = vperm.xlu0 %4407, %v5729_v41   ;;  %3219 = vperm.xlu1 %4400, %v5729_v41  }
0x2013   :  { %4410 = vset.pattern.permute.xlu0 %v4644_v2  ;;  %4402 = vset.pattern.permute.xlu1 %v4645_v25 }
0x2014   :  { %3337 = vperm.xlu0 %4410, %v5729_v41   ;;  %3239 = vperm.xlu1 %4402, %v5729_v41  }
0x2018   :  { %4413 = vset.pattern.permute.xlu0 %v4646_v39  ;;  %4403 = vset.pattern.permute.xlu1 %v4647_v3 }
0x2019   :  { %3373 = vperm.xlu0 %4413, %v5729_v41   ;;  %3255 = vperm.xlu1 %4403, %v5729_v41  }
0x201d   :  { %4416 = vset.pattern.permute.xlu0 %v4625_v0  ;;  %4405 = vset.pattern.permute.xlu1 %v4648_v36 }
0x201e   :  { %3141 = vperm.xlu0 %4416, %v5729_v41   ;;  %3275 = vperm.xlu1 %4405, %v5729_v41  }
0x2022   :  { %4419 = vset.pattern.permute.xlu0 %v6068_v11  ;;  %4406 = vset.pattern.permute.xlu1 %v4649_v54 }
0x2023   :  { %3177 = vperm.xlu0 %4419, %v5729_v41   ;;  %3291 = vperm.xlu1 %4406, %v5729_v41  }
0x2027   :  { %4408 = vset.pattern.permute.xlu1 %v4650_v63  ;;  %4426 = vset.pattern.permute.xlu0 %v4629_v7  ;;  %v4655_v7 = vmov 29  }
0x2028   :  { %3311 = vperm.xlu1 %4408, %v5729_v41  }
0x202c   :  { %4409 = vset.pattern.permute.xlu1 %v4651_v62 }
0x202d   :  { %3327 = vperm.xlu1 %4409, %v5729_v41  }
0x2031   :  { %4411 = vset.pattern.permute.xlu1 %v4652_v38 }
0x2032   :  { %3347 = vperm.xlu1 %4411, %v5729_v41  }
0x2036   :  { %4412 = vset.pattern.permute.xlu1 %v4653_v40 }
0x2037   :  { %3363 = vperm.xlu1 %4412, %v5729_v41  }
0x203b   :  { %4414 = vset.pattern.permute.xlu1 %v4654_v5 }
0x203c   :  { %3383 = vperm.xlu1 %4414, %v5729_v41  }
0x2040   :  { %4415 = vset.pattern.permute.xlu1 %v4655_v7 }
0x2041   :  { %3399 = vperm.xlu1 %4415, %v5729_v41  }
0x2045   :  { %4417 = vset.pattern.permute.xlu1 %v4656_v53 }
0x2046   :  { %3409 = vperm.xlu1 %4417, %v5729_v41  }
0x204a   :  { %4418 = vset.pattern.permute.xlu1 %v4657_v52 }
0x204b   :  { %3419 = vperm.xlu1 %4418, %v5729_v41  }
0x204f   :  { %4420 = vset.pattern.permute.xlu1 %v4658_v48 }
0x207a   :  { %v3148_v6 = vpop.permute.xlu1 %3147  ;;  %v3158_v37 = vpop.permute.xlu0 %3157 }
0x207b   :  { %v3150_v1 = vmul.f32 %v3148_v6, %v5793_v46  ;;  %v3160_v60 = vmul.f32 %v3158_v37, %v5793_v46 }
0x207d   :  { %3152 = vrot.lane.b32.xlu1 %v3150_v1, %s4638_s20  ;;  %v5819_v1 = vadd.f32 %v5367_v26, %v1284_v4 }
0x207f   :  { %v3168_v22 = vpop.permute.xlu1 %3167  ;;  %v3194_v30 = vpop.permute.xlu0 %3193 }
0x2080   :  { %v3170_v55 = vmul.f32 %v3168_v22, %v5793_v46  ;;  %v3196_v32 = vmul.f32 %v3194_v30, %v5805_v56  ;;  %v6065_v22 = vmov 16  }
0x2081   :  { %3162 = vrot.lane.b32.xlu1 %v3160_v60, %s4637_s17  ;;  %v1288_v60 = vrot.slane %v5787_v27, %v1287_v33 }
0x2082   :  { %3172 = vrot.lane.b32.xlu0 %v3170_v55, %s4639_s7 }
0x2084   :  { %v3184_v49 = vpop.permute.xlu1 %3183  ;;  %v3230_v6 = vpop.permute.xlu0 %3229 }
0x2085   :  { %v3186_v59 = vmul.f32 %v3184_v49, %v5805_v56  ;;  %3213 = vperm.xlu1 %4420, %v5729_v41   ;;  %v3232_v47 = vmul.f32 %v3230_v6, %v5819_v1  ;;  %v5832_v49 = vadd.f32 %v5371_v57, %v1288_v60 }
0x2087   :  { %3188 = vrot.lane.b32.xlu0 %v3186_v59, %s4638_s20 }
0x2089   :  { %3198 = vrot.lane.b32.xlu1 %v3196_v32, %s4637_s17  ;;  %v3204_v45 = vpop.permute.xlu1 %3203  ;;  %v3266_v55 = vpop.permute.xlu0 %3265  ;;  %v1292_v32 = vrot.slane %v5787_v27, %v1291_v44 }
0x208a   :  { %v3206_v58 = vmul.f32 %v3204_v45, %v5805_v56  ;;  %4421 = vset.pattern.permute.xlu1 %v6067_v23  ;;  %v3268_v33 = vmul.f32 %v3266_v55, %v5832_v49  ;;  %v6064_v45 = vmov 20  }
0x208c   :  { %3208 = vrot.lane.b32.xlu0 %v3206_v58, %s4639_s7  ;;  %v5845_v58 = vadd.f32 %v5373_v13, %v1292_v32 }
0x208d   :  { %3249 = vperm.xlu1 %4421, %v5729_v41  }
0x208e   :  { %v3220_v37 = vpop.permute.xlu1 %3219  ;;  %v3302_v57 = vpop.permute.xlu0 %3301 }
0x208f   :  { %v3222_v20 = vmul.f32 %v3220_v37, %v5819_v1  ;;  %v3304_v44 = vmul.f32 %v3302_v57, %v5845_v58 }
0x2091   :  { %3234 = vrot.lane.b32.xlu1 %v3232_v47, %s4637_s17  ;;  %3224 = vrot.lane.b32.xlu0 %v3222_v20, %s4638_s20  ;;  %v6071_v47 = vsub.s32 5, %v5357_v51 }
0x2092   :  { %4422 = vset.pattern.permute.xlu1 %v6065_v22 }
0x2093   :  { %v3240_v26 = vpop.permute.xlu1 %3239  ;;  %v1296_v20 = vrot.slane %v5787_v27, %v6071_v47  ;;  %v3338_v55 = vpop.permute.xlu0 %3337 }
0x2094   :  { %v3242_v30 = vmul.f32 %v3240_v26, %v5819_v1  ;;  %v6063_v26 = vmov 24  }
0x2095   :  { %3285 = vperm.xlu1 %4422, %v5729_v41  }
0x2096   :  { %3244 = vrot.lane.b32.xlu0 %v3242_v30, %s4639_s7  ;;  %v5858_v30 = vadd.f32 %v5377_v19, %v1296_v20 }
0x2098   :  { %v3256_v59 = vpop.permute.xlu1 %3255  ;;  %v3374_v19 = vpop.permute.xlu0 %3373 }
0x2099   :  { %v3258_v4 = vmul.f32 %v3256_v59, %v5832_v49  ;;  %3270 = vrot.lane.b32.xlu1 %v3268_v33, %s4637_s17  ;;  %v3340_v33 = vmul.f32 %v3338_v55, %v5858_v30  ;;  %v6073_v55 = vmov 2  }
0x209a   :  { %4423 = vset.pattern.permute.xlu1 %v6064_v45 }
0x209b   :  { %3260 = vrot.lane.b32.xlu0 %v3258_v4, %s4638_s20  ;;  %v6072_v4 = vsub.s32 6, %v5357_v51 }
0x209d   :  { %3321 = vperm.xlu1 %4423, %v5729_v41   ;;  %v3276_v6 = vpop.permute.xlu1 %3275  ;;  %v1300_v57 = vrot.slane %v5787_v27, %v6072_v4 }
0x209e   :  { %v3278_v37 = vmul.f32 %v3276_v6, %v5832_v49  ;;  %v6062_v6 = vmov 28  }
0x20a0   :  { %3280 = vrot.lane.b32.xlu0 %v3278_v37, %s4639_s7 }
0x20a1   :  { %3306 = vrot.lane.b32.xlu1 %v3304_v44, %s4637_s17  ;;  %v5871_v44 = vadd.f32 %v5375_v42, %v1300_v57 }
0x20a2   :  { %v3292_v60 = vpop.permute.xlu1 %3291  ;;  %4424 = vset.pattern.permute.xlu1 %v6063_v26 }
0x20a3   :  { %v3294_v13 = vmul.f32 %v3292_v60, %v5845_v58  ;;  %v3376_v20 = vmul.f32 %v3374_v19, %v5871_v44 }
0x20a5   :  { %3357 = vperm.xlu1 %4424, %v5729_v41   ;;  %3296 = vrot.lane.b32.xlu0 %v3294_v13, %s4638_s20 }
0x20a7   :  { %v3312_v59 = vpop.permute.xlu1 %3311 }
0x20a8   :  { %v3314_v32 = vmul.f32 %v3312_v59, %v5845_v58 }
0x20a9   :  { %3342 = vrot.lane.b32.xlu1 %v3340_v33, %s4637_s17 }
0x20aa   :  { %3316 = vrot.lane.b32.xlu0 %v3314_v32, %s4639_s7  ;;  %4425 = vset.pattern.permute.xlu1 %v6062_v6 }
0x20ac   :  { %v3328_v37 = vpop.permute.xlu1 %3327 }
0x20ad   :  { %v3330_v47 = vmul.f32 %v3328_v37, %v5858_v30  ;;  %3393 = vperm.xlu1 %4425, %v5729_v41   ;;  %v6074_v41 = vsub.s32 7, %v5357_v51 }
0x20af   :  { %3332 = vrot.lane.b32.xlu0 %v3330_v47, %s4638_s20  ;;  %v1304_v59 = vrot.slane %v5787_v27, %v6074_v41 }
0x20b1   :  { %3378 = vrot.lane.b32.xlu1 %v3376_v20, %s4637_s17  ;;  %v3348_v60 = vpop.permute.xlu1 %3347  ;;  %v5889_v57 = vadd.f32 %v5379_v21, %v1304_v59 }
0x20b2   :  { %v3350_v13 = vmul.f32 %v3348_v60, %v5858_v30  ;;  %4427 = vset.pattern.permute.xlu1 %v6073_v55 }
0x20b4   :  { %3352 = vrot.lane.b32.xlu0 %v3350_v13, %s4639_s7  ;;  %v3142_v13 = vpop.permute.xlu0 %3141 }
0x20b5   :  { %v3144_v21 = vmul.f32 %v3142_v13, %v5793_v46 }
0x20b6   :  { %v3364_v33 = vpop.permute.xlu1 %3363 }
0x20b7   :  { %v3366_v42 = vmul.f32 %v3364_v33, %v5871_v44 }
0x20b8   :  { %v3178_v33 = vpop.permute.xlu0 %3177 }
0x20b9   :  { %3368 = vrot.lane.b32.xlu0 %v3366_v42, %s4638_s20 }
0x20bb   :  { %v3384_v32 = vpop.permute.xlu1 %3383 }
0x20bc   :  { %v3386_v4 = vmul.f32 %v3384_v32, %v5871_v44 }
0x20be   :  { %3388 = vrot.lane.b32.xlu0 %v3386_v4, %s4639_s7  ;;  %v3180_v4 = vmul.f32 %v3178_v33, %v5805_v56 }
0x20c0   :  { %v3400_v19 = vpop.permute.xlu1 %3399 }
0x20c1   :  { %v3402_v37 = vmul.f32 %v3400_v19, %v5889_v57 }
0x20c3   :  { %3404 = vrot.lane.b32.xlu1 %v3402_v37, %s4638_s20 }
0x20c5   :  { %v3410_v47 = vpop.permute.xlu1 %3409 }
0x20c6   :  { %v3412_v20 = vmul.f32 %v3410_v47, %v5889_v57 }
0x20c8   :  { %3414 = vrot.lane.b32.xlu0 %v3412_v20, %s4637_s17 }
0x20ca   :  { %v3420_v60 = vpop.permute.xlu1 %3419 }
0x20cb   :  { %v3422_v27 = vmul.f32 %v3420_v60, %v5889_v57 }
0x20cd   :  { %3424 = vrot.lane.b32.xlu1 %v3422_v27, %s4639_s7 }
0x20ef   :  { %v3153_v55 = vpop.permute.xlu1 %3152 }
0x20f0   :  { %v3155_v42 = vadd.f32 %v3153_v55, %v3144_v21 }
0x20f3   :  { %v3163_v41 = vpop.permute.xlu1 %3162 }
0x20f4   :  { %v3165_v59 = vadd.f32 %v3163_v41, %v3155_v42  ;;  %v3173_v32 = vpop.permute.xlu0 %3172 }
0x20f6   :  { %v3175_v19 = vadd.f32 %v3173_v32, %v3165_v59 }
0x20f8   :  { %v3181_v37 = vadd.f32 %v3180_v4, %v3175_v19 }
0x20f9   :  { %v3189_v47 = vpop.permute.xlu0 %3188 }
0x20fa   :  { %v3191_v60 = vadd.f32 %v3189_v47, %v3181_v37 }
0x20fe   :  { %v3209_v20 = vpop.permute.xlu0 %3208 }
0x2103   :  { %v3225_v6 = vpop.permute.xlu0 %3224 }
0x2104   :  { %v3214_v26 = vpop.permute.xlu1 %3213 }
0x2105   :  { %v3216_v61 = vmul.f32 %v3214_v26, %v5819_v1 }
0x2108   :  { %v3245_v45 = vpop.permute.xlu0 %3244  ;;  %v3199_v27 = vpop.permute.xlu1 %3198 }
0x2109   :  { %v3201_v22 = vadd.f32 %v3199_v27, %v3191_v60 }
0x210b   :  { %v3211_v46 = vadd.f32 %v3209_v20, %v3201_v22 }
0x210c   :  { %v3250_v13 = vpop.permute.xlu1 %3249 }
0x210d   :  { %v3261_v55 = vpop.permute.xlu0 %3260  ;;  %v3217_v21 = vadd.f32 %v3216_v61, %v3211_v46  ;;  %v3252_v33 = vmul.f32 %v3250_v13, %v5832_v49 }
0x210f   :  { %v3227_v42 = vadd.f32 %v3225_v6, %v3217_v21 }
0x2110   :  { %v3235_v41 = vpop.permute.xlu1 %3234 }
0x2111   :  { %v3237_v23 = vadd.f32 %v3235_v41, %v3227_v42 }
0x2112   :  { %v3281_v56 = vpop.permute.xlu0 %3280 }
0x2113   :  { %v3247_v59 = vadd.f32 %v3245_v45, %v3237_v23 }
0x2114   :  { %v3286_v32 = vpop.permute.xlu1 %3285 }
0x2115   :  { %v3253_v4 = vadd.f32 %v3252_v33, %v3247_v59  ;;  %v3288_v60 = vmul.f32 %v3286_v32, %v5845_v58 }
0x2117   :  { %v3297_v19 = vpop.permute.xlu0 %3296  ;;  %v3263_v37 = vadd.f32 %v3261_v55, %v3253_v4 }
0x2118   :  { %v3271_v47 = vpop.permute.xlu1 %3270 }
0x2119   :  { %v3273_v11 = vadd.f32 %v3271_v47, %v3263_v37 }
0x211b   :  { %v3283_v1 = vadd.f32 %v3281_v56, %v3273_v11 }
0x211c   :  { %v3317_v22 = vpop.permute.xlu0 %3316  ;;  %v3322_v26 = vpop.permute.xlu1 %3321 }
0x211d   :  { %v3289_v20 = vadd.f32 %v3288_v60, %v3283_v1  ;;  %v3324_v21 = vmul.f32 %v3322_v26, %v5858_v30 }
0x211f   :  { %v3299_v61 = vadd.f32 %v3297_v19, %v3289_v20 }
0x2120   :  { %v3307_v6 = vpop.permute.xlu1 %3306 }
0x2121   :  { %v3309_v27 = vadd.f32 %v3307_v6, %v3299_v61  ;;  %v3333_v46 = vpop.permute.xlu0 %3332 }
0x2123   :  { %v3319_v49 = vadd.f32 %v3317_v22, %v3309_v27 }
0x2124   :  { %v3358_v23 = vpop.permute.xlu1 %3357 }
0x2125   :  { %v3325_v45 = vadd.f32 %v3324_v21, %v3319_v49  ;;  %v3360_v33 = vmul.f32 %v3358_v23, %v5871_v44  ;;  %v6079_v21 = vmov 20  }
0x2126   :  { %v3353_v42 = vpop.permute.xlu0 %3352 }
0x2127   :  { %v3335_v13 = vadd.f32 %v3333_v46, %v3325_v45 }
0x2128   :  { %v3343_v55 = vpop.permute.xlu1 %3342 }
0x2129   :  { %v3345_v41 = vadd.f32 %v3343_v55, %v3335_v13 }
0x212b   :  { %v3355_v58 = vadd.f32 %v3353_v42, %v3345_v41  ;;  %v3369_v56 = vpop.permute.xlu0 %3368  ;;  %v6080_v41 = vmov 24  }
0x212c   :  { %v3394_v11 = vpop.permute.xlu1 %3393 }
0x212d   :  { %v3361_v59 = vadd.f32 %v3360_v33, %v3355_v58  ;;  %v3396_v30 = vmul.f32 %v3394_v11, %v5889_v57 }
0x212f   :  { %v3371_v32 = vadd.f32 %v3369_v56, %v3361_v59 }
0x2130   :  { %v3379_v4 = vpop.permute.xlu1 %3378  ;;  %v3389_v37 = vpop.permute.xlu0 %3388 }
0x2131   :  { %v3381_v19 = vadd.f32 %v3379_v4, %v3371_v32  ;;  %v6081_v4 = vmov 28  }
0x2133   :  { %v3391_v47 = vadd.f32 %v3389_v37, %v3381_v19 }
0x2135   :  { %v3397_v60 = vadd.f32 %v3396_v30, %v3391_v47  ;;  %v3405_v1 = vpop.permute.xlu1 %3404 }
0x2137   :  { %v3407_v26 = vadd.f32 %v3405_v1, %v3397_v60 }
0x213a   :  { %v3415_v22 = vpop.permute.xlu0 %3414 }
0x213b   :  { %v3417_v20 = vadd.f32 %v3415_v22, %v3407_v26 }
0x213f   :  { %v3425_v61 = vpop.permute.xlu1 %3424 }
0x2140   :  { %v3427_v6 = vadd.f32 %v3425_v61, %v3417_v20 }
0x2142   :  { %4619 = vtanh.f32 %v3427_v6 }
0x214c   :  { %v5905_v44 = vpop.eup %4619 }
0x214d   :  { %3447 = vperm.xlu1 %4427, %v5905_v44   ;;  %3437 = vperm.xlu0 %4426, %v5905_v44  }
0x2151   :  { %4428 = vset.pattern.permute.xlu1 %v4630_v8  ;;  %4429 = vset.pattern.permute.xlu0 %v4631_v10  ;;  %v6075_v8 = vmov 4   ;;  %v6076_v10 = vmov 12  }
0x2152   :  { %3457 = vperm.xlu1 %4428, %v5905_v44   ;;  %3473 = vperm.xlu0 %4429, %v5905_v44  }
0x2156   :  { %4430 = vset.pattern.permute.xlu1 %v4633_v15  ;;  %4432 = vset.pattern.permute.xlu0 %v4643_v35  ;;  %v4624_v15 = vld [vmem:[%s6054_s11 + $0x8] sm:$0xff] }
0x2157   :  { %3483 = vperm.xlu1 %4430, %v5905_v44   ;;  %3509 = vperm.xlu0 %4432, %v5905_v44  }
0x215b   :  { %4431 = vset.pattern.permute.xlu1 %v4634_v17  ;;  %4435 = vset.pattern.permute.xlu0 %v4647_v3  ;;  %v6077_v17 = vsub.s32 0, %v5357_v51 }
0x215c   :  { %3493 = vperm.xlu1 %4431, %v5905_v44   ;;  %3545 = vperm.xlu0 %4435, %v5905_v44  }
0x2160   :  { %4433 = vset.pattern.permute.xlu1 %v4640_v50  ;;  %4438 = vset.pattern.permute.xlu0 %v4649_v54  ;;  %v1308_v50 = vrot.slane %v4624_v15, %v6077_v17 }
0x2161   :  { %3519 = vperm.xlu1 %4433, %v5905_v44   ;;  %3581 = vperm.xlu0 %4438, %v5905_v44  }
0x2165   :  { %4434 = vset.pattern.permute.xlu1 %v4645_v25  ;;  %4441 = vset.pattern.permute.xlu0 %v4651_v62 }
0x2166   :  { %3529 = vperm.xlu1 %4434, %v5905_v44   ;;  %3617 = vperm.xlu0 %4441, %v5905_v44  }
0x216a   :  { %4436 = vset.pattern.permute.xlu1 %v4641_v31  ;;  %4444 = vset.pattern.permute.xlu0 %v4653_v40 }
0x216b   :  { %3555 = vperm.xlu1 %4436, %v5905_v44   ;;  %3653 = vperm.xlu0 %4444, %v5905_v44  }
0x216f   :  { %4437 = vset.pattern.permute.xlu1 %v4648_v36  ;;  %4447 = vset.pattern.permute.xlu0 %v4655_v7 }
0x2170   :  { %3565 = vperm.xlu1 %4437, %v5905_v44   ;;  %3689 = vperm.xlu0 %4447, %v5905_v44  }
0x2174   :  { %4439 = vset.pattern.permute.xlu1 %v4642_v28  ;;  %4450 = vset.pattern.permute.xlu0 %v4657_v52 }
0x2175   :  { %3591 = vperm.xlu1 %4439, %v5905_v44   ;;  %3709 = vperm.xlu0 %4450, %v5905_v44  }
0x2179   :  { %4440 = vset.pattern.permute.xlu1 %v4650_v63  ;;  %4452 = vset.pattern.permute.xlu0 %v4658_v48 }
0x217a   :  { %3601 = vperm.xlu1 %4440, %v5905_v44  }
0x217e   :  { %4442 = vset.pattern.permute.xlu1 %v4644_v2 }
0x217f   :  { %3627 = vperm.xlu1 %4442, %v5905_v44  }
0x2183   :  { %4443 = vset.pattern.permute.xlu1 %v4652_v38 }
0x2184   :  { %3637 = vperm.xlu1 %4443, %v5905_v44  }
0x2188   :  { %4445 = vset.pattern.permute.xlu1 %v4646_v39 }
0x2189   :  { %3663 = vperm.xlu1 %4445, %v5905_v44  }
0x218d   :  { %4446 = vset.pattern.permute.xlu1 %v4654_v5 }
0x218e   :  { %3673 = vperm.xlu1 %4446, %v5905_v44  }
0x2192   :  { %4448 = vset.pattern.permute.xlu1 %v4625_v0  ;;  %v5965_v0 = vadd.f32 %v5390_v12, %v1308_v50 }
0x2193   :  { %3431 = vperm.xlu1 %4448, %v5905_v44  }
0x2197   :  { %4449 = vset.pattern.permute.xlu1 %v4656_v53  ;;  %v6078_v53 = vmov 16  }
0x2198   :  { %3699 = vperm.xlu1 %4449, %v5905_v44  }
0x219c   :  { %4451 = vset.pattern.permute.xlu1 %v6075_v8 }
0x219d   :  { %3467 = vperm.xlu1 %4451, %v5905_v44  }
0x21a1   :  { %4453 = vset.pattern.permute.xlu1 %v6076_v10 }
0x21cc   :  { %v3448_v31 = vpop.permute.xlu1 %3447  ;;  %v3438_v28 = vpop.permute.xlu0 %3437 }
0x21cd   :  { %v3450_v35 = vmul.f32 %v3448_v31, %v5965_v0  ;;  %v3440_v2 = vmul.f32 %v3438_v28, %v5965_v0 }
0x21cf   :  { %3452 = vrot.lane.b32.xlu0 %v3450_v35, %s4637_s17  ;;  %3442 = vrot.lane.b32.xlu1 %v3440_v2, %s4638_s20 }
0x21d1   :  { %v3458_v25 = vpop.permute.xlu1 %3457  ;;  %v3474_v3 = vpop.permute.xlu0 %3473 }
0x21d2   :  { %v3460_v39 = vmul.f32 %v3458_v25, %v5965_v0  ;;  %v3476_v51 = vmul.f32 %v3474_v3, %v5394_v43 }
0x21d3   :  { %3503 = vperm.xlu0 %4452, %v5905_v44  }
0x21d4   :  { %3462 = vrot.lane.b32.xlu1 %v3460_v39, %s4639_s7 }
0x21d6   :  { %v3484_v12 = vpop.permute.xlu1 %3483  ;;  %v3510_v62 = vpop.permute.xlu0 %3509 }
0x21d7   :  { %4458 = vset.pattern.permute.xlu0 %v4657_v52  ;;  %v3486_v36 = vmul.f32 %v3484_v12, %v5394_v43  ;;  %v3512_v38 = vmul.f32 %v3510_v62, %v5392_v16 }
0x21d8   :  { %3478 = vrot.lane.b32.xlu1 %v3476_v51, %s4638_s20 }
0x21db   :  { %v3494_v54 = vpop.permute.xlu1 %3493  ;;  %v3546_v48 = vpop.permute.xlu0 %3545 }
0x21dc   :  { %v3496_v63 = vmul.f32 %v3494_v54, %v5394_v43  ;;  %3488 = vrot.lane.b32.xlu1 %v3486_v36, %s4637_s17  ;;  %v3548_v57 = vmul.f32 %v3546_v48, %v5396_v34 }
0x21de   :  { %3498 = vrot.lane.b32.xlu0 %v3496_v63, %s4639_s7 }
0x21e0   :  { %v3520_v40 = vpop.permute.xlu1 %3519  ;;  %3539 = vperm.xlu1 %4453, %v5905_v44   ;;  %v3582_v45 = vpop.permute.xlu0 %3581 }
0x21e1   :  { %v3522_v5 = vmul.f32 %v3520_v40, %v5392_v16  ;;  %v3584_v13 = vmul.f32 %v3582_v45, %v5407_v24 }
0x21e2   :  { %3514 = vrot.lane.b32.xlu0 %v3512_v38, %s4638_s20 }
0x21e4   :  { %3524 = vrot.lane.b32.xlu1 %v3522_v5, %s4637_s17 }
0x21e5   :  { %v3530_v7 = vpop.permute.xlu1 %3529  ;;  %4454 = vset.pattern.permute.xlu1 %v6078_v53  ;;  %v3618_v11 = vpop.permute.xlu0 %3617 }
0x21e6   :  { %v3532_v52 = vmul.f32 %v3530_v7, %v5392_v16  ;;  %v3620_v56 = vmul.f32 %v3618_v11, %v5411_v9 }
0x21e8   :  { %3575 = vperm.xlu1 %4454, %v5905_v44   ;;  %3534 = vrot.lane.b32.xlu0 %v3532_v52, %s4639_s7 }
0x21ea   :  { %v3556_v27 = vpop.permute.xlu1 %3555  ;;  %v3654_v19 = vpop.permute.xlu0 %3653 }
0x21eb   :  { %v3558_v46 = vmul.f32 %v3556_v27, %v5396_v34  ;;  %v3656_v30 = vmul.f32 %v3654_v19, %v5409_v29 }
0x21ec   :  { %3550 = vrot.lane.b32.xlu0 %v3548_v57, %s4638_s20  ;;  %4455 = vset.pattern.permute.xlu1 %v6079_v21 }
0x21ed   :  { %3560 = vrot.lane.b32.xlu1 %v3558_v46, %s4637_s17 }
0x21ef   :  { %v3566_v49 = vpop.permute.xlu1 %3565  ;;  %v3690_v60 = vpop.permute.xlu0 %3689 }
0x21f0   :  { %v3568_v23 = vmul.f32 %v3566_v49, %v5396_v34  ;;  %v3692_v26 = vmul.f32 %v3690_v60, %v5413_v14 }
0x21f1   :  { %3611 = vperm.xlu1 %4455, %v5905_v44  }
0x21f2   :  { %3570 = vrot.lane.b32.xlu0 %v3568_v23, %s4639_s7 }
0x21f4   :  { %v3592_v42 = vpop.permute.xlu1 %3591  ;;  %v3710_v61 = vpop.permute.xlu0 %3709 }
0x21f5   :  { %v3594_v55 = vmul.f32 %v3592_v42, %v5407_v24  ;;  %4456 = vset.pattern.permute.xlu1 %v6080_v41 }
0x21f6   :  { %3586 = vrot.lane.b32.xlu0 %v3584_v13, %s4638_s20 }
0x21f7   :  { %3596 = vrot.lane.b32.xlu1 %v3594_v55, %s4637_s17 }
0x21f9   :  { %v3602_v33 = vpop.permute.xlu1 %3601 }
0x21fa   :  { %v3604_v58 = vmul.f32 %v3602_v33, %v5407_v24 }
0x21fb   :  { %3647 = vperm.xlu1 %4456, %v5905_v44  }
0x21fc   :  { %3606 = vrot.lane.b32.xlu0 %v3604_v58, %s4639_s7 }
0x21fe   :  { %v3628_v59 = vpop.permute.xlu1 %3627 }
0x21ff   :  { %v3630_v32 = vmul.f32 %v3628_v59, %v5411_v9  ;;  %4457 = vset.pattern.permute.xlu1 %v6081_v4 }
0x2200   :  { %3622 = vrot.lane.b32.xlu0 %v3620_v56, %s4638_s20 }
0x2201   :  { %3632 = vrot.lane.b32.xlu1 %v3630_v32, %s4637_s17 }
0x2203   :  { %v3638_v37 = vpop.permute.xlu1 %3637 }
0x2204   :  { %v3640_v47 = vmul.f32 %v3638_v37, %v5411_v9 }
0x2205   :  { %3683 = vperm.xlu1 %4457, %v5905_v44   ;;  %v3712_v44 = vmul.f32 %v3710_v61, %v5413_v14 }
0x2206   :  { %3642 = vrot.lane.b32.xlu0 %v3640_v47, %s4639_s7 }
0x2208   :  { %v3664_v1 = vpop.permute.xlu1 %3663 }
0x2209   :  { %v3666_v22 = vmul.f32 %v3664_v1, %v5409_v29 }
0x220a   :  { %3658 = vrot.lane.b32.xlu0 %v3656_v30, %s4638_s20 }
0x220b   :  { %3668 = vrot.lane.b32.xlu1 %v3666_v22, %s4637_s17 }
0x220d   :  { %v3674_v20 = vpop.permute.xlu1 %3673 }
0x220e   :  { %v3676_v6 = vmul.f32 %v3674_v20, %v5409_v29 }
0x220f   :  { %3694 = vrot.lane.b32.xlu1 %v3692_v26, %s4638_s20 }
0x2210   :  { %3678 = vrot.lane.b32.xlu0 %v3676_v6, %s4639_s7 }
0x2212   :  { %v3432_v8 = vpop.permute.xlu1 %3431 }
0x2213   :  { %3714 = vrot.lane.b32.xlu1 %v3712_v44, %s4639_s7  ;;  %v3434_v31 = vmul.f32 %v3432_v8, %v5965_v0 }
0x2217   :  { %v3700_v10 = vpop.permute.xlu1 %3699 }
0x2218   :  { %v3702_v15 = vmul.f32 %v3700_v10, %v5413_v14 }
0x221a   :  { %3704 = vrot.lane.b32.xlu0 %v3702_v15, %s4637_s17 }
0x221c   :  { %v3468_v17 = vpop.permute.xlu1 %3467 }
0x221d   :  { %v3470_v51 = vmul.f32 %v3468_v17, %v5394_v43 }
0x2241   :  { %v3443_v50 = vpop.permute.xlu1 %3442  ;;  %v3453_v35 = vpop.permute.xlu0 %3452 }
0x2242   :  { %v3445_v28 = vadd.f32 %v3443_v50, %v3434_v31 }
0x2244   :  { %v3455_v25 = vadd.f32 %v3453_v35, %v3445_v28 }
0x2246   :  { %v3463_v2 = vpop.permute.xlu1 %3462 }
0x2247   :  { %v3465_v39 = vadd.f32 %v3463_v2, %v3455_v25  ;;  %v3784_v2 = vld [vmem:[%s6056_s15] ss:$0 sm:$0xff] }
0x2249   :  { %v3471_v12 = vadd.f32 %v3470_v51, %v3465_v39 }
0x224a   :  { %v3479_v3 = vpop.permute.xlu1 %3478 }
0x224b   :  { %v3481_v63 = vadd.f32 %v3479_v3, %v3471_v12  ;;  %v1140_v3 = vadd.f32 %v3784_v2, %v5232_v18 }
0x224e   :  { %v3489_v54 = vpop.permute.xlu1 %3488 }
0x224f   :  { %v3491_v38 = vadd.f32 %v3489_v54, %v3481_v63 }
0x2252   :  { %v3504_v36 = vpop.permute.xlu0 %3503 }
0x2253   :  { %v3506_v7 = vmul.f32 %v3504_v36, %v5392_v16 }
0x2256   :  { %v3499_v62 = vpop.permute.xlu0 %3498 }
0x2257   :  { %v3501_v40 = vadd.f32 %v3499_v62, %v3491_v38 }
0x2259   :  { %v3507_v53 = vadd.f32 %v3506_v7, %v3501_v40 }
0x225a   :  { %v3515_v5 = vpop.permute.xlu0 %3514 }
0x225b   :  { %v3517_v48 = vadd.f32 %v3515_v5, %v3507_v53 }
0x225e   :  { %v3535_v0 = vpop.permute.xlu0 %3534 }
0x225f   :  { %v3540_v52 = vpop.permute.xlu1 %3539 }
0x2260   :  { %v3542_v21 = vmul.f32 %v3540_v52, %v5396_v34 }
0x2262   :  { %v3551_v27 = vpop.permute.xlu0 %3550 }
0x2263   :  { %v3525_v57 = vpop.permute.xlu1 %3524 }
0x2264   :  { %v3527_v46 = vadd.f32 %v3525_v57, %v3517_v48 }
0x2266   :  { %v3537_v43 = vadd.f32 %v3535_v0, %v3527_v46  ;;  %v3571_v45 = vpop.permute.xlu0 %3570 }
0x2267   :  { %v3576_v49 = vpop.permute.xlu1 %3575 }
0x2268   :  { %v3543_v23 = vadd.f32 %v3542_v21, %v3537_v43  ;;  %v3578_v41 = vmul.f32 %v3576_v49, %v5407_v24 }
0x226a   :  { %v3553_v13 = vadd.f32 %v3551_v27, %v3543_v23  ;;  %v3587_v16 = vpop.permute.xlu0 %3586 }
0x226b   :  { %v3561_v42 = vpop.permute.xlu1 %3560 }
0x226c   :  { %v3563_v55 = vadd.f32 %v3561_v42, %v3553_v13 }
0x226e   :  { %v3573_v33 = vadd.f32 %v3571_v45, %v3563_v55  ;;  %v3607_v4 = vpop.permute.xlu0 %3606 }
0x2270   :  { %v3612_v58 = vpop.permute.xlu1 %3611  ;;  %v3579_v11 = vadd.f32 %v3578_v41, %v3573_v33 }
0x2271   :  { %v3614_v19 = vmul.f32 %v3612_v58, %v5411_v9 }
0x2272   :  { %v3589_v56 = vadd.f32 %v3587_v16, %v3579_v11  ;;  %v3623_v30 = vpop.permute.xlu0 %3622 }
0x2274   :  { %v3597_v59 = vpop.permute.xlu1 %3596 }
0x2275   :  { %v3599_v32 = vadd.f32 %v3597_v59, %v3589_v56 }
0x2277   :  { %v3609_v34 = vadd.f32 %v3607_v4, %v3599_v32 }
0x2278   :  { %v3643_v26 = vpop.permute.xlu0 %3642 }
0x2279   :  { %v3615_v37 = vadd.f32 %v3614_v19, %v3609_v34 }
0x227a   :  { %v3648_v47 = vpop.permute.xlu1 %3647 }
0x227b   :  { %v3625_v60 = vadd.f32 %v3623_v30, %v3615_v37  ;;  %v3650_v24 = vmul.f32 %v3648_v47, %v5409_v29 }
0x227c   :  { %v3659_v44 = vpop.permute.xlu0 %3658 }
0x227e   :  { %v3633_v1 = vpop.permute.xlu1 %3632 }
0x227f   :  { %v3635_v22 = vadd.f32 %v3633_v1, %v3625_v60 }
0x2281   :  { %v3645_v20 = vadd.f32 %v3643_v26, %v3635_v22 }
0x2282   :  { %v3679_v17 = vpop.permute.xlu0 %3678 }
0x2283   :  { %v3651_v61 = vadd.f32 %v3650_v24, %v3645_v20 }
0x2284   :  { %v3684_v6 = vpop.permute.xlu1 %3683 }
0x2285   :  { %v3661_v8 = vadd.f32 %v3659_v44, %v3651_v61  ;;  %v3686_v9 = vmul.f32 %v3684_v6, %v5413_v14 }
0x2288   :  { %v3669_v10 = vpop.permute.xlu1 %3668 }
0x2289   :  { %v3671_v15 = vadd.f32 %v3669_v10, %v3661_v8 }
0x228b   :  { %v3681_v50 = vadd.f32 %v3679_v17, %v3671_v15 }
0x228c   :  { %v3695_v31 = vpop.permute.xlu1 %3694  ;;  %v3705_v25 = vpop.permute.xlu0 %3704 }
0x228d   :  { %v3687_v28 = vadd.f32 %v3686_v9, %v3681_v50 }
0x228f   :  { %v3697_v35 = vadd.f32 %v3695_v31, %v3687_v28 }
0x2290   :  { %v3715_v39 = vpop.permute.xlu1 %3714 }
0x2291   :  { %v3707_v29 = vadd.f32 %v3705_v25, %v3697_v35 }
0x2293   :  { %v3717_v51 = vadd.f32 %v3715_v39, %v3707_v29 }
0x2295   :  { %v3718_v12 = vmul.f32 %v3717_v51, %v1140_v3 }
0x2297   :  { %v3720_v36 = vsel %vm3719_vm5, %v3718_v12, 0.0 }
0x2298   :  { %3721 = vadd.xlane.f32.xlu0 %v3720_v36 }
0x2325   :  { %v3722_v54 = vpop.xlane.xlu0 %3721 }
0x2326   :  { %3723 = vst [vmem:[%s6057_s16] sm:$0xf] %v3722_v54 }

</bundles_post_ra>
